<compile_context>
chip_gen: v5e
topology: v5e:2x2
jax: 0.10.0
libtpu: 0.0.40
codegen_flags: <defaults>
</compile_context>

<pallas_src>
import jax
import jax.numpy as jnp
from jax.experimental import pallas as pl
from jax.experimental.pallas import tpu as pltpu


# ----------------------------- activations ----------------------------------
def _elu(x):
    return jnp.where(x > 0, x, jnp.exp(jnp.minimum(x, 0.0)) - 1.0)


def _relu(x):
    return jnp.maximum(x, 0.0)


def _sigmoid(x):
    # Stable sigmoid; tanh goes to the EUP (free slot), no full-precision divide.
    return 0.5 * (jnp.tanh(0.5 * x) + 1.0)


# --------------------------- fused Pallas kernel -----------------------------
def _build_fused_kernel(*, CHW, hidden, att_layers, K):
    """One invocation runs all K steps for the whole batch.

    State layout: (B*N, C*HW) rows = (batch, node); columns = channel-major
    flattened pixels (c*HW + y*W + x) -> everything is lane-dense.
    """

    def kernel(x_ref, m1_ref, m2_ref, m3_ref, mmix_ref, gi_ref, gj_ref,
               agg_ref, const_ref, attw_ref, attb_ref, o_ref):
        f32 = jnp.float32

        M1 = m1_ref[...]            # (CHW, 4*CHW + 2*hidden)
        M2 = m2_ref[...]            # (CHW, 3*CHW)
        M3 = m3_ref[...]            # (CHW, CHW)
        Mmix = mmix_ref[...]        # (2*CHW, CHW)
        Mmix_a = Mmix[0:CHW, :]
        Mmix_b = Mmix[CHW:2 * CHW, :]
        Gi = gi_ref[...]            # (B*E, B*N)  one-hot: edge -> target node i
        Gj = gj_ref[...]            # (B*E, B*N)  one-hot: edge -> source node j
        Agg = agg_ref[...]          # (B*N, B*E)  = Gi^T  (scatter-add)
        cr = const_ref[...]         # (8, 2*CHW) packed constants (rows)
        b_local = cr[0:1, 0:CHW]
        b_fm = cr[1:2, 0:CHW]
        b_zr = cr[2:3, :]           # (1, 2*CHW)
        b_h = cr[3:4, 0:CHW]
        s_gate = cr[4:5, 0:CHW]
        gate_b = cr[5:6, 0:CHW]
        mix_b = cr[6:7, 0:CHW]
        attW = attw_ref[...]        # (hidden, (att_layers-1)*hidden + 1)
        attB = attb_ref[...]        # (1, att_layers*hidden + 1)

        X = x_ref[...]              # (B*N, CHW)

        for _t in range(K):         # K is small & static -> unrolled
            # fused conv pass on X_prev: LocalCA | f_M | GRU-zr hidden part,
            # plus the folded mean -> f_Q/f_K -> first-attention projections.
            y1 = jnp.dot(X, M1, preferred_element_type=f32)
            x_local = _elu(y1[:, 0:CHW] + b_local)
            m_msg = y1[:, CHW:2 * CHW] + b_fm
            zr_h = y1[:, 2 * CHW:4 * CHW]
            proj_q = y1[:, 4 * CHW:4 * CHW + hidden]
            proj_k = y1[:, 4 * CHW + hidden:4 * CHW + 2 * hidden]

            # attention MLP over edges (one-hot gathers via MXU, no edge loop)
            h = _relu(jnp.dot(Gi, proj_q, preferred_element_type=f32)
                      + jnp.dot(Gj, proj_k, preferred_element_type=f32)
                      + attB[:, 0:hidden])
            for l in range(1, att_layers):
                Wl = attW[:, (l - 1) * hidden:l * hidden]
                bl = attB[:, l * hidden:(l + 1) * hidden]
                h = _relu(jnp.dot(h, Wl, preferred_element_type=f32) + bl)
            e_vals = (jnp.dot(
                h, attW[:, (att_layers - 1) * hidden:(att_layers - 1) * hidden + 1],
                preferred_element_type=f32)
                + attB[:, att_layers * hidden:att_layers * hidden + 1])  # (BE,1)

            # gated message aggregation: GateConv on a spatially-constant map
            # is exactly sigmoid(e_ij * S + gate_b) (border-aware template S).
            g = _sigmoid(e_vals * s_gate + gate_b)                  # (BE, CHW)
            msgs = jnp.dot(Gj, m_msg, preferred_element_type=f32)   # (BE, CHW)
            m_agg = jnp.dot(Agg, g * msgs, preferred_element_type=f32)

            # ConvGRU (input = m_agg, hidden = X_prev)
            # TODO(synk): ConvGRUCell conventions assumed (see header).
            y2 = jnp.dot(m_agg, M2, preferred_element_type=f32)     # (BN, 3CHW)
            zr = _sigmoid(zr_h + y2[:, 0:2 * CHW] + b_zr)
            z = zr[:, 0:CHW]
            r = zr[:, CHW:2 * CHW]
            y3 = jnp.dot(r * X, M3, preferred_element_type=f32)
            h_til = jnp.tanh(y3 + y2[:, 2 * CHW:3 * CHW] + b_h)
            h_new = (1.0 - z) * X + z * h_til

            # mix 1x1 over concat([local, graph]) channels (kron'd weights)
            X = (jnp.dot(x_local, Mmix_a, preferred_element_type=f32)
                 + jnp.dot(h_new, Mmix_b, preferred_element_type=f32)
                 + mix_b)

        o_ref[...] = X.astype(o_ref.dtype)

    return kernel


# ----------------------- conv-as-matmul weight folding -----------------------
def _conv3x3_as_matrix(w, H, W):
    """(3,3,Cin,Cout) zero-'same'-padded conv -> dense (Cin*HW, Cout*HW) matrix
    acting on channel-major flattened rows: out_flat = x_flat @ M."""
    HW = H * W
    Cin = w.shape[2]
    Cout = w.shape[3]
    M = jnp.zeros((Cin * HW, Cout * HW), jnp.float32)
    for ky in range(3):
        for kx in range(3):
            shift = jnp.kron(jnp.eye(H, k=-(ky - 1), dtype=jnp.float32),
                             jnp.eye(W, k=-(kx - 1), dtype=jnp.float32))
            M = M + jnp.kron(w[ky, kx].astype(jnp.float32), shift)
    return M


# --------------------------- parameter init ----------------------------------
def init_params(key, C, d, hidden, layers):
    n_keys = 20 + 2 * (layers + 1)
    keys = iter(jax.random.split(key, n_keys))
    s = 0.1

    def nrm(shape):
        return jax.random.normal(next(keys), shape, jnp.float32) * s

    p = {
        "local_w": nrm((3, 3, C, C)), "local_b": nrm((C,)),
        "fq_w": nrm((C, d)), "fq_b": nrm((d,)),
        "fk_w": nrm((C, d)), "fk_b": nrm((d,)),
        "fm_w": nrm((3, 3, C, C)), "fm_b": nrm((C,)),
        "gate_w": nrm((3, 3, 1, C)), "gate_b": nrm((C,)),
        "gru_zr_w": nrm((3, 3, 2 * C, 2 * C)), "gru_zr_b": nrm((2 * C,)),
        "gru_h_w": nrm((3, 3, 2 * C, C)), "gru_h_b": nrm((C,)),
        "mix_w": nrm((2 * C, C)), "mix_b": nrm((C,)),
    }
    # ConcatMLP: `layers` hidden Linear+ReLU blocks, then Linear(hidden -> 1).
    att_w, att_b = [], []
    in_dim = 2 * d
    for _ in range(layers):
        att_w.append(nrm((in_dim, hidden)))
        att_b.append(nrm((hidden,)))
        in_dim = hidden
    att_w.append(nrm((in_dim, 1)))
    att_b.append(nrm((1,)))
    p["att_w"], p["att_b"] = att_w, att_b
    return p


# ------------------------------ forward --------------------------------------
def graph_nca_forward(params, seed, edge_index, *, C, H, W, d, K):
    B, C_in, PH, PW = seed.shape
    assert C_in == C and PH % H == 0 and PW % W == 0
    P = PH // H
    N = P * P
    HW = H * W
    CHW = C * HW
    BN = B * N
    edges = tuple((int(i), int(j)) for i, j in edge_index)
    E = len(edges)
    att_w, att_b = params["att_w"], params["att_b"]
    att_layers = len(att_w) - 1
    hidden = att_w[0].shape[1]
    assert att_layers >= 1
    f32 = jnp.float32

    # ---- NCHW canvas -> lane-dense (B*N, C*HW) channel-major patch state ------
    Xp = (seed.reshape(B, C, P, H, P, W)
              .transpose(0, 2, 4, 1, 3, 5)            # (B, Prow, Pcol, C, H, W)
              .reshape(BN, CHW))
    X0 = jnp.clip(Xp, -10.0, 10.0).astype(f32)

    # ---- fold every 3x3 conv group into ONE dense matrix (weights only) -------
    M_local = _conv3x3_as_matrix(params["local_w"], H, W)
    M_fm = _conv3x3_as_matrix(params["fm_w"], H, W)
    M_zr_h = _conv3x3_as_matrix(params["gru_zr_w"][:, :, C:, :], H, W)
    M_zr_x = _conv3x3_as_matrix(params["gru_zr_w"][:, :, :C, :], H, W)
    M_cand_x = _conv3x3_as_matrix(params["gru_h_w"][:, :, :C, :], H, W)
    M_cand_h = _conv3x3_as_matrix(params["gru_h_w"][:, :, C:, :], H, W)

    # spatial mean + f_Q/f_K 1x1 + first attention layer, folded (all linear)
    A1q, A1k = att_w[0][:d, :], att_w[0][d:, :]
    mean_mat = jnp.kron(jnp.eye(C, dtype=f32), jnp.ones((HW, 1), f32)) / HW
    MQ = mean_mat @ params["fq_w"] @ A1q               # (CHW, hidden)
    MK = mean_mat @ params["fk_w"] @ A1k

    M1 = jnp.concatenate([M_local, M_fm, M_zr_h, MQ, MK], axis=1)
    M2 = jnp.concatenate([M_zr_x, M_cand_x], axis=1)
    M3 = M_cand_h
    Mmix = jnp.kron(params["mix_w"].astype(f32), jnp.eye(HW, dtype=f32))

    # ---- one-hot edge gather / scatter matrices (batch folded into rows) ------
    src = jnp.asarray([i for i, _ in edges], jnp.int32)   # aggregation target / q
    dst = jnp.asarray([j for _, j in edges], jnp.int32)   # message source   / k
    b_of = jnp.repeat(jnp.arange(B, dtype=jnp.int32), E)
    Gi = jax.nn.one_hot(b_of * N + jnp.tile(src, B), BN, dtype=f32)   # (BE, BN)
    Gj = jax.nn.one_hot(b_of * N + jnp.tile(dst, B), BN, dtype=f32)
    Agg = Gi.T                                                        # (BN, BE)

    # ---- GateConv on a constant map == sigmoid(e*S + gate_b): template S ------
    # TODO(synk): GateConv assumed Conv2d(1->C, 3x3, pad=1, zero pad) + sigmoid.
    gw = params["gate_w"]                                             # (3,3,1,C)
    ones_pad = jnp.pad(jnp.ones((H, W), f32), ((1, 1), (1, 1)))
    S = sum(ones_pad[ky:ky + H, kx:kx + W][..., None] * gw[ky, kx, 0, :]
            for ky in range(3) for kx in range(3))                    # (H, W, C)
    s_gate_flat = jnp.transpose(S, (2, 0, 1)).reshape(CHW)

    # ---- packed per-channel constants, broadcast-ready rows -------------------
    width = 2 * CHW

    def row(v):
        v = v.astype(f32).reshape(-1)
        return jnp.pad(v, (0, width - v.shape[0]))[None, :]

    const_rows = jnp.concatenate([
        row(jnp.repeat(params["local_b"], HW)),
        row(jnp.repeat(params["fm_b"], HW)),
        row(jnp.repeat(params["gru_zr_b"], HW)),
        row(jnp.repeat(params["gru_h_b"], HW)),
        row(s_gate_flat),
        row(jnp.repeat(params["gate_b"], HW)),
        row(jnp.repeat(params["mix_b"], HW)),
        jnp.zeros((1, width), f32),
    ], axis=0)                                                        # (8, 2*CHW)

    # ---- packed attention params (first layer already folded into M1) ---------
    attW = jnp.concatenate([att_w[l] for l in range(1, att_layers)]
                           + [att_w[-1]], axis=1)      # (hidden, (L-1)*hidden+1)
    b1p = params["fq_b"] @ A1q + params["fk_b"] @ A1k + att_b[0]
    attB = jnp.concatenate([b1p]
                           + [att_b[l] for l in range(1, att_layers)]
                           + [att_b[-1]])[None, :]     # (1, L*hidden+1)

    inputs = (X0, M1, M2, M3, Mmix, Gi, Gj, Agg, const_rows, attW, attB)

    kernel = _build_fused_kernel(CHW=CHW, hidden=hidden,
                                 att_layers=att_layers, K=K)

    vmem = pl.BlockSpec(memory_space=pltpu.MemorySpace.VMEM)
    Xout = pl.pallas_call(
        kernel,
        out_shape=jax.ShapeDtypeStruct((BN, CHW), f32),
        in_specs=[vmem] * len(inputs),
        out_specs=vmem,
    )(*inputs)

    # ---- reassemble canvas + alive-mask postprocessing (cheap one-shot glue) ---
    canvas = (Xout.reshape(B, P, P, C, H, W)
                  .transpose(0, 3, 1, 4, 2, 5)          # (B, C, P, H, P, W)
                  .reshape(B, C, PH, PW))
    alive = jnp.clip(canvas[:, 0:1], 0.0, 1.0)
    rgb = canvas[:, 1:4] * alive
    if canvas.shape[1] > 4:
        out = jnp.concatenate([canvas[:, 0:1], rgb, canvas[:, 4:]], axis=1)
    else:
        out = jnp.concatenate([canvas[:, 0:1], rgb], axis=1)
    return out


# -------------------------------- main ----------------------------------------
if __name__ == "__main__":
    C, H, W = 4, 8, 8
    d, K = 8, 2
    attention_hidden, attention_layers = 16, 2
    B, P = 2, 2
    PH, PW = P * H, P * W

    key = jax.random.PRNGKey(0)
    k_param, k_seed = jax.random.split(key)
    params = init_params(k_param, C, d, attention_hidden, attention_layers)
    seed = jax.random.normal(k_seed, (B, C, PH, PW), jnp.float32)

    # bidirectional edges over the 2x2 patch grid (4-neighbourhood)
    edge_index = ((0, 1), (1, 0), (0, 2), (2, 0), (1, 3), (3, 1), (2, 3), (3, 2))

    fwd = jax.jit(lambda p, s: graph_nca_forward(
        p, s, edge_index, C=C, H=H, W=W, d=d, K=K))
    out = jax.block_until_ready(fwd(params, seed))
    assert out.shape == (B, C, PH, PW)
    assert bool(jnp.all(jnp.isfinite(out)))
    print("KERNEL_OK")
</pallas_src>

<mosaic_0001>
module attributes {stable_mosaic.version = 11 : i64} {
  func.func @kernel(%arg0: memref<8x256xf32, #tpu.memory_space<vmem>>, %arg1: memref<256x1056xf32, #tpu.memory_space<vmem>>, %arg2: memref<256x768xf32, #tpu.memory_space<vmem>>, %arg3: memref<256x256xf32, #tpu.memory_space<vmem>>, %arg4: memref<512x256xf32, #tpu.memory_space<vmem>>, %arg5: memref<16x8xf32, #tpu.memory_space<vmem>>, %arg6: memref<16x8xf32, #tpu.memory_space<vmem>>, %arg7: memref<8x16xf32, #tpu.memory_space<vmem>>, %arg8: memref<8x512xf32, #tpu.memory_space<vmem>>, %arg9: memref<16x17xf32, #tpu.memory_space<vmem>>, %arg10: memref<1x33xf32, #tpu.memory_space<vmem>>, %arg11: memref<8x256xf32, #tpu.memory_space<vmem>>) attributes {dimension_semantics = [], scalar_prefetch = 0 : i64, scratch_operands = 0 : i64, tpu.core_type = #tpu.core_type<tc>} {
    %c0 = arith.constant 0 : index
    %c0_0 = arith.constant 0 : index
    %0 = vector.load %arg1[%c0, %c0_0] : memref<256x1056xf32, #tpu.memory_space<vmem>>, vector<256x1056xf32>
    %c0_1 = arith.constant 0 : index
    %c0_2 = arith.constant 0 : index
    %1 = vector.load %arg2[%c0_1, %c0_2] : memref<256x768xf32, #tpu.memory_space<vmem>>, vector<256x768xf32>
    %c0_3 = arith.constant 0 : index
    %c0_4 = arith.constant 0 : index
    %2 = vector.load %arg3[%c0_3, %c0_4] : memref<256x256xf32, #tpu.memory_space<vmem>>, vector<256x256xf32>
    %c0_5 = arith.constant 0 : index
    %c0_6 = arith.constant 0 : index
    %3 = vector.load %arg4[%c0_5, %c0_6] : memref<512x256xf32, #tpu.memory_space<vmem>>, vector<512x256xf32>
    %4 = vector.extract_strided_slice %3 {offsets = [0, 0], sizes = [256, 256], strides = [1, 1]} : vector<512x256xf32> to vector<256x256xf32>
    %5 = vector.extract_strided_slice %3 {offsets = [256, 0], sizes = [256, 256], strides = [1, 1]} : vector<512x256xf32> to vector<256x256xf32>
    %c0_7 = arith.constant 0 : index
    %c0_8 = arith.constant 0 : index
    %6 = vector.load %arg5[%c0_7, %c0_8] : memref<16x8xf32, #tpu.memory_space<vmem>>, vector<16x8xf32>
    %c0_9 = arith.constant 0 : index
    %c0_10 = arith.constant 0 : index
    %7 = vector.load %arg6[%c0_9, %c0_10] : memref<16x8xf32, #tpu.memory_space<vmem>>, vector<16x8xf32>
    %c0_11 = arith.constant 0 : index
    %c0_12 = arith.constant 0 : index
    %8 = vector.load %arg7[%c0_11, %c0_12] : memref<8x16xf32, #tpu.memory_space<vmem>>, vector<8x16xf32>
    %c0_13 = arith.constant 0 : index
    %c0_14 = arith.constant 0 : index
    %9 = vector.load %arg8[%c0_13, %c0_14] : memref<8x512xf32, #tpu.memory_space<vmem>>, vector<8x512xf32>
    %10 = vector.extract_strided_slice %9 {offsets = [0, 0], sizes = [1, 256], strides = [1, 1]} : vector<8x512xf32> to vector<1x256xf32>
    %11 = vector.extract_strided_slice %9 {offsets = [1, 0], sizes = [1, 256], strides = [1, 1]} : vector<8x512xf32> to vector<1x256xf32>
    %12 = vector.extract_strided_slice %9 {offsets = [2, 0], sizes = [1, 512], strides = [1, 1]} : vector<8x512xf32> to vector<1x512xf32>
    %13 = vector.extract_strided_slice %9 {offsets = [3, 0], sizes = [1, 256], strides = [1, 1]} : vector<8x512xf32> to vector<1x256xf32>
    %14 = vector.extract_strided_slice %9 {offsets = [4, 0], sizes = [1, 256], strides = [1, 1]} : vector<8x512xf32> to vector<1x256xf32>
    %15 = vector.extract_strided_slice %9 {offsets = [5, 0], sizes = [1, 256], strides = [1, 1]} : vector<8x512xf32> to vector<1x256xf32>
    %16 = vector.extract_strided_slice %9 {offsets = [6, 0], sizes = [1, 256], strides = [1, 1]} : vector<8x512xf32> to vector<1x256xf32>
    %c0_15 = arith.constant 0 : index
    %c0_16 = arith.constant 0 : index
    %17 = vector.load %arg9[%c0_15, %c0_16] : memref<16x17xf32, #tpu.memory_space<vmem>>, vector<16x17xf32>
    %c0_17 = arith.constant 0 : index
    %c0_18 = arith.constant 0 : index
    %18 = vector.load %arg10[%c0_17, %c0_18] : memref<1x33xf32, #tpu.memory_space<vmem>>, vector<1x33xf32>
    %c0_19 = arith.constant 0 : index
    %c0_20 = arith.constant 0 : index
    %19 = vector.load %arg0[%c0_19, %c0_20] : memref<8x256xf32, #tpu.memory_space<vmem>>, vector<8x256xf32>
    %cst = arith.constant dense<0.000000e+00> : vector<8x1056xf32>
    %20 = tpu.matmul %19, %0, %cst {dimension_numbers = #tpu.dot_dimension_numbers<[1], [0], [0], [1], [0, 0, 1, 1], [], []>} : vector<8x256xf32>, vector<256x1056xf32>, vector<8x1056xf32> -> vector<8x1056xf32>
    %21 = vector.extract_strided_slice %20 {offsets = [0, 0], sizes = [8, 256], strides = [1, 1]} : vector<8x1056xf32> to vector<8x256xf32>
    %22 = vector.broadcast %10 : vector<1x256xf32> to vector<8x256xf32>
    %23 = arith.addf %21, %22 : vector<8x256xf32>
    %cst_21 = arith.constant 0.000000e+00 : f32
    %24 = vector.broadcast %cst_21 : f32 to vector<8x256xf32>
    %25 = arith.cmpf ogt, %23, %24 : vector<8x256xf32>
    %cst_22 = arith.constant 0.000000e+00 : f32
    %26 = vector.broadcast %cst_22 : f32 to vector<8x256xf32>
    %27 = arith.minimumf %23, %26 : vector<8x256xf32>
    %28 = math.exp %27 : vector<8x256xf32>
    %cst_23 = arith.constant 1.000000e+00 : f32
    %29 = vector.broadcast %cst_23 : f32 to vector<8x256xf32>
    %30 = arith.subf %28, %29 : vector<8x256xf32>
    %31 = arith.select %25, %23, %30 : vector<8x256xi1>, vector<8x256xf32>
    %32 = vector.extract_strided_slice %20 {offsets = [0, 256], sizes = [8, 256], strides = [1, 1]} : vector<8x1056xf32> to vector<8x256xf32>
    %33 = vector.broadcast %11 : vector<1x256xf32> to vector<8x256xf32>
    %34 = arith.addf %32, %33 : vector<8x256xf32>
    %35 = vector.extract_strided_slice %20 {offsets = [0, 512], sizes = [8, 512], strides = [1, 1]} : vector<8x1056xf32> to vector<8x512xf32>
    %36 = vector.extract_strided_slice %20 {offsets = [0, 1024], sizes = [8, 16], strides = [1, 1]} : vector<8x1056xf32> to vector<8x16xf32>
    %37 = vector.extract_strided_slice %20 {offsets = [0, 1040], sizes = [8, 16], strides = [1, 1]} : vector<8x1056xf32> to vector<8x16xf32>
    %cst_24 = arith.constant dense<0.000000e+00> : vector<16x16xf32>
    %38 = tpu.matmul %6, %36, %cst_24 {dimension_numbers = #tpu.dot_dimension_numbers<[1], [0], [0], [1], [0, 0, 1, 1], [], []>} : vector<16x8xf32>, vector<8x16xf32>, vector<16x16xf32> -> vector<16x16xf32>
    %cst_25 = arith.constant dense<0.000000e+00> : vector<16x16xf32>
    %39 = tpu.matmul %7, %37, %cst_25 {dimension_numbers = #tpu.dot_dimension_numbers<[1], [0], [0], [1], [0, 0, 1, 1], [], []>} : vector<16x8xf32>, vector<8x16xf32>, vector<16x16xf32> -> vector<16x16xf32>
    %40 = arith.addf %38, %39 : vector<16x16xf32>
    %41 = vector.extract_strided_slice %18 {offsets = [0, 0], sizes = [1, 16], strides = [1, 1]} : vector<1x33xf32> to vector<1x16xf32>
    %42 = vector.broadcast %41 : vector<1x16xf32> to vector<16x16xf32>
    %43 = arith.addf %40, %42 : vector<16x16xf32>
    %cst_26 = arith.constant 0.000000e+00 : f32
    %44 = vector.broadcast %cst_26 : f32 to vector<16x16xf32>
    %45 = arith.maximumf %43, %44 : vector<16x16xf32>
    %46 = vector.extract_strided_slice %17 {offsets = [0, 0], sizes = [16, 16], strides = [1, 1]} : vector<16x17xf32> to vector<16x16xf32>
    %47 = vector.extract_strided_slice %18 {offsets = [0, 16], sizes = [1, 16], strides = [1, 1]} : vector<1x33xf32> to vector<1x16xf32>
    %cst_27 = arith.constant dense<0.000000e+00> : vector<16x16xf32>
    %48 = tpu.matmul %45, %46, %cst_27 {dimension_numbers = #tpu.dot_dimension_numbers<[1], [0], [0], [1], [0, 0, 1, 1], [], []>} : vector<16x16xf32>, vector<16x16xf32>, vector<16x16xf32> -> vector<16x16xf32>
    %49 = vector.broadcast %47 : vector<1x16xf32> to vector<16x16xf32>
    %50 = arith.addf %48, %49 : vector<16x16xf32>
    %cst_28 = arith.constant 0.000000e+00 : f32
    %51 = vector.broadcast %cst_28 : f32 to vector<16x16xf32>
    %52 = arith.maximumf %50, %51 : vector<16x16xf32>
    %53 = vector.extract_strided_slice %17 {offsets = [0, 16], sizes = [16, 1], strides = [1, 1]} : vector<16x17xf32> to vector<16x1xf32>
    %cst_29 = arith.constant dense<0.000000e+00> : vector<16x1xf32>
    %54 = tpu.matmul %52, %53, %cst_29 {dimension_numbers = #tpu.dot_dimension_numbers<[1], [0], [0], [1], [0, 0, 1, 1], [], []>} : vector<16x16xf32>, vector<16x1xf32>, vector<16x1xf32> -> vector<16x1xf32>
    %55 = vector.extract_strided_slice %18 {offsets = [0, 32], sizes = [1, 1], strides = [1, 1]} : vector<1x33xf32> to vector<1x1xf32>
    %56 = vector.broadcast %55 : vector<1x1xf32> to vector<16x1xf32>
    %57 = arith.addf %54, %56 : vector<16x1xf32>
    %58 = vector.broadcast %57 : vector<16x1xf32> to vector<16x256xf32>
    %59 = vector.broadcast %14 : vector<1x256xf32> to vector<16x256xf32>
    %60 = arith.mulf %58, %59 : vector<16x256xf32>
    %61 = vector.broadcast %15 : vector<1x256xf32> to vector<16x256xf32>
    %62 = arith.addf %60, %61 : vector<16x256xf32>
    %cst_30 = arith.constant 5.000000e-01 : f32
    %63 = vector.broadcast %cst_30 : f32 to vector<16x256xf32>
    %64 = arith.mulf %63, %62 : vector<16x256xf32>
    %65 = math.tanh %64 : vector<16x256xf32>
    %cst_31 = arith.constant 1.000000e+00 : f32
    %66 = vector.broadcast %cst_31 : f32 to vector<16x256xf32>
    %67 = arith.addf %65, %66 : vector<16x256xf32>
    %cst_32 = arith.constant 5.000000e-01 : f32
    %68 = vector.broadcast %cst_32 : f32 to vector<16x256xf32>
    %69 = arith.mulf %68, %67 : vector<16x256xf32>
    %cst_33 = arith.constant dense<0.000000e+00> : vector<16x256xf32>
    %70 = tpu.matmul %7, %34, %cst_33 {dimension_numbers = #tpu.dot_dimension_numbers<[1], [0], [0], [1], [0, 0, 1, 1], [], []>} : vector<16x8xf32>, vector<8x256xf32>, vector<16x256xf32> -> vector<16x256xf32>
    %71 = arith.mulf %69, %70 : vector<16x256xf32>
    %cst_34 = arith.constant dense<0.000000e+00> : vector<8x256xf32>
    %72 = tpu.matmul %8, %71, %cst_34 {dimension_numbers = #tpu.dot_dimension_numbers<[1], [0], [0], [1], [0, 0, 1, 1], [], []>} : vector<8x16xf32>, vector<16x256xf32>, vector<8x256xf32> -> vector<8x256xf32>
    %cst_35 = arith.constant dense<0.000000e+00> : vector<8x768xf32>
    %73 = tpu.matmul %72, %1, %cst_35 {dimension_numbers = #tpu.dot_dimension_numbers<[1], [0], [0], [1], [0, 0, 1, 1], [], []>} : vector<8x256xf32>, vector<256x768xf32>, vector<8x768xf32> -> vector<8x768xf32>
    %74 = vector.extract_strided_slice %73 {offsets = [0, 0], sizes = [8, 512], strides = [1, 1]} : vector<8x768xf32> to vector<8x512xf32>
    %75 = arith.addf %35, %74 : vector<8x512xf32>
    %76 = vector.broadcast %12 : vector<1x512xf32> to vector<8x512xf32>
    %77 = arith.addf %75, %76 : vector<8x512xf32>
    %cst_36 = arith.constant 5.000000e-01 : f32
    %78 = vector.broadcast %cst_36 : f32 to vector<8x512xf32>
    %79 = arith.mulf %78, %77 : vector<8x512xf32>
    %80 = math.tanh %79 : vector<8x512xf32>
    %cst_37 = arith.constant 1.000000e+00 : f32
    %81 = vector.broadcast %cst_37 : f32 to vector<8x512xf32>
    %82 = arith.addf %80, %81 : vector<8x512xf32>
    %cst_38 = arith.constant 5.000000e-01 : f32
    %83 = vector.broadcast %cst_38 : f32 to vector<8x512xf32>
    %84 = arith.mulf %83, %82 : vector<8x512xf32>
    %85 = vector.extract_strided_slice %84 {offsets = [0, 0], sizes = [8, 256], strides = [1, 1]} : vector<8x512xf32> to vector<8x256xf32>
    %86 = vector.extract_strided_slice %84 {offsets = [0, 256], sizes = [8, 256], strides = [1, 1]} : vector<8x512xf32> to vector<8x256xf32>
    %87 = arith.mulf %86, %19 : vector<8x256xf32>
    %cst_39 = arith.constant dense<0.000000e+00> : vector<8x256xf32>
    %88 = tpu.matmul %87, %2, %cst_39 {dimension_numbers = #tpu.dot_dimension_numbers<[1], [0], [0], [1], [0, 0, 1, 1], [], []>} : vector<8x256xf32>, vector<256x256xf32>, vector<8x256xf32> -> vector<8x256xf32>
    %89 = vector.extract_strided_slice %73 {offsets = [0, 512], sizes = [8, 256], strides = [1, 1]} : vector<8x768xf32> to vector<8x256xf32>
    %90 = arith.addf %88, %89 : vector<8x256xf32>
    %91 = vector.broadcast %13 : vector<1x256xf32> to vector<8x256xf32>
    %92 = arith.addf %90, %91 : vector<8x256xf32>
    %93 = math.tanh %92 : vector<8x256xf32>
    %cst_40 = arith.constant 1.000000e+00 : f32
    %94 = vector.broadcast %cst_40 : f32 to vector<8x256xf32>
    %95 = arith.subf %94, %85 : vector<8x256xf32>
    %96 = arith.mulf %95, %19 : vector<8x256xf32>
    %97 = arith.mulf %85, %93 : vector<8x256xf32>
    %98 = arith.addf %96, %97 : vector<8x256xf32>
    %cst_41 = arith.constant dense<0.000000e+00> : vector<8x256xf32>
    %99 = tpu.matmul %31, %4, %cst_41 {dimension_numbers = #tpu.dot_dimension_numbers<[1], [0], [0], [1], [0, 0, 1, 1], [], []>} : vector<8x256xf32>, vector<256x256xf32>, vector<8x256xf32> -> vector<8x256xf32>
    %cst_42 = arith.constant dense<0.000000e+00> : vector<8x256xf32>
    %100 = tpu.matmul %98, %5, %cst_42 {dimension_numbers = #tpu.dot_dimension_numbers<[1], [0], [0], [1], [0, 0, 1, 1], [], []>} : vector<8x256xf32>, vector<256x256xf32>, vector<8x256xf32> -> vector<8x256xf32>
    %101 = arith.addf %99, %100 : vector<8x256xf32>
    %102 = vector.broadcast %16 : vector<1x256xf32> to vector<8x256xf32>
    %103 = arith.addf %101, %102 : vector<8x256xf32>
    %cst_43 = arith.constant dense<0.000000e+00> : vector<8x1056xf32>
    %104 = tpu.matmul %103, %0, %cst_43 {dimension_numbers = #tpu.dot_dimension_numbers<[1], [0], [0], [1], [0, 0, 1, 1], [], []>} : vector<8x256xf32>, vector<256x1056xf32>, vector<8x1056xf32> -> vector<8x1056xf32>
    %105 = vector.extract_strided_slice %104 {offsets = [0, 0], sizes = [8, 256], strides = [1, 1]} : vector<8x1056xf32> to vector<8x256xf32>
    %106 = vector.broadcast %10 : vector<1x256xf32> to vector<8x256xf32>
    %107 = arith.addf %105, %106 : vector<8x256xf32>
    %cst_44 = arith.constant 0.000000e+00 : f32
    %108 = vector.broadcast %cst_44 : f32 to vector<8x256xf32>
    %109 = arith.cmpf ogt, %107, %108 : vector<8x256xf32>
    %cst_45 = arith.constant 0.000000e+00 : f32
    %110 = vector.broadcast %cst_45 : f32 to vector<8x256xf32>
    %111 = arith.minimumf %107, %110 : vector<8x256xf32>
    %112 = math.exp %111 : vector<8x256xf32>
    %cst_46 = arith.constant 1.000000e+00 : f32
    %113 = vector.broadcast %cst_46 : f32 to vector<8x256xf32>
    %114 = arith.subf %112, %113 : vector<8x256xf32>
    %115 = arith.select %109, %107, %114 : vector<8x256xi1>, vector<8x256xf32>
    %116 = vector.extract_strided_slice %104 {offsets = [0, 256], sizes = [8, 256], strides = [1, 1]} : vector<8x1056xf32> to vector<8x256xf32>
    %117 = vector.broadcast %11 : vector<1x256xf32> to vector<8x256xf32>
    %118 = arith.addf %116, %117 : vector<8x256xf32>
    %119 = vector.extract_strided_slice %104 {offsets = [0, 512], sizes = [8, 512], strides = [1, 1]} : vector<8x1056xf32> to vector<8x512xf32>
    %120 = vector.extract_strided_slice %104 {offsets = [0, 1024], sizes = [8, 16], strides = [1, 1]} : vector<8x1056xf32> to vector<8x16xf32>
    %121 = vector.extract_strided_slice %104 {offsets = [0, 1040], sizes = [8, 16], strides = [1, 1]} : vector<8x1056xf32> to vector<8x16xf32>
    %cst_47 = arith.constant dense<0.000000e+00> : vector<16x16xf32>
    %122 = tpu.matmul %6, %120, %cst_47 {dimension_numbers = #tpu.dot_dimension_numbers<[1], [0], [0], [1], [0, 0, 1, 1], [], []>} : vector<16x8xf32>, vector<8x16xf32>, vector<16x16xf32> -> vector<16x16xf32>
    %cst_48 = arith.constant dense<0.000000e+00> : vector<16x16xf32>
    %123 = tpu.matmul %7, %121, %cst_48 {dimension_numbers = #tpu.dot_dimension_numbers<[1], [0], [0], [1], [0, 0, 1, 1], [], []>} : vector<16x8xf32>, vector<8x16xf32>, vector<16x16xf32> -> vector<16x16xf32>
    %124 = arith.addf %122, %123 : vector<16x16xf32>
    %125 = vector.extract_strided_slice %18 {offsets = [0, 0], sizes = [1, 16], strides = [1, 1]} : vector<1x33xf32> to vector<1x16xf32>
    %126 = vector.broadcast %125 : vector<1x16xf32> to vector<16x16xf32>
    %127 = arith.addf %124, %126 : vector<16x16xf32>
    %cst_49 = arith.constant 0.000000e+00 : f32
    %128 = vector.broadcast %cst_49 : f32 to vector<16x16xf32>
    %129 = arith.maximumf %127, %128 : vector<16x16xf32>
    %130 = vector.extract_strided_slice %17 {offsets = [0, 0], sizes = [16, 16], strides = [1, 1]} : vector<16x17xf32> to vector<16x16xf32>
    %131 = vector.extract_strided_slice %18 {offsets = [0, 16], sizes = [1, 16], strides = [1, 1]} : vector<1x33xf32> to vector<1x16xf32>
    %cst_50 = arith.constant dense<0.000000e+00> : vector<16x16xf32>
    %132 = tpu.matmul %129, %130, %cst_50 {dimension_numbers = #tpu.dot_dimension_numbers<[1], [0], [0], [1], [0, 0, 1, 1], [], []>} : vector<16x16xf32>, vector<16x16xf32>, vector<16x16xf32> -> vector<16x16xf32>
    %133 = vector.broadcast %131 : vector<1x16xf32> to vector<16x16xf32>
    %134 = arith.addf %132, %133 : vector<16x16xf32>
    %cst_51 = arith.constant 0.000000e+00 : f32
    %135 = vector.broadcast %cst_51 : f32 to vector<16x16xf32>
    %136 = arith.maximumf %134, %135 : vector<16x16xf32>
    %137 = vector.extract_strided_slice %17 {offsets = [0, 16], sizes = [16, 1], strides = [1, 1]} : vector<16x17xf32> to vector<16x1xf32>
    %cst_52 = arith.constant dense<0.000000e+00> : vector<16x1xf32>
    %138 = tpu.matmul %136, %137, %cst_52 {dimension_numbers = #tpu.dot_dimension_numbers<[1], [0], [0], [1], [0, 0, 1, 1], [], []>} : vector<16x16xf32>, vector<16x1xf32>, vector<16x1xf32> -> vector<16x1xf32>
    %139 = vector.extract_strided_slice %18 {offsets = [0, 32], sizes = [1, 1], strides = [1, 1]} : vector<1x33xf32> to vector<1x1xf32>
    %140 = vector.broadcast %139 : vector<1x1xf32> to vector<16x1xf32>
    %141 = arith.addf %138, %140 : vector<16x1xf32>
    %142 = vector.broadcast %141 : vector<16x1xf32> to vector<16x256xf32>
    %143 = vector.broadcast %14 : vector<1x256xf32> to vector<16x256xf32>
    %144 = arith.mulf %142, %143 : vector<16x256xf32>
    %145 = vector.broadcast %15 : vector<1x256xf32> to vector<16x256xf32>
    %146 = arith.addf %144, %145 : vector<16x256xf32>
    %cst_53 = arith.constant 5.000000e-01 : f32
    %147 = vector.broadcast %cst_53 : f32 to vector<16x256xf32>
    %148 = arith.mulf %147, %146 : vector<16x256xf32>
    %149 = math.tanh %148 : vector<16x256xf32>
    %cst_54 = arith.constant 1.000000e+00 : f32
    %150 = vector.broadcast %cst_54 : f32 to vector<16x256xf32>
    %151 = arith.addf %149, %150 : vector<16x256xf32>
    %cst_55 = arith.constant 5.000000e-01 : f32
    %152 = vector.broadcast %cst_55 : f32 to vector<16x256xf32>
    %153 = arith.mulf %152, %151 : vector<16x256xf32>
    %cst_56 = arith.constant dense<0.000000e+00> : vector<16x256xf32>
    %154 = tpu.matmul %7, %118, %cst_56 {dimension_numbers = #tpu.dot_dimension_numbers<[1], [0], [0], [1], [0, 0, 1, 1], [], []>} : vector<16x8xf32>, vector<8x256xf32>, vector<16x256xf32> -> vector<16x256xf32>
    %155 = arith.mulf %153, %154 : vector<16x256xf32>
    %cst_57 = arith.constant dense<0.000000e+00> : vector<8x256xf32>
    %156 = tpu.matmul %8, %155, %cst_57 {dimension_numbers = #tpu.dot_dimension_numbers<[1], [0], [0], [1], [0, 0, 1, 1], [], []>} : vector<8x16xf32>, vector<16x256xf32>, vector<8x256xf32> -> vector<8x256xf32>
    %cst_58 = arith.constant dense<0.000000e+00> : vector<8x768xf32>
    %157 = tpu.matmul %156, %1, %cst_58 {dimension_numbers = #tpu.dot_dimension_numbers<[1], [0], [0], [1], [0, 0, 1, 1], [], []>} : vector<8x256xf32>, vector<256x768xf32>, vector<8x768xf32> -> vector<8x768xf32>
    %158 = vector.extract_strided_slice %157 {offsets = [0, 0], sizes = [8, 512], strides = [1, 1]} : vector<8x768xf32> to vector<8x512xf32>
    %159 = arith.addf %119, %158 : vector<8x512xf32>
    %160 = vector.broadcast %12 : vector<1x512xf32> to vector<8x512xf32>
    %161 = arith.addf %159, %160 : vector<8x512xf32>
    %cst_59 = arith.constant 5.000000e-01 : f32
    %162 = vector.broadcast %cst_59 : f32 to vector<8x512xf32>
    %163 = arith.mulf %162, %161 : vector<8x512xf32>
    %164 = math.tanh %163 : vector<8x512xf32>
    %cst_60 = arith.constant 1.000000e+00 : f32
    %165 = vector.broadcast %cst_60 : f32 to vector<8x512xf32>
    %166 = arith.addf %164, %165 : vector<8x512xf32>
    %cst_61 = arith.constant 5.000000e-01 : f32
    %167 = vector.broadcast %cst_61 : f32 to vector<8x512xf32>
    %168 = arith.mulf %167, %166 : vector<8x512xf32>
    %169 = vector.extract_strided_slice %168 {offsets = [0, 0], sizes = [8, 256], strides = [1, 1]} : vector<8x512xf32> to vector<8x256xf32>
    %170 = vector.extract_strided_slice %168 {offsets = [0, 256], sizes = [8, 256], strides = [1, 1]} : vector<8x512xf32> to vector<8x256xf32>
    %171 = arith.mulf %170, %103 : vector<8x256xf32>
    %cst_62 = arith.constant dense<0.000000e+00> : vector<8x256xf32>
    %172 = tpu.matmul %171, %2, %cst_62 {dimension_numbers = #tpu.dot_dimension_numbers<[1], [0], [0], [1], [0, 0, 1, 1], [], []>} : vector<8x256xf32>, vector<256x256xf32>, vector<8x256xf32> -> vector<8x256xf32>
    %173 = vector.extract_strided_slice %157 {offsets = [0, 512], sizes = [8, 256], strides = [1, 1]} : vector<8x768xf32> to vector<8x256xf32>
    %174 = arith.addf %172, %173 : vector<8x256xf32>
    %175 = vector.broadcast %13 : vector<1x256xf32> to vector<8x256xf32>
    %176 = arith.addf %174, %175 : vector<8x256xf32>
    %177 = math.tanh %176 : vector<8x256xf32>
    %cst_63 = arith.constant 1.000000e+00 : f32
    %178 = vector.broadcast %cst_63 : f32 to vector<8x256xf32>
    %179 = arith.subf %178, %169 : vector<8x256xf32>
    %180 = arith.mulf %179, %103 : vector<8x256xf32>
    %181 = arith.mulf %169, %177 : vector<8x256xf32>
    %182 = arith.addf %180, %181 : vector<8x256xf32>
    %cst_64 = arith.constant dense<0.000000e+00> : vector<8x256xf32>
    %183 = tpu.matmul %115, %4, %cst_64 {dimension_numbers = #tpu.dot_dimension_numbers<[1], [0], [0], [1], [0, 0, 1, 1], [], []>} : vector<8x256xf32>, vector<256x256xf32>, vector<8x256xf32> -> vector<8x256xf32>
    %cst_65 = arith.constant dense<0.000000e+00> : vector<8x256xf32>
    %184 = tpu.matmul %182, %5, %cst_65 {dimension_numbers = #tpu.dot_dimension_numbers<[1], [0], [0], [1], [0, 0, 1, 1], [], []>} : vector<8x256xf32>, vector<256x256xf32>, vector<8x256xf32> -> vector<8x256xf32>
    %185 = arith.addf %183, %184 : vector<8x256xf32>
    %186 = vector.broadcast %16 : vector<1x256xf32> to vector<8x256xf32>
    %187 = arith.addf %185, %186 : vector<8x256xf32>
    %c0_66 = arith.constant 0 : index
    %c0_67 = arith.constant 0 : index
    %188 = vector.load %arg11[%c0_66, %c0_67] : memref<8x256xf32, #tpu.memory_space<vmem>>, vector<8x256xf32>
    tpu.vector_store %arg11[%c0_66, %c0_67], %187 {strides = array<i32>} : memref<8x256xf32, #tpu.memory_space<vmem>>, vector<8x256xf32>,
    return
  }
}

</mosaic_0001>

<bundles_post_ra>
// kernel: _lambda_.1
= control target key start
LH: loop header
LB: loop body
LE: loop exit
PB: predicated region body
PF: predicated region fallthrough
CT: control target
= control target key end

     0   :  { %s3825_s29 = smov 112   ;;  %vm1108_vm0 = vcmask 64512   ;;  %vm1177_vm1 = vcmask 130048   ;;  %s3826_s15 = smov 96   ;;  %s8338_s1 = inlined_call_operand.vmem [shape: f32[256,1056], index: 1, kind: input, shape index: {}]   ;;  %s8339_s0 = inlined_call_operand.vmem [shape: f32[8,256], index: 0, kind: input, shape index: {}]   ;;  %s8340_s8 = inlined_call_operand.vmem [shape: f32[8,512], index: 8, kind: input, shape index: {}]   ;;  %s8341_s6 = inlined_call_operand.vmem [shape: f32[16,8], index: 6, kind: input, shape index: {}]   ;;  %s8342_s5 = inlined_call_operand.vmem [shape: f32[16,8], index: 5, kind: input, shape index: {}]   ;;  %s8343_s10 = inlined_call_operand.vmem [shape: f32[1,33], index: 10, kind: input, shape index: {}]   ;;  %s8344_s9 = inlined_call_operand.vmem [shape: f32[16,17], index: 9, kind: input, shape index: {}]   ;;  %s8345_s2 = inlined_call_operand.vmem [shape: f32[256,768], index: 2, kind: input, shape index: {}]   ;;  %s8346_s7 = inlined_call_operand.vmem [shape: f32[8,16], index: 7, kind: input, shape index: {}]   ;;  %s8347_s3 = inlined_call_operand.vmem [shape: f32[256,256], index: 3, kind: input, shape index: {}]   ;;  %s8348_s4 = inlined_call_operand.vmem [shape: f32[512,256], index: 4, kind: input, shape index: {}]   ;;  %s8349_s11 = inlined_call_operand.vmem [shape: f32[8,256], index: 11, kind: output, shape index: {}]  }
   0x1   :  { %v173_v0 = vld [vmem:[%s8338_s1 + $0x438] sm:$0xff]  ;;  %v164_v2 = vld [vmem:[%s8338_s1 + $0x3f0] sm:$0xff]  ;;  %v155_v4 = vld [vmem:[%s8338_s1 + $0x3a8] sm:$0xff] }
   0x2   :  { %v317_v1 = vld [vmem:[%s8338_s1 + $0x8b8] sm:$0xff]  ;;  %724 = vmatpush.msra.mxu0 %v173_v0  ;;  %v308_v3 = vld [vmem:[%s8338_s1 + $0x870] sm:$0xff]  ;;  %v299_v5 = vld [vmem:[%s8338_s1 + $0x828] sm:$0xff] }
   0x3   :  { %744 = vmatpush.msra.mxu1 %v317_v1  ;;  %v146_v6 = vld [vmem:[%s8338_s1 + $0x360] sm:$0xff]  ;;  %v137_v8 = vld [vmem:[%s8338_s1 + $0x318] sm:$0xff]  ;;  %v128_v10 = vld [vmem:[%s8338_s1 + $0x2d0] sm:$0xff] }
   0x4   :  { %725 = vmatpush.msra.mxu0 %v164_v2  ;;  %v290_v7 = vld [vmem:[%s8338_s1 + $0x7e0] sm:$0xff]  ;;  %v281_v9 = vld [vmem:[%s8338_s1 + $0x798] sm:$0xff]  ;;  %v272_v11 = vld [vmem:[%s8338_s1 + $0x750] sm:$0xff] }
   0x5   :  { %745 = vmatpush.msra.mxu1 %v308_v3  ;;  %v119_v12 = vld [vmem:[%s8338_s1 + $0x288] sm:$0xff]  ;;  %v110_v14 = vld [vmem:[%s8338_s1 + $0x240] sm:$0xff]  ;;  %v101_v16 = vld [vmem:[%s8338_s1 + $0x1f8] sm:$0xff] }
   0x6   :  { %726 = vmatpush.msra.mxu0 %v155_v4  ;;  %v263_v13 = vld [vmem:[%s8338_s1 + $0x708] sm:$0xff]  ;;  %v254_v15 = vld [vmem:[%s8338_s1 + $0x6c0] sm:$0xff]  ;;  %v245_v17 = vld [vmem:[%s8338_s1 + $0x678] sm:$0xff] }
   0x7   :  { %746 = vmatpush.msra.mxu1 %v299_v5  ;;  %v92_v18 = vld [vmem:[%s8338_s1 + $0x1b0] sm:$0xff]  ;;  %v83_v20 = vld [vmem:[%s8338_s1 + $0x168] sm:$0xff]  ;;  %v74_v22 = vld [vmem:[%s8338_s1 + $0x120] sm:$0xff] }
   0x8   :  { %727 = vmatpush.msra.mxu0 %v146_v6  ;;  %v236_v19 = vld [vmem:[%s8338_s1 + $0x630] sm:$0xff]  ;;  %v227_v21 = vld [vmem:[%s8338_s1 + $0x5e8] sm:$0xff]  ;;  %v218_v23 = vld [vmem:[%s8338_s1 + $0x5a0] sm:$0xff] }
   0x9   :  { %747 = vmatpush.msra.mxu1 %v290_v7  ;;  %v65_v24 = vld [vmem:[%s8338_s1 + $0xd8] sm:$0xff]  ;;  %v56_v26 = vld [vmem:[%s8338_s1 + $0x90] sm:$0xff]  ;;  %v47_v28 = vld [vmem:[%s8338_s1 + $0x48] sm:$0xff] }
   0xa   :  { %728 = vmatpush.msra.mxu0 %v137_v8  ;;  %v209_v25 = vld [vmem:[%s8338_s1 + $0x558] sm:$0xff]  ;;  %v200_v27 = vld [vmem:[%s8338_s1 + $0x510] sm:$0xff]  ;;  %v191_v29 = vld [vmem:[%s8338_s1 + $0x4c8] sm:$0xff] }
   0xb   :  { %748 = vmatpush.msra.mxu1 %v281_v9  ;;  %v38_v30 = vld [vmem:[%s8338_s1] sm:$0xff]  ;;  %v175_v32 = vld [vmem:[%s8338_s1 + $0x448] sm:$0xff]  ;;  %v157_v38 = vld [vmem:[%s8338_s1 + $0x3b8] sm:$0xff] }
   0xc   :  { %729 = vmatpush.msra.mxu0 %v128_v10  ;;  %v182_v31 = vld [vmem:[%s8338_s1 + $0x480] sm:$0xff]  ;;  %v319_v33 = vld [vmem:[%s8338_s1 + $0x8c8] sm:$0xff]  ;;  %v301_v39 = vld [vmem:[%s8338_s1 + $0x838] sm:$0xff] }
   0xd   :  { %749 = vmatpush.msra.mxu1 %v272_v11  ;;  %v3993_v34 = vld [vmem:[%s8339_s0] sm:$0xff]  ;;  %v3998_v35 = vld [vmem:[%s8339_s0 + $0x8] sm:$0xff]  ;;  %v148_v40 = vld [vmem:[%s8338_s1 + $0x370] sm:$0xff] }
   0xe   :  { %730 = vmatpush.msra.mxu0 %v119_v12  ;;  %v166_v36 = vld [vmem:[%s8338_s1 + $0x400] sm:$0xff]  ;;  %v292_v41 = vld [vmem:[%s8338_s1 + $0x7f0] sm:$0xff]  ;;  %v139_v42 = vld [vmem:[%s8338_s1 + $0x328] sm:$0xff] }
   0xf   :  { %750 = vmatpush.msra.mxu1 %v263_v13  ;;  %v310_v37 = vld [vmem:[%s8338_s1 + $0x880] sm:$0xff]  ;;  %v283_v43 = vld [vmem:[%s8338_s1 + $0x7a8] sm:$0xff]  ;;  %v121_v46 = vld [vmem:[%s8338_s1 + $0x298] sm:$0xff] }
  0x10   :  { %731 = vmatpush.msra.mxu0 %v110_v14  ;;  %v130_v44 = vld [vmem:[%s8338_s1 + $0x2e0] sm:$0xff]  ;;  %v265_v47 = vld [vmem:[%s8338_s1 + $0x718] sm:$0xff]  ;;  %v112_v48 = vld [vmem:[%s8338_s1 + $0x250] sm:$0xff] }
  0x11   :  { %751 = vmatpush.msra.mxu1 %v254_v15  ;;  %v274_v45 = vld [vmem:[%s8338_s1 + $0x760] sm:$0xff]  ;;  %v256_v49 = vld [vmem:[%s8338_s1 + $0x6d0] sm:$0xff]  ;;  %v103_v50 = vld [vmem:[%s8338_s1 + $0x208] sm:$0xff] }
  0x12   :  { %732 = vmatpush.msra.mxu0 %v101_v16  ;;  %v247_v51 = vld [vmem:[%s8338_s1 + $0x688] sm:$0xff]  ;;  %v94_v52 = vld [vmem:[%s8338_s1 + $0x1c0] sm:$0xff]  ;;  %v85_v54 = vld [vmem:[%s8338_s1 + $0x178] sm:$0xff] }
  0x13   :  { %752 = vmatpush.msra.mxu1 %v245_v17  ;;  %v238_v53 = vld [vmem:[%s8338_s1 + $0x640] sm:$0xff]  ;;  %v229_v55 = vld [vmem:[%s8338_s1 + $0x5f8] sm:$0xff]  ;;  %v76_v56 = vld [vmem:[%s8338_s1 + $0x130] sm:$0xff] }
  0x14   :  { %733 = vmatpush.msra.mxu0 %v92_v18  ;;  %v220_v57 = vld [vmem:[%s8338_s1 + $0x5b0] sm:$0xff]  ;;  %v67_v58 = vld [vmem:[%s8338_s1 + $0xe8] sm:$0xff]  ;;  %v58_v60 = vld [vmem:[%s8338_s1 + $0xa0] sm:$0xff] }
  0x15   :  { %753 = vmatpush.msra.mxu1 %v236_v19  ;;  %v211_v59 = vld [vmem:[%s8338_s1 + $0x568] sm:$0xff]  ;;  %v202_v61 = vld [vmem:[%s8338_s1 + $0x520] sm:$0xff]  ;;  %v49_v62 = vld [vmem:[%s8338_s1 + $0x58] sm:$0xff] }
  0x16   :  { %734 = vmatpush.msra.mxu0 %v83_v20  ;;  %v193_v63 = vld [vmem:[%s8338_s1 + $0x4d8] sm:$0xff]  ;;  %v40_v0 = vld [vmem:[%s8338_s1 + $0x10] sm:$0xff]  ;;  %v159_v6 = vld [vmem:[%s8338_s1 + $0x3c8] sm:$0xff] }
  0x17   :  { %754 = vmatpush.msra.mxu1 %v227_v21  ;;  %v184_v1 = vld [vmem:[%s8338_s1 + $0x490] sm:$0xff]  ;;  %v177_v2 = vld [vmem:[%s8338_s1 + $0x458] sm:$0xff]  ;;  %v303_v7 = vld [vmem:[%s8338_s1 + $0x848] sm:$0xff] }
  0x18   :  { %735 = vmatpush.msra.mxu0 %v74_v22  ;;  %v321_v3 = vld [vmem:[%s8338_s1 + $0x8d8] sm:$0xff]  ;;  %v168_v4 = vld [vmem:[%s8338_s1 + $0x410] sm:$0xff]  ;;  %v150_v8 = vld [vmem:[%s8338_s1 + $0x380] sm:$0xff] }
  0x19   :  { %755 = vmatpush.msra.mxu1 %v218_v23  ;;  %v312_v5 = vld [vmem:[%s8338_s1 + $0x890] sm:$0xff]  ;;  %v294_v9 = vld [vmem:[%s8338_s1 + $0x800] sm:$0xff]  ;;  %v141_v10 = vld [vmem:[%s8338_s1 + $0x338] sm:$0xff] }
  0x1a   :  { %736 = vmatpush.msra.mxu0 %v65_v24  ;;  %v285_v11 = vld [vmem:[%s8338_s1 + $0x7b8] sm:$0xff]  ;;  %v132_v12 = vld [vmem:[%s8338_s1 + $0x2f0] sm:$0xff]  ;;  %v123_v14 = vld [vmem:[%s8338_s1 + $0x2a8] sm:$0xff] }
  0x1b   :  { %756 = vmatpush.msra.mxu1 %v209_v25  ;;  %v276_v13 = vld [vmem:[%s8338_s1 + $0x770] sm:$0xff]  ;;  %v267_v15 = vld [vmem:[%s8338_s1 + $0x728] sm:$0xff]  ;;  %v114_v16 = vld [vmem:[%s8338_s1 + $0x260] sm:$0xff] }
  0x1c   :  { %737 = vmatpush.msra.mxu0 %v56_v26  ;;  %v258_v17 = vld [vmem:[%s8338_s1 + $0x6e0] sm:$0xff]  ;;  %v105_v18 = vld [vmem:[%s8338_s1 + $0x218] sm:$0xff]  ;;  %v96_v20 = vld [vmem:[%s8338_s1 + $0x1d0] sm:$0xff] }
  0x1d   :  { %757 = vmatpush.msra.mxu1 %v200_v27  ;;  %v249_v19 = vld [vmem:[%s8338_s1 + $0x698] sm:$0xff]  ;;  %v240_v21 = vld [vmem:[%s8338_s1 + $0x650] sm:$0xff]  ;;  %v87_v22 = vld [vmem:[%s8338_s1 + $0x188] sm:$0xff] }
  0x1e   :  { %738 = vmatpush.msra.mxu0 %v47_v28  ;;  %v231_v23 = vld [vmem:[%s8338_s1 + $0x608] sm:$0xff]  ;;  %v78_v24 = vld [vmem:[%s8338_s1 + $0x140] sm:$0xff]  ;;  %v69_v26 = vld [vmem:[%s8338_s1 + $0xf8] sm:$0xff] }
  0x1f   :  { %758 = vmatpush.msra.mxu1 %v191_v29  ;;  %v222_v25 = vld [vmem:[%s8338_s1 + $0x5c0] sm:$0xff]  ;;  %v213_v27 = vld [vmem:[%s8338_s1 + $0x578] sm:$0xff]  ;;  %v60_v28 = vld [vmem:[%s8338_s1 + $0xb0] sm:$0xff] }
  0x20   :  { %739 = vmatpush.msra.mxu0 %v38_v30  ;;  %v204_v29 = vld [vmem:[%s8338_s1 + $0x530] sm:$0xff]  ;;  %v51_v30 = vld [vmem:[%s8338_s1 + $0x68] sm:$0xff] }
  0x21   :  { %759 = vmatpush.msra.mxu1 %v182_v31  ;;  %740 = vmatmul.f32.vlgmr.msra.gmra.mxu0 %v3993_v34  ;;  %v195_v31 = vld [vmem:[%s8338_s1 + $0x4e8] sm:$0xff] }
  0x22   :  { %804 = vmatpush.msrb.mxu0 %v175_v32  ;;  %760 = vmatmul.f32.vlgmr.msra.gmra.mxu1 %v3998_v35  ;;  %v42_v32 = vld [vmem:[%s8338_s1 + $0x20] sm:$0xff] }
  0x23   :  { %824 = vmatpush.msrb.mxu1 %v319_v33  ;;  %v186_v33 = vld [vmem:[%s8338_s1 + $0x4a0] sm:$0xff] }
  0x24   :  { %805 = vmatpush.msrb.mxu0 %v166_v36  ;;  %v179_v36 = vld [vmem:[%s8338_s1 + $0x468] sm:$0xff] }
  0x25   :  { %825 = vmatpush.msrb.mxu1 %v310_v37  ;;  %v323_v37 = vld [vmem:[%s8338_s1 + $0x8e8] sm:$0xff] }
  0x26   :  { %806 = vmatpush.msrb.mxu0 %v157_v38  ;;  %v170_v38 = vld [vmem:[%s8338_s1 + $0x420] sm:$0xff] }
  0x27   :  { %826 = vmatpush.msrb.mxu1 %v301_v39  ;;  %v314_v39 = vld [vmem:[%s8338_s1 + $0x8a0] sm:$0xff] }
  0x28   :  { %807 = vmatpush.msrb.mxu0 %v148_v40  ;;  %v161_v40 = vld [vmem:[%s8338_s1 + $0x3d8] sm:$0xff] }
  0x29   :  { %827 = vmatpush.msrb.mxu1 %v292_v41  ;;  %v305_v41 = vld [vmem:[%s8338_s1 + $0x858] sm:$0xff] }
  0x2a   :  { %808 = vmatpush.msrb.mxu0 %v139_v42  ;;  %v152_v42 = vld [vmem:[%s8338_s1 + $0x390] sm:$0xff] }
  0x2b   :  { %828 = vmatpush.msrb.mxu1 %v283_v43  ;;  %v296_v43 = vld [vmem:[%s8338_s1 + $0x810] sm:$0xff] }
  0x2c   :  { %809 = vmatpush.msrb.mxu0 %v130_v44  ;;  %v143_v44 = vld [vmem:[%s8338_s1 + $0x348] sm:$0xff] }
  0x2d   :  { %829 = vmatpush.msrb.mxu1 %v274_v45  ;;  %v287_v45 = vld [vmem:[%s8338_s1 + $0x7c8] sm:$0xff] }
  0x2e   :  { %810 = vmatpush.msrb.mxu0 %v121_v46  ;;  %v134_v46 = vld [vmem:[%s8338_s1 + $0x300] sm:$0xff] }
  0x2f   :  { %830 = vmatpush.msrb.mxu1 %v265_v47  ;;  %v278_v47 = vld [vmem:[%s8338_s1 + $0x780] sm:$0xff] }
  0x30   :  { %811 = vmatpush.msrb.mxu0 %v112_v48  ;;  %v125_v48 = vld [vmem:[%s8338_s1 + $0x2b8] sm:$0xff] }
  0x31   :  { %831 = vmatpush.msrb.mxu1 %v256_v49  ;;  %v269_v49 = vld [vmem:[%s8338_s1 + $0x738] sm:$0xff] }
  0x32   :  { %812 = vmatpush.msrb.mxu0 %v103_v50  ;;  %v116_v50 = vld [vmem:[%s8338_s1 + $0x270] sm:$0xff] }
  0x33   :  { %832 = vmatpush.msrb.mxu1 %v247_v51  ;;  %v260_v51 = vld [vmem:[%s8338_s1 + $0x6f0] sm:$0xff] }
  0x34   :  { %813 = vmatpush.msrb.mxu0 %v94_v52  ;;  %v107_v52 = vld [vmem:[%s8338_s1 + $0x228] sm:$0xff] }
  0x35   :  { %833 = vmatpush.msrb.mxu1 %v238_v53  ;;  %v251_v53 = vld [vmem:[%s8338_s1 + $0x6a8] sm:$0xff] }
  0x36   :  { %814 = vmatpush.msrb.mxu0 %v85_v54  ;;  %v98_v54 = vld [vmem:[%s8338_s1 + $0x1e0] sm:$0xff] }
  0x37   :  { %834 = vmatpush.msrb.mxu1 %v229_v55  ;;  %v242_v55 = vld [vmem:[%s8338_s1 + $0x660] sm:$0xff] }
  0x38   :  { %815 = vmatpush.msrb.mxu0 %v76_v56  ;;  %v89_v56 = vld [vmem:[%s8338_s1 + $0x198] sm:$0xff] }
  0x39   :  { %835 = vmatpush.msrb.mxu1 %v220_v57  ;;  %v233_v57 = vld [vmem:[%s8338_s1 + $0x618] sm:$0xff] }
  0x3a   :  { %816 = vmatpush.msrb.mxu0 %v67_v58  ;;  %v80_v58 = vld [vmem:[%s8338_s1 + $0x150] sm:$0xff] }
  0x3b   :  { %836 = vmatpush.msrb.mxu1 %v211_v59  ;;  %v224_v59 = vld [vmem:[%s8338_s1 + $0x5d0] sm:$0xff] }
  0x3c   :  { %817 = vmatpush.msrb.mxu0 %v58_v60  ;;  %v71_v60 = vld [vmem:[%s8338_s1 + $0x108] sm:$0xff] }
  0x3d   :  { %837 = vmatpush.msrb.mxu1 %v202_v61  ;;  %v215_v61 = vld [vmem:[%s8338_s1 + $0x588] sm:$0xff] }
  0x3e   :  { %818 = vmatpush.msrb.mxu0 %v49_v62  ;;  %v62_v62 = vld [vmem:[%s8338_s1 + $0xc0] sm:$0xff] }
  0x3f   :  { %838 = vmatpush.msrb.mxu1 %v193_v63  ;;  %v206_v63 = vld [vmem:[%s8338_s1 + $0x540] sm:$0xff] }
  0x40   :  { %819 = vmatpush.msrb.mxu0 %v40_v0  ;;  %v53_v0 = vld [vmem:[%s8338_s1 + $0x78] sm:$0xff] }
  0x41   :  { %839 = vmatpush.msrb.mxu1 %v184_v1  ;;  %820 = vmatmul.f32.vlgmr.msrb.gmra.mxu0 %v3993_v34  ;;  %v197_v1 = vld [vmem:[%s8338_s1 + $0x4f8] sm:$0xff] }
  0x42   :  { %884 = vmatpush.msra.mxu0 %v177_v2  ;;  %840 = vmatmul.f32.vlgmr.msrb.gmra.mxu1 %v3998_v35  ;;  %v44_v2 = vld [vmem:[%s8338_s1 + $0x30] sm:$0xff] }
  0x43   :  { %904 = vmatpush.msra.mxu1 %v321_v3  ;;  %v188_v3 = vld [vmem:[%s8338_s1 + $0x4b0] sm:$0xff] }
  0x44   :  { %885 = vmatpush.msra.mxu0 %v168_v4  ;;  %v181_v4 = vld [vmem:[%s8338_s1 + $0x478] sm:$0xff] }
  0x45   :  { %905 = vmatpush.msra.mxu1 %v312_v5  ;;  %v325_v5 = vld [vmem:[%s8338_s1 + $0x8f8] sm:$0xff] }
  0x46   :  { %886 = vmatpush.msra.mxu0 %v159_v6  ;;  %v172_v6 = vld [vmem:[%s8338_s1 + $0x430] sm:$0xff] }
  0x47   :  { %906 = vmatpush.msra.mxu1 %v303_v7  ;;  %v316_v7 = vld [vmem:[%s8338_s1 + $0x8b0] sm:$0xff] }
  0x48   :  { %887 = vmatpush.msra.mxu0 %v150_v8  ;;  %v318_v8 = vld [vmem:[%s8338_s1 + $0x8c0] sm:$0xff] }
  0x49   :  { %907 = vmatpush.msra.mxu1 %v294_v9  ;;  %v163_v9 = vld [vmem:[%s8338_s1 + $0x3e8] sm:$0xff]  ;;  %784 = vmatpush.msra.mxu3 %v318_v8  ;;  %v185_v8 = vld [vmem:[%s8338_s1 + $0x498] sm:$0xff] }
  0x4a   :  { %888 = vmatpush.msra.mxu0 %v141_v10  ;;  %v307_v10 = vld [vmem:[%s8338_s1 + $0x868] sm:$0xff] }
  0x4b   :  { %908 = vmatpush.msra.mxu1 %v285_v11  ;;  %v309_v11 = vld [vmem:[%s8338_s1 + $0x878] sm:$0xff] }
  0x4c   :  { %889 = vmatpush.msra.mxu0 %v132_v12  ;;  %v154_v12 = vld [vmem:[%s8338_s1 + $0x3a0] sm:$0xff]  ;;  %785 = vmatpush.msra.mxu3 %v309_v11 }
  0x4d   :  { %909 = vmatpush.msra.mxu1 %v276_v13  ;;  %v298_v13 = vld [vmem:[%s8338_s1 + $0x820] sm:$0xff] }
  0x4e   :  { %890 = vmatpush.msra.mxu0 %v123_v14  ;;  %v300_v14 = vld [vmem:[%s8338_s1 + $0x830] sm:$0xff] }
  0x4f   :  { %910 = vmatpush.msra.mxu1 %v267_v15  ;;  %v145_v15 = vld [vmem:[%s8338_s1 + $0x358] sm:$0xff]  ;;  %786 = vmatpush.msra.mxu3 %v300_v14 }
  0x50   :  { %891 = vmatpush.msra.mxu0 %v114_v16  ;;  %v289_v16 = vld [vmem:[%s8338_s1 + $0x7d8] sm:$0xff] }
  0x51   :  { %911 = vmatpush.msra.mxu1 %v258_v17  ;;  %v291_v17 = vld [vmem:[%s8338_s1 + $0x7e8] sm:$0xff]  ;;  %v313_v14 = vld [vmem:[%s8338_s1 + $0x898] sm:$0xff] }
  0x52   :  { %892 = vmatpush.msra.mxu0 %v105_v18  ;;  %v136_v18 = vld [vmem:[%s8338_s1 + $0x310] sm:$0xff]  ;;  %787 = vmatpush.msra.mxu3 %v291_v17  ;;  %v295_v17 = vld [vmem:[%s8338_s1 + $0x808] sm:$0xff] }
  0x53   :  { %912 = vmatpush.msra.mxu1 %v249_v19  ;;  %v280_v19 = vld [vmem:[%s8338_s1 + $0x790] sm:$0xff] }
  0x54   :  { %893 = vmatpush.msra.mxu0 %v96_v20  ;;  %v282_v20 = vld [vmem:[%s8338_s1 + $0x7a0] sm:$0xff] }
  0x55   :  { %913 = vmatpush.msra.mxu1 %v240_v21  ;;  %v127_v21 = vld [vmem:[%s8338_s1 + $0x2c8] sm:$0xff]  ;;  %788 = vmatpush.msra.mxu3 %v282_v20  ;;  %v268_v20 = vld [vmem:[%s8338_s1 + $0x730] sm:$0xff] }
  0x56   :  { %894 = vmatpush.msra.mxu0 %v87_v22  ;;  %v271_v22 = vld [vmem:[%s8338_s1 + $0x748] sm:$0xff] }
  0x57   :  { %914 = vmatpush.msra.mxu1 %v231_v23  ;;  %v273_v23 = vld [vmem:[%s8338_s1 + $0x758] sm:$0xff] }
  0x58   :  { %895 = vmatpush.msra.mxu0 %v78_v24  ;;  %v118_v24 = vld [vmem:[%s8338_s1 + $0x280] sm:$0xff]  ;;  %789 = vmatpush.msra.mxu3 %v273_v23 }
  0x59   :  { %915 = vmatpush.msra.mxu1 %v222_v25  ;;  %v262_v25 = vld [vmem:[%s8338_s1 + $0x700] sm:$0xff] }
  0x5a   :  { %896 = vmatpush.msra.mxu0 %v69_v26  ;;  %v264_v26 = vld [vmem:[%s8338_s1 + $0x710] sm:$0xff]  ;;  %v174_v23 = vld [vmem:[%s8338_s1 + $0x440] sm:$0xff] }
  0x5b   :  { %916 = vmatpush.msra.mxu1 %v213_v27  ;;  %v109_v27 = vld [vmem:[%s8338_s1 + $0x238] sm:$0xff]  ;;  %790 = vmatpush.msra.mxu3 %v264_v26  ;;  %v232_v26 = vld [vmem:[%s8338_s1 + $0x610] sm:$0xff] }
  0x5c   :  { %897 = vmatpush.msra.mxu0 %v60_v28  ;;  %v253_v28 = vld [vmem:[%s8338_s1 + $0x6b8] sm:$0xff]  ;;  %764 = vmatpush.msra.mxu2 %v174_v23 }
  0x5d   :  { %917 = vmatpush.msra.mxu1 %v204_v29  ;;  %v255_v29 = vld [vmem:[%s8338_s1 + $0x6c8] sm:$0xff]  ;;  %v77_v23 = vld [vmem:[%s8338_s1 + $0x138] sm:$0xff] }
  0x5e   :  { %898 = vmatpush.msra.mxu0 %v51_v30  ;;  %v100_v30 = vld [vmem:[%s8338_s1 + $0x1f0] sm:$0xff]  ;;  %791 = vmatpush.msra.mxu3 %v255_v29  ;;  %v214_v29 = vld [vmem:[%s8338_s1 + $0x580] sm:$0xff] }
  0x5f   :  { %918 = vmatpush.msra.mxu1 %v195_v31  ;;  %v244_v31 = vld [vmem:[%s8338_s1 + $0x670] sm:$0xff] }
  0x60   :  { %899 = vmatpush.msra.mxu0 %v42_v32  ;;  %v246_v32 = vld [vmem:[%s8338_s1 + $0x680] sm:$0xff] }
  0x61   :  { %919 = vmatpush.msra.mxu1 %v186_v33  ;;  %900 = vmatmul.f32.vlgmr.msra.gmra.mxu0 %v3993_v34  ;;  %v91_v33 = vld [vmem:[%s8338_s1 + $0x1a8] sm:$0xff] }
  0x62   :  { %964 = vmatpush.msrb.mxu0 %v179_v36  ;;  %920 = vmatmul.f32.vlgmr.msra.gmra.mxu1 %v3998_v35  ;;  %v235_v36 = vld [vmem:[%s8338_s1 + $0x628] sm:$0xff] }
  0x63   :  { %984 = vmatpush.msrb.mxu1 %v323_v37  ;;  %v237_v37 = vld [vmem:[%s8338_s1 + $0x638] sm:$0xff]  ;;  %792 = vmatpush.msra.mxu3 %v246_v32  ;;  %v187_v32 = vld [vmem:[%s8338_s1 + $0x4a8] sm:$0xff] }
  0x64   :  { %965 = vmatpush.msrb.mxu0 %v170_v38  ;;  %v82_v38 = vld [vmem:[%s8338_s1 + $0x160] sm:$0xff] }
  0x65   :  { %985 = vmatpush.msrb.mxu1 %v314_v39  ;;  %v226_v39 = vld [vmem:[%s8338_s1 + $0x5e0] sm:$0xff]  ;;  %793 = vmatpush.msra.mxu3 %v237_v37 }
  0x66   :  { %966 = vmatpush.msrb.mxu0 %v161_v40  ;;  %v228_v40 = vld [vmem:[%s8338_s1 + $0x5f0] sm:$0xff] }
  0x67   :  { %986 = vmatpush.msrb.mxu1 %v305_v41  ;;  %v73_v41 = vld [vmem:[%s8338_s1 + $0x118] sm:$0xff]  ;;  %794 = vmatpush.msra.mxu3 %v228_v40  ;;  %v315_v40 = vld [vmem:[%s8338_s1 + $0x8a8] sm:$0xff] }
  0x68   :  { %967 = vmatpush.msrb.mxu0 %v152_v42  ;;  %v217_v42 = vld [vmem:[%s8338_s1 + $0x598] sm:$0xff] }
  0x69   :  { %987 = vmatpush.msrb.mxu1 %v296_v43  ;;  %v219_v43 = vld [vmem:[%s8338_s1 + $0x5a8] sm:$0xff] }
  0x6a   :  { %968 = vmatpush.msrb.mxu0 %v143_v44  ;;  %v64_v44 = vld [vmem:[%s8338_s1 + $0xd0] sm:$0xff]  ;;  %795 = vmatpush.msra.mxu3 %v219_v43  ;;  %v306_v43 = vld [vmem:[%s8338_s1 + $0x860] sm:$0xff] }
  0x6b   :  { %988 = vmatpush.msrb.mxu1 %v287_v45  ;;  %v208_v45 = vld [vmem:[%s8338_s1 + $0x550] sm:$0xff] }
  0x6c   :  { %969 = vmatpush.msrb.mxu0 %v134_v46  ;;  %v210_v46 = vld [vmem:[%s8338_s1 + $0x560] sm:$0xff] }
  0x6d   :  { %989 = vmatpush.msrb.mxu1 %v278_v47  ;;  %v55_v47 = vld [vmem:[%s8338_s1 + $0x88] sm:$0xff]  ;;  %796 = vmatpush.msra.mxu3 %v210_v46  ;;  %v288_v46 = vld [vmem:[%s8338_s1 + $0x7d0] sm:$0xff] }
  0x6e   :  { %970 = vmatpush.msrb.mxu0 %v125_v48  ;;  %v199_v48 = vld [vmem:[%s8338_s1 + $0x508] sm:$0xff] }
  0x6f   :  { %990 = vmatpush.msrb.mxu1 %v269_v49  ;;  %v201_v49 = vld [vmem:[%s8338_s1 + $0x518] sm:$0xff] }
  0x70   :  { %971 = vmatpush.msrb.mxu0 %v116_v50  ;;  %v46_v50 = vld [vmem:[%s8338_s1 + $0x40] sm:$0xff]  ;;  %797 = vmatpush.msra.mxu3 %v201_v49  ;;  %v261_v49 = vld [vmem:[%s8338_s1 + $0x6f8] sm:$0xff] }
  0x71   :  { %991 = vmatpush.msrb.mxu1 %v260_v51  ;;  %v190_v51 = vld [vmem:[%s8338_s1 + $0x4c0] sm:$0xff] }
  0x72   :  { %972 = vmatpush.msrb.mxu0 %v107_v52  ;;  %v192_v52 = vld [vmem:[%s8338_s1 + $0x4d0] sm:$0xff] }
  0x73   :  { %992 = vmatpush.msrb.mxu1 %v251_v53  ;;  %v183_v53 = vld [vmem:[%s8338_s1 + $0x488] sm:$0xff]  ;;  %798 = vmatpush.msra.mxu3 %v192_v52  ;;  %v234_v52 = vld [vmem:[%s8338_s1 + $0x620] sm:$0xff] }
  0x74   :  { %973 = vmatpush.msrb.mxu0 %v98_v54  ;;  %v320_v54 = vld [vmem:[%s8338_s1 + $0x8d0] sm:$0xff] }
  0x75   :  { %993 = vmatpush.msrb.mxu1 %v242_v55  ;;  %799 = vmatpush.msra.mxu3 %v183_v53  ;;  %v311_v55 = vld [vmem:[%s8338_s1 + $0x888] sm:$0xff]  ;;  %v225_v53 = vld [vmem:[%s8338_s1 + $0x5d8] sm:$0xff] }
  0x76   :  { %974 = vmatpush.msrb.mxu0 %v89_v56  ;;  %v302_v56 = vld [vmem:[%s8338_s1 + $0x840] sm:$0xff]  ;;  %800 = vmatmul.f32.vlgmr.msra.gmra.mxu3 %v3998_v35 }
  0x77   :  { %994 = vmatpush.msrb.mxu1 %v233_v57  ;;  %864 = vmatpush.msrb.mxu3 %v320_v54  ;;  %v293_v57 = vld [vmem:[%s8338_s1 + $0x7f8] sm:$0xff]  ;;  %v216_v54 = vld [vmem:[%s8338_s1 + $0x590] sm:$0xff] }
  0x78   :  { %975 = vmatpush.msrb.mxu0 %v80_v58  ;;  %v284_v58 = vld [vmem:[%s8338_s1 + $0x7b0] sm:$0xff] }
  0x79   :  { %995 = vmatpush.msrb.mxu1 %v224_v59  ;;  %865 = vmatpush.msrb.mxu3 %v311_v55  ;;  %v275_v59 = vld [vmem:[%s8338_s1 + $0x768] sm:$0xff] }
  0x7a   :  { %976 = vmatpush.msrb.mxu0 %v71_v60  ;;  %v266_v60 = vld [vmem:[%s8338_s1 + $0x720] sm:$0xff]  ;;  %v207_v55 = vld [vmem:[%s8338_s1 + $0x548] sm:$0xff] }
  0x7b   :  { %996 = vmatpush.msrb.mxu1 %v215_v61  ;;  %866 = vmatpush.msrb.mxu3 %v302_v56  ;;  %v257_v61 = vld [vmem:[%s8338_s1 + $0x6d8] sm:$0xff]  ;;  %v198_v56 = vld [vmem:[%s8338_s1 + $0x500] sm:$0xff] }
  0x7c   :  { %977 = vmatpush.msrb.mxu0 %v62_v62  ;;  %v248_v62 = vld [vmem:[%s8338_s1 + $0x690] sm:$0xff] }
  0x7d   :  { %997 = vmatpush.msrb.mxu1 %v206_v63  ;;  %867 = vmatpush.msrb.mxu3 %v293_v57  ;;  %v239_v63 = vld [vmem:[%s8338_s1 + $0x648] sm:$0xff] }
  0x7e   :  { %978 = vmatpush.msrb.mxu0 %v53_v0  ;;  %v230_v0 = vld [vmem:[%s8338_s1 + $0x600] sm:$0xff]  ;;  %v111_v57 = vld [vmem:[%s8338_s1 + $0x248] sm:$0xff] }
  0x7f   :  { %998 = vmatpush.msrb.mxu1 %v197_v1  ;;  %868 = vmatpush.msrb.mxu3 %v284_v58  ;;  %v221_v1 = vld [vmem:[%s8338_s1 + $0x5b8] sm:$0xff] }
  0x80   :  { %979 = vmatpush.msrb.mxu0 %v44_v2  ;;  %v189_v58 = vld [vmem:[%s8338_s1 + $0x4b8] sm:$0xff] }
  0x81   :  { %999 = vmatpush.msrb.mxu1 %v188_v3  ;;  %980 = vmatmul.f32.vlgmr.msrb.gmra.mxu0 %v3993_v34 }
  0x82   :  { %1044 = vmatpush.msra.mxu0 %v181_v4  ;;  %1000 = vmatmul.f32.vlgmr.msrb.gmra.mxu1 %v3998_v35  ;;  %v212_v4 = vld [vmem:[%s8338_s1 + $0x570] sm:$0xff] }
  0x83   :  { %1064 = vmatpush.msra.mxu1 %v325_v5  ;;  %869 = vmatpush.msrb.mxu3 %v275_v59  ;;  %v203_v5 = vld [vmem:[%s8338_s1 + $0x528] sm:$0xff]  ;;  %v102_v59 = vld [vmem:[%s8338_s1 + $0x200] sm:$0xff] }
  0x84   :  { %1045 = vmatpush.msra.mxu0 %v172_v6  ;;  %v194_v6 = vld [vmem:[%s8338_s1 + $0x4e0] sm:$0xff] }
  0x85   :  { %1065 = vmatpush.msra.mxu1 %v316_v7  ;;  %870 = vmatpush.msrb.mxu3 %v266_v60  ;;  %v4489_v7 = vld [vmem:[%s8340_s8] sm:$0xff] }
  0x86   :  { %1046 = vmatpush.msra.mxu0 %v163_v9  ;;  %v1100_v9 = vperm.slane %v4489_v7, 1 }
  0x87   :  { %1066 = vmatpush.msra.mxu1 %v307_v10  ;;  %871 = vmatpush.msrb.mxu3 %v257_v61  ;;  %v322_v10 = vld [vmem:[%s8338_s1 + $0x8e0] sm:$0xff] }
  0x88   :  { %1047 = vmatpush.msra.mxu0 %v154_v12 }
  0x89   :  { %1067 = vmatpush.msra.mxu1 %v298_v13  ;;  %872 = vmatpush.msrb.mxu3 %v248_v62 }
  0x8a   :  { %1048 = vmatpush.msra.mxu0 %v145_v15 }
  0x8b   :  { %1068 = vmatpush.msra.mxu1 %v289_v16  ;;  %873 = vmatpush.msrb.mxu3 %v239_v63  ;;  %v304_v16 = vld [vmem:[%s8338_s1 + $0x850] sm:$0xff]  ;;  %v93_v63 = vld [vmem:[%s8338_s1 + $0x1b8] sm:$0xff] }
  0x8c   :  { %1049 = vmatpush.msra.mxu0 %v136_v18  ;;  %v286_v18 = vld [vmem:[%s8338_s1 + $0x7c0] sm:$0xff] }
  0x8d   :  { %1069 = vmatpush.msra.mxu1 %v280_v19  ;;  %874 = vmatpush.msrb.mxu3 %v230_v0  ;;  %v277_v19 = vld [vmem:[%s8338_s1 + $0x778] sm:$0xff]  ;;  %v84_v0 = vld [vmem:[%s8338_s1 + $0x170] sm:$0xff] }
  0x8e   :  { %1050 = vmatpush.msra.mxu0 %v127_v21  ;;  %v259_v21 = vld [vmem:[%s8338_s1 + $0x6e8] sm:$0xff] }
  0x8f   :  { %1070 = vmatpush.msra.mxu1 %v271_v22  ;;  %875 = vmatpush.msrb.mxu3 %v221_v1  ;;  %v250_v22 = vld [vmem:[%s8338_s1 + $0x6a0] sm:$0xff]  ;;  %v75_v1 = vld [vmem:[%s8338_s1 + $0x128] sm:$0xff] }
  0x90   :  { %1051 = vmatpush.msra.mxu0 %v118_v24  ;;  %v241_v24 = vld [vmem:[%s8338_s1 + $0x658] sm:$0xff] }
  0x91   :  { %1071 = vmatpush.msra.mxu1 %v262_v25  ;;  %876 = vmatpush.msrb.mxu3 %v212_v4  ;;  %v165_v25 = vld [vmem:[%s8338_s1 + $0x3f8] sm:$0xff]  ;;  %v66_v4 = vld [vmem:[%s8338_s1 + $0xe0] sm:$0xff] }
  0x92   :  { %1052 = vmatpush.msra.mxu0 %v109_v27  ;;  %765 = vmatpush.msra.mxu2 %v165_v25  ;;  %v156_v27 = vld [vmem:[%s8338_s1 + $0x3b0] sm:$0xff]  ;;  %v59_v25 = vld [vmem:[%s8338_s1 + $0xa8] sm:$0xff] }
  0x93   :  { %1072 = vmatpush.msra.mxu1 %v253_v28  ;;  %877 = vmatpush.msrb.mxu3 %v203_v5  ;;  %v223_v28 = vld [vmem:[%s8338_s1 + $0x5c8] sm:$0xff]  ;;  %v57_v5 = vld [vmem:[%s8338_s1 + $0x98] sm:$0xff] }
  0x94   :  { %1053 = vmatpush.msra.mxu0 %v100_v30  ;;  %766 = vmatpush.msra.mxu2 %v156_v27  ;;  %v205_v30 = vld [vmem:[%s8338_s1 + $0x538] sm:$0xff] }
  0x95   :  { %1073 = vmatpush.msra.mxu1 %v244_v31  ;;  %878 = vmatpush.msrb.mxu3 %v194_v6  ;;  %v196_v31 = vld [vmem:[%s8338_s1 + $0x4f0] sm:$0xff]  ;;  %v39_v6 = vld [vmem:[%s8338_s1 + $0x8] sm:$0xff]  ;;  %v41_v27 = vld [vmem:[%s8338_s1 + $0x18] sm:$0xff] }
  0x96   :  { %1054 = vmatpush.msra.mxu0 %v91_v33  ;;  %v324_v33 = vld [vmem:[%s8338_s1 + $0x8f0] sm:$0xff] }
  0x97   :  { %1074 = vmatpush.msra.mxu1 %v235_v36  ;;  %879 = vmatpush.msrb.mxu3 %v185_v8  ;;  %v176_v8 = vld [vmem:[%s8338_s1 + $0x450] sm:$0xff] }
  0x98   :  { %1055 = vmatpush.msra.mxu0 %v82_v38  ;;  %880 = vmatmul.f32.vlgmr.msrb.gmra.mxu3 %v3998_v35  ;;  %v147_v38 = vld [vmem:[%s8338_s1 + $0x368] sm:$0xff] }
  0x99   :  { %1075 = vmatpush.msra.mxu1 %v226_v39  ;;  %944 = vmatpush.msra.mxu3 %v322_v10  ;;  %v167_v10 = vld [vmem:[%s8338_s1 + $0x408] sm:$0xff] }
  0x9a   :  { %1056 = vmatpush.msra.mxu0 %v73_v41  ;;  %767 = vmatpush.msra.mxu2 %v147_v38  ;;  %v138_v41 = vld [vmem:[%s8338_s1 + $0x320] sm:$0xff]  ;;  %v97_v38 = vld [vmem:[%s8338_s1 + $0x1d8] sm:$0xff] }
  0x9b   :  { %1076 = vmatpush.msra.mxu1 %v217_v42  ;;  %945 = vmatpush.msra.mxu3 %v313_v14  ;;  %v129_v42 = vld [vmem:[%s8338_s1 + $0x2d8] sm:$0xff]  ;;  %v131_v14 = vld [vmem:[%s8338_s1 + $0x2e8] sm:$0xff] }
  0x9c   :  { %1057 = vmatpush.msra.mxu0 %v64_v44  ;;  %768 = vmatpush.msra.mxu2 %v138_v41  ;;  %v120_v44 = vld [vmem:[%s8338_s1 + $0x290] sm:$0xff]  ;;  %v79_v41 = vld [vmem:[%s8338_s1 + $0x148] sm:$0xff] }
  0x9d   :  { %1077 = vmatpush.msra.mxu1 %v208_v45  ;;  %946 = vmatpush.msra.mxu3 %v304_v16  ;;  %v297_v45 = vld [vmem:[%s8338_s1 + $0x818] sm:$0xff] }
  0x9e   :  { %1058 = vmatpush.msra.mxu0 %v55_v47  ;;  %v4473_v2 = vpop.f32.mrf.mxu0  ;;  %769 = vmatpush.msra.mxu2 %v129_v42  ;;  %v279_v47 = vld [vmem:[%s8338_s1 + $0x788] sm:$0xff]  ;;  %v113_v16 = vld [vmem:[%s8338_s1 + $0x258] sm:$0xff]  ;;  %v70_v42 = vld [vmem:[%s8338_s1 + $0x100] sm:$0xff] }
  0x9f   :  { %1078 = vmatpush.msra.mxu1 %v199_v48  ;;  %v4475_v3 = vpop.f32.mrf.mxu1  ;;  %947 = vmatpush.msra.mxu3 %v295_v17  ;;  %v270_v48 = vld [vmem:[%s8338_s1 + $0x740] sm:$0xff]  ;;  %v104_v17 = vld [vmem:[%s8338_s1 + $0x210] sm:$0xff] }
  0xa0   :  { %1059 = vmatpush.msra.mxu0 %v46_v50  ;;  %770 = vmatpush.msra.mxu2 %v120_v44  ;;  %v252_v50 = vld [vmem:[%s8338_s1 + $0x6b0] sm:$0xff] }
  0xa1   :  { %1079 = vmatpush.msra.mxu1 %v190_v51  ;;  %1060 = vmatmul.f32.vlgmr.msra.gmra.mxu0 %v3993_v34  ;;  %v243_v51 = vld [vmem:[%s8338_s1 + $0x668] sm:$0xff]  ;;  %v52_v44 = vld [vmem:[%s8338_s1 + $0x70] sm:$0xff] }
  0xa2   :  { %1080 = vmatmul.f32.vlgmr.msra.gmra.mxu1 %v3998_v35  ;;  %948 = vmatpush.msra.mxu3 %v286_v18 }
  0xa3   :  { %771 = vmatpush.msra.mxu2 %v111_v57  ;;  %v90_v57 = vld [vmem:[%s8338_s1 + $0x1a0] sm:$0xff] }
  0xa4   :  { %949 = vmatpush.msra.mxu3 %v277_v19 }
  0xa5   :  { %772 = vmatpush.msra.mxu2 %v102_v59  ;;  %v72_v59 = vld [vmem:[%s8338_s1 + $0x110] sm:$0xff] }
  0xa6   :  { %950 = vmatpush.msra.mxu3 %v268_v20 }
  0xa7   :  { %773 = vmatpush.msra.mxu2 %v93_v63  ;;  %v45_v63 = vld [vmem:[%s8338_s1 + $0x38] sm:$0xff] }
  0xa8   :  { %951 = vmatpush.msra.mxu3 %v259_v21  ;;  %v95_v21 = vld [vmem:[%s8338_s1 + $0x1c8] sm:$0xff] }
  0xa9   :  { %774 = vmatpush.msra.mxu2 %v84_v0  ;;  %v712_v0 = vld [vmem:[%s8341_s6] sm:$0xff] }
  0xaa   :  { %952 = vmatpush.msra.mxu3 %v250_v22  ;;  %v86_v22 = vld [vmem:[%s8338_s1 + $0x180] sm:$0xff] }
  0xab   :  { %775 = vmatpush.msra.mxu2 %v75_v1  ;;  %v710_v1 = vld [vmem:[%s8342_s5] sm:$0xff] }
  0xac   :  { %953 = vmatpush.msra.mxu3 %v241_v24  ;;  %v68_v24 = vld [vmem:[%s8338_s1 + $0xf0] sm:$0xff] }
  0xad   :  { %776 = vmatpush.msra.mxu2 %v66_v4  ;;  %v713_v4 = vld [vmem:[%s8341_s6 + $0x8] sm:$0xff] }
  0xae   :  { %954 = vmatpush.msra.mxu3 %v232_v26  ;;  %v50_v26 = vld [vmem:[%s8338_s1 + $0x60] sm:$0xff] }
  0xaf   :  { %777 = vmatpush.msra.mxu2 %v57_v5  ;;  %v711_v5 = vld [vmem:[%s8342_s5 + $0x8] sm:$0xff] }
  0xb0   :  { %955 = vmatpush.msra.mxu3 %v223_v28  ;;  %v178_v28 = vld [vmem:[%s8338_s1 + $0x460] sm:$0xff] }
  0xb2   :  { %956 = vmatpush.msra.mxu3 %v214_v29  ;;  %v169_v29 = vld [vmem:[%s8338_s1 + $0x418] sm:$0xff] }
  0xb4   :  { %957 = vmatpush.msra.mxu3 %v205_v30  ;;  %v160_v30 = vld [vmem:[%s8338_s1 + $0x3d0] sm:$0xff] }
  0xb6   :  { %958 = vmatpush.msra.mxu3 %v196_v31  ;;  %v151_v31 = vld [vmem:[%s8338_s1 + $0x388] sm:$0xff] }
  0xb8   :  { %959 = vmatpush.msra.mxu3 %v187_v32  ;;  %v142_v32 = vld [vmem:[%s8338_s1 + $0x340] sm:$0xff] }
  0xb9   :  { %960 = vmatmul.f32.vlgmr.msra.gmra.mxu3 %v3998_v35 }
  0xba   :  { %1024 = vmatpush.msrb.mxu3 %v324_v33  ;;  %v133_v33 = vld [vmem:[%s8338_s1 + $0x2f8] sm:$0xff] }
  0xbc   :  { %1025 = vmatpush.msrb.mxu3 %v315_v40  ;;  %v88_v40 = vld [vmem:[%s8338_s1 + $0x190] sm:$0xff] }
  0xbe   :  { %v821_v11 = vpop.f32.mrf.mxu0  ;;  %1026 = vmatpush.msrb.mxu3 %v306_v43  ;;  %v61_v43 = vld [vmem:[%s8338_s1 + $0xb8] sm:$0xff] }
  0xbf   :  { %v841_v12 = vpop.f32.mrf.mxu1 }
  0xc0   :  { %v842_v13 = vadd.f32 %v841_v12, %v821_v11  ;;  %1027 = vmatpush.msrb.mxu3 %v297_v45  ;;  %v158_v11 = vld [vmem:[%s8338_s1 + $0x3c0] sm:$0xff]  ;;  %v149_v12 = vld [vmem:[%s8338_s1 + $0x378] sm:$0xff]  ;;  %v43_v45 = vld [vmem:[%s8338_s1 + $0x28] sm:$0xff] }
  0xc2   :  { %v1102_v15 = vadd.f32 %v1100_v9, %v842_v13  ;;  %1028 = vmatpush.msrb.mxu3 %v288_v46  ;;  %v140_v13 = vld [vmem:[%s8338_s1 + $0x330] sm:$0xff] }
  0xc3   :  { %v180_v46 = vld [vmem:[%s8338_s1 + $0x470] sm:$0xff] }
  0xc4   :  { %1302 = vmatpush.msrb.mxu0 %v1102_v15  ;;  %1029 = vmatpush.msrb.mxu3 %v279_v47  ;;  %v122_v15 = vld [vmem:[%s8338_s1 + $0x2a0] sm:$0xff]  ;;  %v171_v47 = vld [vmem:[%s8338_s1 + $0x428] sm:$0xff] }
  0xc5   :  { %3058 = vmatmul.msk.f32.vlgmr.msrb.gmra.mxu0 %vm1108_vm0, %v712_v0 }
  0xc6   :  { %1030 = vmatpush.msrb.mxu3 %v270_v48  ;;  %v162_v48 = vld [vmem:[%s8338_s1 + $0x3e0] sm:$0xff] }
  0xc8   :  { %1031 = vmatpush.msrb.mxu3 %v261_v49  ;;  %v3140_v49 = vld [vmem:[%s8339_s0] sm:$0xff] }
  0xca   :  { %1032 = vmatpush.msrb.mxu3 %v252_v50  ;;  %v153_v50 = vld [vmem:[%s8338_s1 + $0x398] sm:$0xff] }
  0xcc   :  { %1033 = vmatpush.msrb.mxu3 %v243_v51  ;;  %v144_v51 = vld [vmem:[%s8338_s1 + $0x350] sm:$0xff] }
  0xcd   :  { %3059 = vmatmul.msk.f32.gmra.mxu0 %vm1108_vm0, %v713_v4 }
  0xce   :  { %1034 = vmatpush.msrb.mxu3 %v234_v52  ;;  %v135_v52 = vld [vmem:[%s8338_s1 + $0x308] sm:$0xff] }
  0xd0   :  { %1035 = vmatpush.msrb.mxu3 %v225_v53  ;;  %v126_v53 = vld [vmem:[%s8338_s1 + $0x2c0] sm:$0xff] }
  0xd2   :  { %1036 = vmatpush.msrb.mxu3 %v216_v54  ;;  %v117_v54 = vld [vmem:[%s8338_s1 + $0x278] sm:$0xff] }
  0xd4   :  { %1037 = vmatpush.msrb.mxu3 %v207_v55  ;;  %v108_v55 = vld [vmem:[%s8338_s1 + $0x230] sm:$0xff] }
  0xd6   :  { %1038 = vmatpush.msrb.mxu3 %v198_v56  ;;  %v99_v56 = vld [vmem:[%s8338_s1 + $0x1e8] sm:$0xff] }
  0xd8   :  { %1039 = vmatpush.msrb.mxu3 %v189_v58  ;;  %v81_v58 = vld [vmem:[%s8338_s1 + $0x158] sm:$0xff] }
  0xd9   :  { %1040 = vmatmul.f32.vlgmr.msrb.gmra.mxu3 %v3998_v35  ;;  %v48_v35 = vld [vmem:[%s8338_s1 + $0x50] sm:$0xff] }
  0xda   :  { %778 = vmatpush.msra.mxu2 %v48_v35 }
  0xdc   :  { %779 = vmatpush.msra.mxu2 %v39_v6 }
  0xdd   :  { %780 = vmatmul.f32.vlgmr.msra.gmra.mxu2 %v3993_v34 }
  0xde   :  { %v901_v36 = vpop.f32.mrf.mxu0  ;;  %844 = vmatpush.msrb.mxu2 %v176_v8 }
  0xdf   :  { %v921_v37 = vpop.f32.mrf.mxu1 }
  0xe0   :  { %v4561_v39 = vadd.f32 %v921_v37, %v901_v36  ;;  %845 = vmatpush.msrb.mxu2 %v167_v10  ;;  %v115_v36 = vld [vmem:[%s8338_s1 + $0x268] sm:$0xff]  ;;  %v106_v37 = vld [vmem:[%s8338_s1 + $0x220] sm:$0xff] }
  0xe1   :  { %v4823_v10 = vld [vmem:[%s8340_s8 + $0x8] sm:$0xff] }
  0xe2   :  { %846 = vmatpush.msrb.mxu2 %v158_v11 }
  0xe4   :  { %847 = vmatpush.msrb.mxu2 %v149_v12  ;;  %v1101_v12 = vperm.slane %v4823_v10, 1 }
  0xe6   :  { %848 = vmatpush.msrb.mxu2 %v140_v13 }
  0xe8   :  { %849 = vmatpush.msrb.mxu2 %v131_v14 }
  0xea   :  { %850 = vmatpush.msrb.mxu2 %v122_v15 }
  0xec   :  { %851 = vmatpush.msrb.mxu2 %v113_v16  ;;  %v3091_v16 = vld [vmem:[%s8343_s10] ss:$0 sm:$0xff] }
  0xee   :  { %852 = vmatpush.msrb.mxu2 %v104_v17  ;;  %v720_v17 = vld [vmem:[%s8344_s9 + $0x8] sm:$0xff] }
  0xf0   :  { %853 = vmatpush.msrb.mxu2 %v95_v21 }
  0xf2   :  { %854 = vmatpush.msrb.mxu2 %v86_v22 }
  0xf4   :  { %855 = vmatpush.msrb.mxu2 %v77_v23 }
  0xf6   :  { %856 = vmatpush.msrb.mxu2 %v68_v24 }
  0xf8   :  { %857 = vmatpush.msrb.mxu2 %v59_v25 }
  0xf9   :  { %v4816_v6 = vpop.f32.mrf.mxu3 }
  0xfa   :  { %858 = vmatpush.msrb.mxu2 %v50_v26 }
  0xfc   :  { %859 = vmatpush.msrb.mxu2 %v41_v27 }
  0xfd   :  { %860 = vmatmul.f32.vlgmr.msrb.gmra.mxu2 %v3993_v34  ;;  %v124_v34 = vld [vmem:[%s8338_s1 + $0x2b0] sm:$0xff] }
  0xfe   :  { %v981_v60 = vpop.f32.mrf.mxu0  ;;  %924 = vmatpush.msra.mxu2 %v178_v28 }
  0xff   :  { %v1001_v61 = vpop.f32.mrf.mxu1 }
 0x100   :  { %v4624_v62 = vadd.f32 %v1001_v61, %v981_v60  ;;  %925 = vmatpush.msra.mxu2 %v169_v29  ;;  %v63_v60 = vld [vmem:[%s8338_s1 + $0xc8] sm:$0xff]  ;;  %v54_v61 = vld [vmem:[%s8338_s1 + $0x80] sm:$0xff] }
 0x102   :  { %926 = vmatpush.msra.mxu2 %v160_v30 }
 0x104   :  { %927 = vmatpush.msra.mxu2 %v151_v31 }
 0x106   :  { %928 = vmatpush.msra.mxu2 %v142_v32 }
 0x108   :  { %929 = vmatpush.msra.mxu2 %v133_v33 }
 0x10a   :  { %930 = vmatpush.msra.mxu2 %v124_v34 }
 0x10c   :  { %931 = vmatpush.msra.mxu2 %v115_v36 }
 0x10e   :  { %932 = vmatpush.msra.mxu2 %v106_v37 }
 0x110   :  { %933 = vmatpush.msra.mxu2 %v97_v38 }
 0x112   :  { %934 = vmatpush.msra.mxu2 %v88_v40 }
 0x114   :  { %935 = vmatpush.msra.mxu2 %v79_v41 }
 0x116   :  { %936 = vmatpush.msra.mxu2 %v70_v42 }
 0x118   :  { %937 = vmatpush.msra.mxu2 %v61_v43 }
 0x11a   :  { %938 = vmatpush.msra.mxu2 %v52_v44 }
 0x11b   :  { %v881_v11 = vpop.f32.mrf.mxu3 }
 0x11c   :  { %939 = vmatpush.msra.mxu2 %v43_v45 }
 0x11d   :  { %940 = vmatmul.f32.vlgmr.msra.gmra.mxu2 %v3140_v49 }
 0x11e   :  { %v1061_v18 = vpop.f32.mrf.mxu0  ;;  %1004 = vmatpush.msrb.mxu2 %v180_v46  ;;  %v3827_v46 = vmov 0  }
 0x11f   :  { %v1081_v19 = vpop.f32.mrf.mxu1  ;;  %3088 = vset.pattern.permute.xlu2 %v3827_v46  ;;  %3089 = vset.pattern.permute.xlu1 %v3827_v46 }
 0x120   :  { %v1082_v20 = vadd.f32 %v1081_v19, %v1061_v18  ;;  %1005 = vmatpush.msrb.mxu2 %v171_v47  ;;  %v719_v18 = vld [vmem:[%s8344_s9] sm:$0xff]  ;;  %3090 = vset.pattern.permute.xlu0 %v3827_v46 }
 0x121   :  { %v3083_v21 = vpack.i.bf16 %v719_v18, %v720_v17 }
 0x122   :  { %1105 = vrot.lane.b32.xlu0 %v1082_v20, %s3825_s29  ;;  %1159 = vmatpush.msra.mxu3 %v1082_v20 }
 0x123   :  { %1006 = vmatpush.msrb.mxu2 %v162_v48  ;;  %3052 = vmatmul.msk.f32.vlgmr.msra.gmra.mxu3 %vm1108_vm0, %v710_v1  ;;  %v500_v1 = vld [vmem:[%s8345_s2 + $0x570] sm:$0xff] }
 0x124   :  { %3084 = vrot.lane.b32.xlu1 %v3083_v21, %s3825_s29  ;;  %v386_v21 = vld [vmem:[%s8345_s2 + $0x1e0] sm:$0xff] }
 0x125   :  { %1007 = vmatpush.msrb.mxu2 %v153_v50 }
 0x127   :  { %1008 = vmatpush.msrb.mxu2 %v144_v51 }
 0x129   :  { %1009 = vmatpush.msrb.mxu2 %v135_v52  ;;  %v4870_v52 = vperm.slane %v4489_v7, 4 }
 0x12a   :  { %1174 = vrot.lane.b32.xlu0 %v3091_v16, %s3825_s29 }
 0x12b   :  { %1010 = vmatpush.msrb.mxu2 %v126_v53  ;;  %3053 = vmatmul.msk.f32.gmra.mxu3 %vm1108_vm0, %v711_v5  ;;  %v4873_v53 = vperm.slane %v4823_v10, 4 }
 0x12c   :  { %1217 = vrot.lane.b32.xlu1 %v3091_v16, %s3826_s15 }
 0x12d   :  { %1011 = vmatpush.msrb.mxu2 %v117_v54  ;;  %v416_v54 = vld [vmem:[%s8345_s2 + $0x2d0] sm:$0xff] }
 0x12e   :  { %1380 = vmatpush.msra.mxu0 %v416_v54 }
 0x12f   :  { %1012 = vmatpush.msrb.mxu2 %v108_v55  ;;  %v512_v55 = vld [vmem:[%s8345_s2 + $0x5d0] sm:$0xff] }
 0x131   :  { %1013 = vmatpush.msrb.mxu2 %v99_v56  ;;  %v4882_v56 = vperm.slane %v4489_v7, 5 }
 0x133   :  { %1014 = vmatpush.msrb.mxu2 %v90_v57  ;;  %v4885_v57 = vperm.slane %v4823_v10, 5  ;;  %v3438_v10 = vld [vmem:[%s8345_s2 + $0x240] sm:$0xff] }
 0x135   :  { %1015 = vmatpush.msrb.mxu2 %v81_v58  ;;  %v410_v58 = vld [vmem:[%s8345_s2 + $0x2a0] sm:$0xff] }
 0x136   :  { %1381 = vmatpush.msra.mxu0 %v410_v58 }
 0x137   :  { %1016 = vmatpush.msrb.mxu2 %v72_v59  ;;  %v506_v59 = vld [vmem:[%s8345_s2 + $0x5a0] sm:$0xff] }
 0x139   :  { %1017 = vmatpush.msrb.mxu2 %v63_v60 }
 0x13b   :  { %1018 = vmatpush.msrb.mxu2 %v54_v61 }
 0x13c   :  { %v4840_v19 = vpop.f32.mrf.mxu3 }
 0x13d   :  { %1019 = vmatpush.msrb.mxu2 %v45_v63 }
 0x13e   :  { %1020 = vmatmul.f32.vlgmr.msrb.gmra.mxu2 %v3140_v49 }
 0x15c   :  { %v4845_v22 = vpop.f32.mrf.mxu3 }
 0x160   :  { %v4818_v8 = vpop.f32.mrf.mxu2 }
 0x180   :  { %v861_v13 = vpop.f32.mrf.mxu2 }
 0x181   :  { %v882_v14 = vadd.f32 %v881_v11, %v861_v13  ;;  %v494_v11 = vld [vmem:[%s8345_s2 + $0x540] sm:$0xff] }
 0x183   :  { %v1103_v15 = vadd.f32 %v1101_v12, %v882_v14 }
 0x185   :  { %1325 = vmatpush.msrb.mxu1 %v1103_v15  ;;  %v4909_v15 = vpop.f32.mrf.mxu0 }
 0x186   :  { %3060 = vmatmul.msk.f32.vlgmr.msrb.gmra.mxu1 %vm1108_vm0, %v712_v0 }
 0x187   :  { %1400 = vmatpush.msra.mxu1 %v512_v55 }
 0x189   :  { %1401 = vmatpush.msra.mxu1 %v506_v59  ;;  %v356_v59 = vld [vmem:[%s8345_s2 + $0xf0] sm:$0xff] }
 0x18b   :  { %1402 = vmatpush.msra.mxu1 %v500_v1  ;;  %v446_v1 = vld [vmem:[%s8345_s2 + $0x3c0] sm:$0xff] }
 0x18d   :  { %1403 = vmatpush.msra.mxu1 %v494_v11 }
 0x18e   :  { %3061 = vmatmul.msk.f32.gmra.mxu1 %vm1108_vm0, %v713_v4 }
 0x194   :  { %v1106_v35 = vpop.permute.xlu0 %1105 }
 0x195   :  { %1130 = vmatpush.msra.mxu2 %v1106_v35  ;;  %v398_v35 = vld [vmem:[%s8345_s2 + $0x240] sm:$0xff] }
 0x196   :  { %3050 = vmatmul.msk.f32.vlgmr.msra.gmra.mxu2 %vm1108_vm0, %v712_v0  ;;  %v4851_v34 = vpop.permute.xlu1 %3084  ;;  %v404_v0 = vld [vmem:[%s8345_s2 + $0x270] sm:$0xff] }
 0x197   :  { %1198 = vmatpush.msrb.mxu2 %v720_v17  ;;  %v3087_v36 = vunpack.i.h.bf16 %v4851_v34  ;;  %v3086_v37 = vunpack.i.l.bf16 %v4851_v34  ;;  %1382 = vmatpush.msra.mxu0 %v404_v0  ;;  %v488_v17 = vld [vmem:[%s8345_s2 + $0x510] sm:$0xff]  ;;  %v350_v0 = vld [vmem:[%s8345_s2 + $0xc0] sm:$0xff] }
 0x198   :  { %1404 = vmatpush.msra.mxu1 %v488_v17  ;;  %v434_v17 = vld [vmem:[%s8345_s2 + $0x360] sm:$0xff] }
 0x199   :  { %1199 = vmatpush.msrb.mxu2 %v719_v18  ;;  %1240 = vmatpush.msrb.mxu3 %v3086_v37  ;;  %v3502_v34 = vld [vmem:[%s8344_s9] sm:$0xff] }
 0x19a   :  { %1383 = vmatpush.msra.mxu0 %v398_v35  ;;  %v440_v35 = vld [vmem:[%s8345_s2 + $0x390] sm:$0xff] }
 0x19b   :  { %1241 = vmatpush.msrb.mxu3 %v3087_v36 }
 0x19c   :  { %v4859_v38 = vpop.permute.xlu0 %1174 }
 0x19e   :  { %3051 = vmatmul.msk.f32.gmra.mxu2 %vm1108_vm0, %v713_v4  ;;  %v4865_v48 = vpop.permute.xlu1 %1217 }
 0x1a0   :  { %v4842_v20 = vpop.f32.mrf.mxu2 }
 0x1a6   :  { %v1161_v24 = vpop.f32.mrf.mxu3 }
 0x1ae   :  { %v1164_v29 = vpop.f32.mrf.mxu3 }
 0x1c1   :  { %v4847_v23 = vpop.f32.mrf.mxu2 }
 0x203   :  { %v4917_v18 = vpop.f32.mrf.mxu1 }
 0x20b   :  { %v1330_v55 = vpop.f32.mrf.mxu1 }
 0x219   :  { %v1132_v25 = vpop.f32.mrf.mxu2 }
 0x21a   :  { %v1162_v26 = vadd.f32 %v1161_v24, %v1132_v25  ;;  %v482_v24 = vld [vmem:[%s8345_s2 + $0x4e0] sm:$0xff] }
 0x21b   :  { %1405 = vmatpush.msra.mxu1 %v482_v24 }
 0x21c   :  { %v1170_v27 = vadd.f32 %v3091_v16, %v1162_v26 }
 0x21e   :  { %v1172_v28 = vmax.f32 %v1170_v27, 0.0 }
 0x220   :  { %3054 = vmatmul.msk.f32.vlgmr.msrb.gmra.mxu2 %vm1177_vm1, %v1172_v28  ;;  %v380_v28 = vld [vmem:[%s8345_s2 + $0x1b0] sm:$0xff] }
 0x221   :  { %v1135_v30 = vpop.f32.mrf.mxu2 }
 0x222   :  { %v1165_v31 = vadd.f32 %v1164_v29, %v1135_v30  ;;  %v476_v29 = vld [vmem:[%s8345_s2 + $0x4b0] sm:$0xff] }
 0x223   :  { %1406 = vmatpush.msra.mxu1 %v476_v29 }
 0x224   :  { %v1171_v32 = vadd.f32 %v3091_v16, %v1165_v31  ;;  %v392_v16 = vld [vmem:[%s8345_s2 + $0x210] sm:$0xff] }
 0x225   :  { %1384 = vmatpush.msra.mxu0 %v392_v16  ;;  %v338_v16 = vld [vmem:[%s8345_s2 + $0x60] sm:$0xff] }
 0x226   :  { %v1173_v33 = vmax.f32 %v1171_v32, 0.0  ;;  %v374_v32 = vld [vmem:[%s8345_s2 + $0x180] sm:$0xff] }
 0x227   :  { %1385 = vmatpush.msra.mxu0 %v386_v21 }
 0x228   :  { %3055 = vmatmul.msk.f32.gmra.mxu2 %vm1177_vm1, %v1173_v33  ;;  %v470_v33 = vld [vmem:[%s8345_s2 + $0x480] sm:$0xff] }
 0x229   :  { %1386 = vmatpush.msra.mxu0 %v380_v28  ;;  %1407 = vmatpush.msra.mxu1 %v470_v33  ;;  %v714_v28 = vld [vmem:[%s8346_s7] sm:$0xff]  ;;  %v507_v33 = vld [vmem:[%s8345_s2 + $0x5a8] sm:$0xff] }
 0x22b   :  { %1387 = vmatpush.msra.mxu0 %v374_v32  ;;  %v422_v32 = vld [vmem:[%s8345_s2 + $0x300] sm:$0xff] }
 0x2a3   :  { %v1201_v40 = vpop.f32.mrf.mxu2 }
 0x2a4   :  { %v1202_v41 = vadd.f32 %v1201_v40, %v4859_v38 }
 0x2a6   :  { %v1207_v42 = vmax.f32 %v1202_v41, 0.0 }
 0x2a8   :  { %3056 = vmatmul.msk.f32.vlgmr.msrb.gmra.mxu3 %vm1177_vm1, %v1207_v42 }
 0x2ab   :  { %v1204_v43 = vpop.f32.mrf.mxu2 }
 0x2ac   :  { %v1205_v44 = vadd.f32 %v1204_v43, %v4859_v38  ;;  %v368_v43 = vld [vmem:[%s8345_s2 + $0x150] sm:$0xff] }
 0x2ad   :  { %1388 = vmatpush.msra.mxu0 %v368_v43  ;;  %v501_v43 = vld [vmem:[%s8345_s2 + $0x578] sm:$0xff] }
 0x2ae   :  { %v1208_v45 = vmax.f32 %v1205_v44, 0.0  ;;  %v464_v44 = vld [vmem:[%s8345_s2 + $0x450] sm:$0xff] }
 0x2af   :  { %1408 = vmatpush.msra.mxu1 %v464_v44  ;;  %v412_v44 = vld [vmem:[%s8345_s2 + $0x2b0] sm:$0xff] }
 0x2b0   :  { %3057 = vmatmul.msk.f32.gmra.mxu3 %vm1177_vm1, %v1208_v45 }
 0x32b   :  { %v1243_v47 = vpop.f32.mrf.mxu3 }
 0x32c   :  { %v1244_v51 = vadd.f32 %v1243_v47, %v4865_v48  ;;  %v1307_v47 = vpop.f32.mrf.mxu0 }
 0x333   :  { %v1246_v49 = vpop.f32.mrf.mxu3 }
 0x334   :  { %v1247_v50 = vadd.f32 %v1246_v49, %v4865_v48 }
 0x336   :  { %1256 = vperm.xlu2 %3088, %v1247_v50   ;;  %v362_v50 = vld [vmem:[%s8345_s2 + $0x120] sm:$0xff] }
 0x337   :  { %1389 = vmatpush.msra.mxu0 %v362_v50  ;;  %v393_v50 = vld [vmem:[%s8345_s2 + $0x218] sm:$0xff] }
 0x339   :  { %1390 = vmatpush.msra.mxu0 %v356_v59  ;;  %v496_v59 = vld [vmem:[%s8345_s2 + $0x550] sm:$0xff] }
 0x33b   :  { %1391 = vmatpush.msra.mxu0 %v350_v0  ;;  %v490_v0 = vld [vmem:[%s8345_s2 + $0x520] sm:$0xff] }
 0x33e   :  { %1251 = vperm.xlu2 %3088, %v1244_v51   ;;  %v458_v51 = vld [vmem:[%s8345_s2 + $0x420] sm:$0xff] }
 0x33f   :  { %1409 = vmatpush.msra.mxu1 %v458_v51  ;;  %v502_v51 = vld [vmem:[%s8345_s2 + $0x580] sm:$0xff] }
 0x390   :  { %v1257_v60 = vpop.permute.xlu2 %1256 }
 0x391   :  { %v1263_v61 = vmul.f32 %v4870_v52, %v1257_v60  ;;  %v1264_v63 = vmul.f32 %v4873_v53, %v1257_v60  ;;  %v452_v60 = vld [vmem:[%s8345_s2 + $0x3f0] sm:$0xff] }
 0x392   :  { %1410 = vmatpush.msra.mxu1 %v452_v60  ;;  %v483_v60 = vld [vmem:[%s8345_s2 + $0x4e8] sm:$0xff] }
 0x393   :  { %v1269_v4 = vadd.f32 %v4882_v56, %v1263_v61  ;;  %v1270_v5 = vadd.f32 %v4885_v57, %v1264_v63 }
 0x394   :  { %1411 = vmatpush.msra.mxu1 %v446_v1  ;;  %v477_v1 = vld [vmem:[%s8345_s2 + $0x4b8] sm:$0xff] }
 0x395   :  { %v1273_v13 = vmul.f32 0.5, %v1269_v4  ;;  %v1274_v14 = vmul.f32 0.5, %v1270_v5  ;;  %v344_v5 = vld [vmem:[%s8345_s2 + $0x90] sm:$0xff] }
 0x396   :  { %1392 = vmatpush.msra.mxu0 %v344_v5  ;;  %1412 = vmatpush.msra.mxu1 %v440_v35  ;;  %v375_v5 = vld [vmem:[%s8345_s2 + $0x188] sm:$0xff]  ;;  %v484_v35 = vld [vmem:[%s8345_s2 + $0x4f0] sm:$0xff] }
 0x397   :  { %3092 = vtanh.f32 %v1273_v13 }
 0x398   :  { %v1252_v25 = vpop.permute.xlu2 %1251  ;;  %3094 = vtanh.f32 %v1274_v14  ;;  %1393 = vmatpush.msra.mxu0 %v338_v16  ;;  %1413 = vmatpush.msra.mxu1 %v434_v17  ;;  %v478_v16 = vld [vmem:[%s8345_s2 + $0x4c0] sm:$0xff]  ;;  %v465_v17 = vld [vmem:[%s8345_s2 + $0x458] sm:$0xff] }
 0x399   :  { %v1261_v26 = vmul.f32 %v4870_v52, %v1252_v25  ;;  %v1262_v27 = vmul.f32 %v4873_v53, %v1252_v25  ;;  %v332_v25 = vld [vmem:[%s8345_s2 + $0x30] sm:$0xff] }
 0x39a   :  { %1394 = vmatpush.msra.mxu0 %v332_v25  ;;  %v472_v25 = vld [vmem:[%s8345_s2 + $0x490] sm:$0xff] }
 0x39b   :  { %v1267_v30 = vadd.f32 %v4882_v56, %v1261_v26  ;;  %v1268_v31 = vadd.f32 %v4885_v57, %v1262_v27  ;;  %v428_v26 = vld [vmem:[%s8345_s2 + $0x330] sm:$0xff] }
 0x39c   :  { %1414 = vmatpush.msra.mxu1 %v428_v26  ;;  %v459_v26 = vld [vmem:[%s8345_s2 + $0x428] sm:$0xff] }
 0x39d   :  { %v3093_v40 = vpop.eup %3092  ;;  %v1271_v41 = vmul.f32 0.5, %v1267_v30  ;;  %v1272_v42 = vmul.f32 0.5, %v1268_v31  ;;  %v417_v30 = vld [vmem:[%s8345_s2 + $0x2d8] sm:$0xff] }
 0x39e   :  { %v3095_v45 = vpop.eup %3094  ;;  %v1281_v46 = vadd.f32 1.0, %v3093_v40  ;;  %v513_v31 = vld [vmem:[%s8345_s2 + $0x5d8] sm:$0xff]  ;;  %v418_v40 = vld [vmem:[%s8345_s2 + $0x2e0] sm:$0xff]  ;;  %1415 = vmatpush.msra.mxu1 %v422_v32  ;;  %v447_v32 = vld [vmem:[%s8345_s2 + $0x3c8] sm:$0xff] }
 0x39f   :  { %3096 = vtanh.f32 %v1271_v41  ;;  %v1282_v49 = vadd.f32 1.0, %v3095_v45  ;;  %v405_v41 = vld [vmem:[%s8345_s2 + $0x278] sm:$0xff]  ;;  %v399_v45 = vld [vmem:[%s8345_s2 + $0x248] sm:$0xff] }
 0x3a0   :  { %3098 = vtanh.f32 %v1272_v42  ;;  %v1285_v54 = vmul.f32 0.5, %v1281_v46  ;;  %v514_v42 = vld [vmem:[%s8345_s2 + $0x5e0] sm:$0xff]  ;;  %v508_v46 = vld [vmem:[%s8345_s2 + $0x5b0] sm:$0xff] }
 0x3a1   :  { %v1286_v58 = vmul.f32 0.5, %v1282_v49  ;;  %1480 = vmatpush.msrb.mxu1 %v514_v42  ;;  %v406_v49 = vld [vmem:[%s8345_s2 + $0x280] sm:$0xff]  ;;  %v441_v42 = vld [vmem:[%s8345_s2 + $0x398] sm:$0xff] }
 0x3a2   :  { %v1335_v61 = vmul.f32 %v1307_v47, %v1285_v54  ;;  %v495_v47 = vld [vmem:[%s8345_s2 + $0x548] sm:$0xff]  ;;  %v489_v54 = vld [vmem:[%s8345_s2 + $0x518] sm:$0xff] }
 0x3a3   :  { %v1336_v63 = vmul.f32 %v1330_v55, %v1286_v58  ;;  %1481 = vmatpush.msrb.mxu1 %v508_v46  ;;  %v400_v55 = vld [vmem:[%s8345_s2 + $0x250] sm:$0xff]  ;;  %v387_v58 = vld [vmem:[%s8345_s2 + $0x1e8] sm:$0xff] }
 0x3a4   :  { %1354 = vmatpush.msra.mxu2 %v1335_v61  ;;  %v394_v61 = vld [vmem:[%s8345_s2 + $0x220] sm:$0xff]  ;;  %v435_v46 = vld [vmem:[%s8345_s2 + $0x368] sm:$0xff] }
 0x3a5   :  { %v3097_v4 = vpop.eup %3096  ;;  %1374 = vmatpush.msra.mxu3 %v1336_v63  ;;  %1482 = vmatpush.msrb.mxu1 %v502_v51  ;;  %v381_v63 = vld [vmem:[%s8345_s2 + $0x1b8] sm:$0xff] }
 0x3a6   :  { %v3099_v11 = vpop.eup %3098  ;;  %v1279_v13 = vadd.f32 1.0, %v3097_v4  ;;  %v388_v4 = vld [vmem:[%s8345_s2 + $0x1f0] sm:$0xff]  ;;  %v429_v51 = vld [vmem:[%s8345_s2 + $0x338] sm:$0xff] }
 0x3a7   :  { %v1280_v14 = vadd.f32 1.0, %v3099_v11  ;;  %1483 = vmatpush.msrb.mxu1 %v496_v59  ;;  %v471_v11 = vld [vmem:[%s8345_s2 + $0x488] sm:$0xff] }
 0x3a8   :  { %v1283_v21 = vmul.f32 0.5, %v1279_v13  ;;  %v382_v13 = vld [vmem:[%s8345_s2 + $0x1c0] sm:$0xff]  ;;  %v423_v59 = vld [vmem:[%s8345_s2 + $0x308] sm:$0xff] }
 0x3a9   :  { %v1284_v24 = vmul.f32 0.5, %v1280_v14  ;;  %1484 = vmatpush.msrb.mxu1 %v490_v0  ;;  %v369_v14 = vld [vmem:[%s8345_s2 + $0x158] sm:$0xff] }
 0x3aa   :  { %v1333_v27 = vmul.f32 %v4909_v15, %v1283_v21  ;;  %v326_v15 = vld [vmem:[%s8345_s2] sm:$0xff]  ;;  %v376_v21 = vld [vmem:[%s8345_s2 + $0x190] sm:$0xff]  ;;  %v413_v0 = vld [vmem:[%s8345_s2 + $0x2b8] sm:$0xff] }
 0x3ab   :  { %v1334_v29 = vmul.f32 %v4917_v18, %v1284_v24  ;;  %v411_v18 = vld [vmem:[%s8345_s2 + $0x2a8] sm:$0xff]  ;;  %1395 = vmatpush.msra.mxu0 %v326_v15  ;;  %1485 = vmatpush.msrb.mxu1 %v484_v35 }
 0x3ac   :  { %1355 = vmatpush.msra.mxu2 %v1333_v27  ;;  %v363_v24 = vld [vmem:[%s8345_s2 + $0x128] sm:$0xff]  ;;  %v370_v27 = vld [vmem:[%s8345_s2 + $0x160] sm:$0xff] }
 0x3ad   :  { %1375 = vmatpush.msra.mxu3 %v1334_v29  ;;  %3062 = vmatmul.msk.f32.vlgmr.msra.gmra.mxu2 %vm1177_vm1, %v714_v28  ;;  %v466_v29 = vld [vmem:[%s8345_s2 + $0x460] sm:$0xff]  ;;  %v351_v15 = vld [vmem:[%s8345_s2 + $0xc8] sm:$0xff] }
 0x3ae   :  { %3063 = vmatmul.msk.f32.vlgmr.msra.gmra.mxu3 %vm1177_vm1, %v714_v28  ;;  %1420 = vmatpush.msrb.mxu2 %v417_v30  ;;  %v357_v28 = vld [vmem:[%s8345_s2 + $0xf8] sm:$0xff]  ;;  %v503_v35 = vld [vmem:[%s8345_s2 + $0x588] sm:$0xff] }
 0x3af   :  { %1440 = vmatpush.msrb.mxu3 %v513_v31  ;;  %1460 = vmatpush.msrb.mxu0 %v418_v40  ;;  %v453_v30 = vld [vmem:[%s8345_s2 + $0x3f8] sm:$0xff]  ;;  %v364_v31 = vld [vmem:[%s8345_s2 + $0x130] sm:$0xff] }
 0x3b0   :  { %1421 = vmatpush.msrb.mxu2 %v411_v18  ;;  %1486 = vmatpush.msrb.mxu1 %v478_v16  ;;  %v460_v18 = vld [vmem:[%s8345_s2 + $0x430] sm:$0xff]  ;;  %v345_v40 = vld [vmem:[%s8345_s2 + $0x98] sm:$0xff]  ;;  %v491_v16 = vld [vmem:[%s8345_s2 + $0x528] sm:$0xff] }
 0x3b1   :  { %1441 = vmatpush.msrb.mxu3 %v507_v33  ;;  %1461 = vmatpush.msrb.mxu0 %v412_v44  ;;  %v358_v33 = vld [vmem:[%s8345_s2 + $0x100] sm:$0xff]  ;;  %v339_v44 = vld [vmem:[%s8345_s2 + $0x68] sm:$0xff] }
 0x3b2   :  { %1422 = vmatpush.msrb.mxu2 %v405_v41  ;;  %1487 = vmatpush.msrb.mxu1 %v472_v25  ;;  %v454_v41 = vld [vmem:[%s8345_s2 + $0x400] sm:$0xff]  ;;  %v479_v25 = vld [vmem:[%s8345_s2 + $0x4c8] sm:$0xff] }
 0x3b3   :  { %1442 = vmatpush.msrb.mxu3 %v501_v43  ;;  %1462 = vmatpush.msrb.mxu0 %v406_v49  ;;  %v352_v43 = vld [vmem:[%s8345_s2 + $0xd0] sm:$0xff]  ;;  %v333_v49 = vld [vmem:[%s8345_s2 + $0x38] sm:$0xff] }
 0x3b4   :  { %1423 = vmatpush.msrb.mxu2 %v399_v45  ;;  %1488 = vmatpush.msrb.mxu1 %v466_v29  ;;  %v448_v45 = vld [vmem:[%s8345_s2 + $0x3d0] sm:$0xff]  ;;  %v467_v29 = vld [vmem:[%s8345_s2 + $0x468] sm:$0xff] }
 0x3b5   :  { %1443 = vmatpush.msrb.mxu3 %v495_v47  ;;  %1463 = vmatpush.msrb.mxu0 %v400_v55  ;;  %v346_v47 = vld [vmem:[%s8345_s2 + $0xa0] sm:$0xff]  ;;  %v327_v55 = vld [vmem:[%s8345_s2 + $0x8] sm:$0xff] }
 0x3b6   :  { %1424 = vmatpush.msrb.mxu2 %v393_v50  ;;  %1489 = vmatpush.msrb.mxu1 %v460_v18  ;;  %v442_v50 = vld [vmem:[%s8345_s2 + $0x3a0] sm:$0xff]  ;;  %v455_v18 = vld [vmem:[%s8345_s2 + $0x408] sm:$0xff] }
 0x3b7   :  { %1444 = vmatpush.msrb.mxu3 %v489_v54  ;;  %1464 = vmatpush.msrb.mxu0 %v394_v61  ;;  %v340_v54 = vld [vmem:[%s8345_s2 + $0x70] sm:$0xff]  ;;  %v515_v61 = vld [vmem:[%s8345_s2 + $0x5e8] sm:$0xff] }
 0x3b8   :  { %1425 = vmatpush.msrb.mxu2 %v387_v58  ;;  %1490 = vmatpush.msrb.mxu1 %v454_v41  ;;  %v436_v58 = vld [vmem:[%s8345_s2 + $0x370] sm:$0xff]  ;;  %v443_v41 = vld [vmem:[%s8345_s2 + $0x3a8] sm:$0xff] }
 0x3b9   :  { %1445 = vmatpush.msrb.mxu3 %v483_v60  ;;  %1465 = vmatpush.msrb.mxu0 %v388_v4  ;;  %v419_v60 = vld [vmem:[%s8345_s2 + $0x2e8] sm:$0xff]  ;;  %v509_v4 = vld [vmem:[%s8345_s2 + $0x5b8] sm:$0xff] }
 0x3ba   :  { %1426 = vmatpush.msrb.mxu2 %v381_v63  ;;  %1491 = vmatpush.msrb.mxu1 %v448_v45  ;;  %v334_v63 = vld [vmem:[%s8345_s2 + $0x40] sm:$0xff]  ;;  %v431_v45 = vld [vmem:[%s8345_s2 + $0x348] sm:$0xff] }
 0x3bb   :  { %1446 = vmatpush.msrb.mxu3 %v477_v1  ;;  %1466 = vmatpush.msrb.mxu0 %v382_v13  ;;  %v430_v1 = vld [vmem:[%s8345_s2 + $0x340] sm:$0xff]  ;;  %v497_v13 = vld [vmem:[%s8345_s2 + $0x558] sm:$0xff] }
 0x3bc   :  { %1427 = vmatpush.msrb.mxu2 %v375_v5  ;;  %1492 = vmatpush.msrb.mxu1 %v442_v50  ;;  %v407_v5 = vld [vmem:[%s8345_s2 + $0x288] sm:$0xff]  ;;  %v425_v50 = vld [vmem:[%s8345_s2 + $0x318] sm:$0xff] }
 0x3bd   :  { %1447 = vmatpush.msrb.mxu3 %v471_v11  ;;  %1467 = vmatpush.msrb.mxu0 %v376_v21  ;;  %v401_v11 = vld [vmem:[%s8345_s2 + $0x258] sm:$0xff] }
 0x3be   :  { %1428 = vmatpush.msrb.mxu2 %v369_v14  ;;  %1493 = vmatpush.msrb.mxu1 %v436_v58  ;;  %v395_v14 = vld [vmem:[%s8345_s2 + $0x228] sm:$0xff]  ;;  %v485_v21 = vld [vmem:[%s8345_s2 + $0x4f8] sm:$0xff] }
 0x3bf   :  { %1448 = vmatpush.msrb.mxu3 %v465_v17  ;;  %1468 = vmatpush.msrb.mxu0 %v370_v27  ;;  %v389_v17 = vld [vmem:[%s8345_s2 + $0x1f8] sm:$0xff] }
 0x3c0   :  { %1429 = vmatpush.msrb.mxu2 %v363_v24  ;;  %1494 = vmatpush.msrb.mxu1 %v430_v1  ;;  %v383_v24 = vld [vmem:[%s8345_s2 + $0x1c8] sm:$0xff]  ;;  %v473_v27 = vld [vmem:[%s8345_s2 + $0x498] sm:$0xff] }
 0x3c1   :  { %1449 = vmatpush.msrb.mxu3 %v459_v26  ;;  %1469 = vmatpush.msrb.mxu0 %v364_v31  ;;  %v377_v26 = vld [vmem:[%s8345_s2 + $0x198] sm:$0xff]  ;;  %v511_v1 = vld [vmem:[%s8345_s2 + $0x5c8] sm:$0xff] }
 0x3c2   :  { %1430 = vmatpush.msrb.mxu2 %v357_v28  ;;  %v371_v28 = vld [vmem:[%s8345_s2 + $0x168] sm:$0xff]  ;;  %v461_v31 = vld [vmem:[%s8345_s2 + $0x438] sm:$0xff] }
 0x3c3   :  { %1450 = vmatpush.msrb.mxu3 %v453_v30  ;;  %1470 = vmatpush.msrb.mxu0 %v358_v33  ;;  %v365_v30 = vld [vmem:[%s8345_s2 + $0x138] sm:$0xff] }
 0x3c4   :  { %1431 = vmatpush.msrb.mxu2 %v351_v15  ;;  %v359_v15 = vld [vmem:[%s8345_s2 + $0x108] sm:$0xff]  ;;  %v449_v33 = vld [vmem:[%s8345_s2 + $0x3d8] sm:$0xff] }
 0x3c5   :  { %1451 = vmatpush.msrb.mxu3 %v447_v32  ;;  %1471 = vmatpush.msrb.mxu0 %v352_v43  ;;  %v353_v32 = vld [vmem:[%s8345_s2 + $0xd8] sm:$0xff] }
 0x3c6   :  { %1432 = vmatpush.msrb.mxu2 %v345_v40  ;;  %v347_v40 = vld [vmem:[%s8345_s2 + $0xa8] sm:$0xff]  ;;  %v437_v43 = vld [vmem:[%s8345_s2 + $0x378] sm:$0xff] }
 0x3c7   :  { %1452 = vmatpush.msrb.mxu3 %v441_v42  ;;  %1472 = vmatpush.msrb.mxu0 %v346_v47  ;;  %v341_v42 = vld [vmem:[%s8345_s2 + $0x78] sm:$0xff]  ;;  %v424_v47 = vld [vmem:[%s8345_s2 + $0x310] sm:$0xff] }
 0x3c8   :  { %1433 = vmatpush.msrb.mxu2 %v339_v44  ;;  %v335_v44 = vld [vmem:[%s8345_s2 + $0x48] sm:$0xff]  ;;  %1495 = vmatpush.msrb.mxu1 %v424_v47  ;;  %v366_v47 = vld [vmem:[%s8345_s2 + $0x140] sm:$0xff] }
 0x3c9   :  { %1453 = vmatpush.msrb.mxu3 %v435_v46  ;;  %1473 = vmatpush.msrb.mxu0 %v340_v54  ;;  %v328_v46 = vld [vmem:[%s8345_s2 + $0x10] sm:$0xff] }
 0x3ca   :  { %1434 = vmatpush.msrb.mxu2 %v333_v49  ;;  %v329_v49 = vld [vmem:[%s8345_s2 + $0x18] sm:$0xff]  ;;  %v420_v54 = vld [vmem:[%s8345_s2 + $0x2f0] sm:$0xff] }
 0x3cb   :  { %1454 = vmatpush.msrb.mxu3 %v429_v51  ;;  %1474 = vmatpush.msrb.mxu0 %v334_v63  ;;  %v510_v63 = vld [vmem:[%s8345_s2 + $0x5c0] sm:$0xff] }
 0x3cc   :  { %1435 = vmatpush.msrb.mxu2 %v327_v55  ;;  %v516_v55 = vld [vmem:[%s8345_s2 + $0x5f0] sm:$0xff] }
 0x3cd   :  { %1455 = vmatpush.msrb.mxu3 %v423_v59  ;;  %1475 = vmatpush.msrb.mxu0 %v328_v46  ;;  %v421_v59 = vld [vmem:[%s8345_s2 + $0x2f8] sm:$0xff] }
 0x3ce   :  { %1500 = vmatpush.msra.mxu2 %v419_v60  ;;  %v517_v60 = vld [vmem:[%s8345_s2 + $0x5f8] sm:$0xff] }
 0x3cf   :  { %1520 = vmatpush.msra.mxu3 %v515_v61  ;;  %v414_v61 = vld [vmem:[%s8345_s2 + $0x2c0] sm:$0xff]  ;;  %v469_v46 = vld [vmem:[%s8345_s2 + $0x478] sm:$0xff] }
 0x3d0   :  { %1501 = vmatpush.msra.mxu2 %v413_v0  ;;  %v415_v0 = vld [vmem:[%s8345_s2 + $0x2c8] sm:$0xff] }
 0x3d1   :  { %1521 = vmatpush.msra.mxu3 %v509_v4  ;;  %v408_v4 = vld [vmem:[%s8345_s2 + $0x290] sm:$0xff] }
 0x3d2   :  { %1502 = vmatpush.msra.mxu2 %v407_v5  ;;  %v504_v5 = vld [vmem:[%s8345_s2 + $0x590] sm:$0xff] }
 0x3d3   :  { %1522 = vmatpush.msra.mxu3 %v503_v35  ;;  %v409_v35 = vld [vmem:[%s8345_s2 + $0x298] sm:$0xff] }
 0x3d4   :  { %1503 = vmatpush.msra.mxu2 %v401_v11  ;;  %v505_v11 = vld [vmem:[%s8345_s2 + $0x598] sm:$0xff] }
 0x3d5   :  { %1523 = vmatpush.msra.mxu3 %v497_v13  ;;  %v402_v13 = vld [vmem:[%s8345_s2 + $0x260] sm:$0xff] }
 0x3d6   :  { %1504 = vmatpush.msra.mxu2 %v395_v14  ;;  %v498_v14 = vld [vmem:[%s8345_s2 + $0x560] sm:$0xff] }
 0x3d7   :  { %1524 = vmatpush.msra.mxu3 %v491_v16  ;;  %v403_v16 = vld [vmem:[%s8345_s2 + $0x268] sm:$0xff] }
 0x3d8   :  { %1505 = vmatpush.msra.mxu2 %v389_v17  ;;  %v499_v17 = vld [vmem:[%s8345_s2 + $0x568] sm:$0xff] }
 0x3d9   :  { %1525 = vmatpush.msra.mxu3 %v485_v21  ;;  %v396_v21 = vld [vmem:[%s8345_s2 + $0x230] sm:$0xff] }
 0x3da   :  { %1506 = vmatpush.msra.mxu2 %v383_v24  ;;  %v492_v24 = vld [vmem:[%s8345_s2 + $0x530] sm:$0xff] }
 0x3db   :  { %1526 = vmatpush.msra.mxu3 %v479_v25  ;;  %v397_v25 = vld [vmem:[%s8345_s2 + $0x238] sm:$0xff] }
 0x3dc   :  { %1507 = vmatpush.msra.mxu2 %v377_v26  ;;  %v493_v26 = vld [vmem:[%s8345_s2 + $0x538] sm:$0xff] }
 0x3dd   :  { %1527 = vmatpush.msra.mxu3 %v473_v27  ;;  %v390_v27 = vld [vmem:[%s8345_s2 + $0x200] sm:$0xff] }
 0x3de   :  { %1508 = vmatpush.msra.mxu2 %v371_v28  ;;  %v486_v28 = vld [vmem:[%s8345_s2 + $0x500] sm:$0xff] }
 0x3df   :  { %1528 = vmatpush.msra.mxu3 %v467_v29  ;;  %v391_v29 = vld [vmem:[%s8345_s2 + $0x208] sm:$0xff] }
 0x3e0   :  { %1509 = vmatpush.msra.mxu2 %v365_v30  ;;  %v487_v30 = vld [vmem:[%s8345_s2 + $0x508] sm:$0xff] }
 0x3e1   :  { %1529 = vmatpush.msra.mxu3 %v461_v31  ;;  %v384_v31 = vld [vmem:[%s8345_s2 + $0x1d0] sm:$0xff] }
 0x3e2   :  { %1510 = vmatpush.msra.mxu2 %v359_v15  ;;  %v480_v15 = vld [vmem:[%s8345_s2 + $0x4d0] sm:$0xff] }
 0x3e3   :  { %1530 = vmatpush.msra.mxu3 %v455_v18  ;;  %v385_v18 = vld [vmem:[%s8345_s2 + $0x1d8] sm:$0xff] }
 0x3e4   :  { %1511 = vmatpush.msra.mxu2 %v353_v32  ;;  %v481_v32 = vld [vmem:[%s8345_s2 + $0x4d8] sm:$0xff] }
 0x3e5   :  { %1531 = vmatpush.msra.mxu3 %v449_v33  ;;  %v378_v33 = vld [vmem:[%s8345_s2 + $0x1a0] sm:$0xff] }
 0x3e6   :  { %1512 = vmatpush.msra.mxu2 %v347_v40  ;;  %v474_v40 = vld [vmem:[%s8345_s2 + $0x4a0] sm:$0xff] }
 0x3e7   :  { %1532 = vmatpush.msra.mxu3 %v443_v41  ;;  %v379_v41 = vld [vmem:[%s8345_s2 + $0x1a8] sm:$0xff] }
 0x3e8   :  { %1513 = vmatpush.msra.mxu2 %v341_v42  ;;  %v475_v42 = vld [vmem:[%s8345_s2 + $0x4a8] sm:$0xff] }
 0x3e9   :  { %1533 = vmatpush.msra.mxu3 %v437_v43  ;;  %v372_v43 = vld [vmem:[%s8345_s2 + $0x170] sm:$0xff] }
 0x3ea   :  { %1514 = vmatpush.msra.mxu2 %v335_v44  ;;  %v468_v44 = vld [vmem:[%s8345_s2 + $0x470] sm:$0xff] }
 0x3eb   :  { %1534 = vmatpush.msra.mxu3 %v431_v45  ;;  %v373_v45 = vld [vmem:[%s8345_s2 + $0x178] sm:$0xff] }
 0x3ec   :  { %1515 = vmatpush.msra.mxu2 %v329_v49  ;;  %v462_v49 = vld [vmem:[%s8345_s2 + $0x440] sm:$0xff] }
 0x3ed   :  { %1535 = vmatpush.msra.mxu3 %v425_v50  ;;  %v367_v50 = vld [vmem:[%s8345_s2 + $0x148] sm:$0xff] }
 0x430   :  { %v5284_v51 = vpop.f32.mrf.mxu2 }
 0x431   :  { %v5292_v58 = vpop.f32.mrf.mxu3  ;;  %1396 = vmatmul.f32.vlgmr.msra.gmra.mxu0 %v5284_v51  ;;  %1436 = vmatmul.f32.vlgmr.msrb.gmra.mxu2 %v5284_v51 }
 0x432   :  { %1416 = vmatmul.f32.vlgmr.msra.gmra.mxu1 %v5292_v58  ;;  %1456 = vmatmul.f32.vlgmr.msrb.gmra.mxu3 %v5292_v58 }
 0x433   :  { %1540 = vmatpush.msra.mxu0 %v420_v54  ;;  %1560 = vmatpush.msra.mxu1 %v516_v55  ;;  %v463_v54 = vld [vmem:[%s8345_s2 + $0x448] sm:$0xff]  ;;  %v360_v55 = vld [vmem:[%s8345_s2 + $0x110] sm:$0xff] }
 0x434   :  { %1580 = vmatpush.msrb.mxu2 %v421_v59  ;;  %1600 = vmatpush.msrb.mxu3 %v517_v60  ;;  %v456_v59 = vld [vmem:[%s8345_s2 + $0x410] sm:$0xff]  ;;  %v361_v60 = vld [vmem:[%s8345_s2 + $0x118] sm:$0xff] }
 0x435   :  { %1541 = vmatpush.msra.mxu0 %v414_v61  ;;  %1561 = vmatpush.msra.mxu1 %v510_v63  ;;  %v457_v61 = vld [vmem:[%s8345_s2 + $0x418] sm:$0xff]  ;;  %v354_v63 = vld [vmem:[%s8345_s2 + $0xe0] sm:$0xff] }
 0x436   :  { %1581 = vmatpush.msrb.mxu2 %v415_v0  ;;  %1601 = vmatpush.msrb.mxu3 %v511_v1  ;;  %v450_v0 = vld [vmem:[%s8345_s2 + $0x3e0] sm:$0xff]  ;;  %v355_v1 = vld [vmem:[%s8345_s2 + $0xe8] sm:$0xff] }
 0x437   :  { %1542 = vmatpush.msra.mxu0 %v408_v4  ;;  %1562 = vmatpush.msra.mxu1 %v504_v5  ;;  %v451_v4 = vld [vmem:[%s8345_s2 + $0x3e8] sm:$0xff]  ;;  %v348_v5 = vld [vmem:[%s8345_s2 + $0xb0] sm:$0xff] }
 0x438   :  { %1582 = vmatpush.msrb.mxu2 %v409_v35  ;;  %1602 = vmatpush.msrb.mxu3 %v505_v11  ;;  %v444_v35 = vld [vmem:[%s8345_s2 + $0x3b0] sm:$0xff]  ;;  %v349_v11 = vld [vmem:[%s8345_s2 + $0xb8] sm:$0xff] }
 0x439   :  { %1543 = vmatpush.msra.mxu0 %v402_v13  ;;  %1563 = vmatpush.msra.mxu1 %v498_v14  ;;  %v445_v13 = vld [vmem:[%s8345_s2 + $0x3b8] sm:$0xff]  ;;  %v342_v14 = vld [vmem:[%s8345_s2 + $0x80] sm:$0xff] }
 0x43a   :  { %1583 = vmatpush.msrb.mxu2 %v403_v16  ;;  %1603 = vmatpush.msrb.mxu3 %v499_v17  ;;  %v438_v16 = vld [vmem:[%s8345_s2 + $0x380] sm:$0xff]  ;;  %v343_v17 = vld [vmem:[%s8345_s2 + $0x88] sm:$0xff] }
 0x43b   :  { %1476 = vmatmul.f32.vlgmr.msrb.gmra.mxu0 %v5284_v51  ;;  %1496 = vmatmul.f32.vlgmr.msrb.gmra.mxu1 %v5292_v58 }
 0x43c   :  { %1516 = vmatmul.f32.vlgmr.msra.gmra.mxu2 %v5284_v51  ;;  %1536 = vmatmul.f32.vlgmr.msra.gmra.mxu3 %v5292_v58 }
 0x43d   :  { %1544 = vmatpush.msra.mxu0 %v396_v21  ;;  %1564 = vmatpush.msra.mxu1 %v492_v24  ;;  %v439_v21 = vld [vmem:[%s8345_s2 + $0x388] sm:$0xff]  ;;  %v336_v24 = vld [vmem:[%s8345_s2 + $0x50] sm:$0xff] }
 0x43e   :  { %1584 = vmatpush.msrb.mxu2 %v397_v25  ;;  %1604 = vmatpush.msrb.mxu3 %v493_v26  ;;  %v432_v25 = vld [vmem:[%s8345_s2 + $0x350] sm:$0xff]  ;;  %v337_v26 = vld [vmem:[%s8345_s2 + $0x58] sm:$0xff] }
 0x43f   :  { %1545 = vmatpush.msra.mxu0 %v390_v27  ;;  %1565 = vmatpush.msra.mxu1 %v486_v28  ;;  %v433_v27 = vld [vmem:[%s8345_s2 + $0x358] sm:$0xff]  ;;  %v330_v28 = vld [vmem:[%s8345_s2 + $0x20] sm:$0xff] }
 0x440   :  { %1585 = vmatpush.msrb.mxu2 %v391_v29  ;;  %1605 = vmatpush.msrb.mxu3 %v487_v30  ;;  %v426_v29 = vld [vmem:[%s8345_s2 + $0x320] sm:$0xff]  ;;  %v331_v30 = vld [vmem:[%s8345_s2 + $0x28] sm:$0xff] }
 0x441   :  { %1546 = vmatpush.msra.mxu0 %v384_v31  ;;  %1566 = vmatpush.msra.mxu1 %v480_v15  ;;  %v427_v31 = vld [vmem:[%s8345_s2 + $0x328] sm:$0xff]  ;;  %v548_v15 = vld [vmem:[%s8347_s3 + $0xf0] sm:$0xff] }
 0x442   :  { %1586 = vmatpush.msrb.mxu2 %v385_v18  ;;  %1606 = vmatpush.msrb.mxu3 %v481_v32  ;;  %v549_v18 = vld [vmem:[%s8347_s3 + $0xf8] sm:$0xff]  ;;  %v546_v32 = vld [vmem:[%s8347_s3 + $0xe0] sm:$0xff] }
 0x443   :  { %1547 = vmatpush.msra.mxu0 %v378_v33  ;;  %1567 = vmatpush.msra.mxu1 %v474_v40  ;;  %v547_v33 = vld [vmem:[%s8347_s3 + $0xe8] sm:$0xff]  ;;  %v544_v40 = vld [vmem:[%s8347_s3 + $0xd0] sm:$0xff] }
 0x444   :  { %1587 = vmatpush.msrb.mxu2 %v379_v41  ;;  %1607 = vmatpush.msrb.mxu3 %v475_v42  ;;  %v580_v41 = vld [vmem:[%s8347_s3 + $0x1f0] sm:$0xff]  ;;  %v543_v42 = vld [vmem:[%s8347_s3 + $0xc8] sm:$0xff] }
 0x445   :  { %1548 = vmatpush.msra.mxu0 %v372_v43  ;;  %1568 = vmatpush.msra.mxu1 %v468_v44  ;;  %v581_v43 = vld [vmem:[%s8347_s3 + $0x1f8] sm:$0xff]  ;;  %v540_v44 = vld [vmem:[%s8347_s3 + $0xb0] sm:$0xff] }
 0x446   :  { %1588 = vmatpush.msrb.mxu2 %v373_v45  ;;  %1608 = vmatpush.msrb.mxu3 %v469_v46  ;;  %v578_v45 = vld [vmem:[%s8347_s3 + $0x1e0] sm:$0xff]  ;;  %v541_v46 = vld [vmem:[%s8347_s3 + $0xb8] sm:$0xff] }
 0x447   :  { %1549 = vmatpush.msra.mxu0 %v366_v47  ;;  %1569 = vmatpush.msra.mxu1 %v462_v49  ;;  %v579_v47 = vld [vmem:[%s8347_s3 + $0x1e8] sm:$0xff]  ;;  %v538_v49 = vld [vmem:[%s8347_s3 + $0xa0] sm:$0xff] }
 0x448   :  { %1589 = vmatpush.msrb.mxu2 %v367_v50  ;;  %1609 = vmatpush.msrb.mxu3 %v463_v54  ;;  %v576_v50 = vld [vmem:[%s8347_s3 + $0x1d0] sm:$0xff]  ;;  %v539_v54 = vld [vmem:[%s8347_s3 + $0xa8] sm:$0xff] }
 0x449   :  { %1550 = vmatpush.msra.mxu0 %v360_v55  ;;  %1570 = vmatpush.msra.mxu1 %v456_v59  ;;  %v577_v55 = vld [vmem:[%s8347_s3 + $0x1d8] sm:$0xff]  ;;  %v536_v59 = vld [vmem:[%s8347_s3 + $0x90] sm:$0xff] }
 0x44a   :  { %1590 = vmatpush.msrb.mxu2 %v361_v60  ;;  %1610 = vmatpush.msrb.mxu3 %v457_v61  ;;  %v574_v60 = vld [vmem:[%s8347_s3 + $0x1c0] sm:$0xff]  ;;  %v537_v61 = vld [vmem:[%s8347_s3 + $0x98] sm:$0xff] }
 0x44b   :  { %1551 = vmatpush.msra.mxu0 %v354_v63  ;;  %1571 = vmatpush.msra.mxu1 %v450_v0  ;;  %v575_v63 = vld [vmem:[%s8347_s3 + $0x1c8] sm:$0xff]  ;;  %v534_v0 = vld [vmem:[%s8347_s3 + $0x80] sm:$0xff] }
 0x44c   :  { %1591 = vmatpush.msrb.mxu2 %v355_v1  ;;  %1611 = vmatpush.msrb.mxu3 %v451_v4  ;;  %v572_v1 = vld [vmem:[%s8347_s3 + $0x1b0] sm:$0xff]  ;;  %v535_v4 = vld [vmem:[%s8347_s3 + $0x88] sm:$0xff] }
 0x44d   :  { %1552 = vmatpush.msra.mxu0 %v348_v5  ;;  %1572 = vmatpush.msra.mxu1 %v444_v35  ;;  %v573_v5 = vld [vmem:[%s8347_s3 + $0x1b8] sm:$0xff]  ;;  %v532_v35 = vld [vmem:[%s8347_s3 + $0x70] sm:$0xff] }
 0x44e   :  { %1592 = vmatpush.msrb.mxu2 %v349_v11  ;;  %1612 = vmatpush.msrb.mxu3 %v445_v13  ;;  %v570_v11 = vld [vmem:[%s8347_s3 + $0x1a0] sm:$0xff]  ;;  %v533_v13 = vld [vmem:[%s8347_s3 + $0x78] sm:$0xff] }
 0x44f   :  { %1553 = vmatpush.msra.mxu0 %v342_v14  ;;  %1573 = vmatpush.msra.mxu1 %v438_v16  ;;  %v571_v14 = vld [vmem:[%s8347_s3 + $0x1a8] sm:$0xff]  ;;  %v530_v16 = vld [vmem:[%s8347_s3 + $0x60] sm:$0xff] }
 0x450   :  { %1593 = vmatpush.msrb.mxu2 %v343_v17  ;;  %1613 = vmatpush.msrb.mxu3 %v439_v21  ;;  %v568_v17 = vld [vmem:[%s8347_s3 + $0x190] sm:$0xff]  ;;  %v531_v21 = vld [vmem:[%s8347_s3 + $0x68] sm:$0xff] }
 0x451   :  { %1554 = vmatpush.msra.mxu0 %v336_v24  ;;  %1574 = vmatpush.msra.mxu1 %v432_v25  ;;  %v569_v24 = vld [vmem:[%s8347_s3 + $0x198] sm:$0xff]  ;;  %v528_v25 = vld [vmem:[%s8347_s3 + $0x50] sm:$0xff] }
 0x452   :  { %1594 = vmatpush.msrb.mxu2 %v337_v26  ;;  %1614 = vmatpush.msrb.mxu3 %v433_v27  ;;  %v566_v26 = vld [vmem:[%s8347_s3 + $0x180] sm:$0xff]  ;;  %v529_v27 = vld [vmem:[%s8347_s3 + $0x58] sm:$0xff] }
 0x453   :  { %1555 = vmatpush.msra.mxu0 %v330_v28  ;;  %1575 = vmatpush.msra.mxu1 %v426_v29  ;;  %v567_v28 = vld [vmem:[%s8347_s3 + $0x188] sm:$0xff]  ;;  %v526_v29 = vld [vmem:[%s8347_s3 + $0x40] sm:$0xff] }
 0x454   :  { %1595 = vmatpush.msrb.mxu2 %v331_v30  ;;  %1615 = vmatpush.msrb.mxu3 %v427_v31  ;;  %v564_v30 = vld [vmem:[%s8347_s3 + $0x170] sm:$0xff]  ;;  %v527_v31 = vld [vmem:[%s8347_s3 + $0x48] sm:$0xff] }
 0x455   :  { %1556 = vmatmul.f32.vlgmr.msra.gmra.mxu0 %v5284_v51  ;;  %1576 = vmatmul.f32.vlgmr.msra.gmra.mxu1 %v5292_v58 }
 0x456   :  { %1596 = vmatmul.f32.vlgmr.msrb.gmra.mxu2 %v5284_v51  ;;  %1616 = vmatmul.f32.vlgmr.msrb.gmra.mxu3 %v5292_v58  ;;  %v545_v51 = vld [vmem:[%s8347_s3 + $0xd8] sm:$0xff]  ;;  %v542_v58 = vld [vmem:[%s8347_s3 + $0xc0] sm:$0xff] }
 0x457   :  { %1650 = vmatpush.msrb.mxu0 %v548_v15  ;;  %1690 = vmatpush.msra.mxu2 %v549_v18  ;;  %v565_v15 = vld [vmem:[%s8347_s3 + $0x178] sm:$0xff]  ;;  %v524_v18 = vld [vmem:[%s8347_s3 + $0x30] sm:$0xff] }
 0x458   :  { %1670 = vmatpush.msrb.mxu1 %v580_v41  ;;  %1710 = vmatpush.msra.mxu3 %v581_v43  ;;  %v523_v41 = vld [vmem:[%s8347_s3 + $0x28] sm:$0xff] }
 0x459   :  { %1651 = vmatpush.msrb.mxu0 %v546_v32  ;;  %1691 = vmatpush.msra.mxu2 %v547_v33  ;;  %v562_v32 = vld [vmem:[%s8347_s3 + $0x160] sm:$0xff]  ;;  %v525_v33 = vld [vmem:[%s8347_s3 + $0x38] sm:$0xff] }
 0x45a   :  { %1671 = vmatpush.msrb.mxu1 %v578_v45  ;;  %1711 = vmatpush.msra.mxu3 %v579_v47  ;;  %v558_v45 = vld [vmem:[%s8347_s3 + $0x140] sm:$0xff] }
 0x45b   :  { %1652 = vmatpush.msrb.mxu0 %v544_v40  ;;  %1692 = vmatpush.msra.mxu2 %v545_v51  ;;  %v563_v40 = vld [vmem:[%s8347_s3 + $0x168] sm:$0xff]  ;;  %v522_v51 = vld [vmem:[%s8347_s3 + $0x20] sm:$0xff] }
 0x45c   :  { %1672 = vmatpush.msrb.mxu1 %v576_v50  ;;  %1712 = vmatpush.msra.mxu3 %v577_v55  ;;  %v556_v55 = vld [vmem:[%s8347_s3 + $0x130] sm:$0xff] }
 0x45d   :  { %1653 = vmatpush.msrb.mxu0 %v542_v58  ;;  %1693 = vmatpush.msra.mxu2 %v543_v42  ;;  %v560_v58 = vld [vmem:[%s8347_s3 + $0x150] sm:$0xff]  ;;  %v561_v42 = vld [vmem:[%s8347_s3 + $0x158] sm:$0xff] }
 0x45e   :  { %1673 = vmatpush.msrb.mxu1 %v574_v60  ;;  %1713 = vmatpush.msra.mxu3 %v575_v63  ;;  %v557_v60 = vld [vmem:[%s8347_s3 + $0x138] sm:$0xff]  ;;  %v554_v63 = vld [vmem:[%s8347_s3 + $0x120] sm:$0xff] }
 0x45f   :  { %1654 = vmatpush.msrb.mxu0 %v540_v44  ;;  %1694 = vmatpush.msra.mxu2 %v541_v46  ;;  %v520_v44 = vld [vmem:[%s8347_s3 + $0x10] sm:$0xff]  ;;  %v521_v46 = vld [vmem:[%s8347_s3 + $0x18] sm:$0xff] }
 0x460   :  { %1674 = vmatpush.msrb.mxu1 %v572_v1  ;;  %1714 = vmatpush.msra.mxu3 %v573_v5  ;;  %v552_v1 = vld [vmem:[%s8347_s3 + $0x110] sm:$0xff]  ;;  %v550_v5 = vld [vmem:[%s8347_s3 + $0x100] sm:$0xff] }
 0x461   :  { %1655 = vmatpush.msrb.mxu0 %v538_v49  ;;  %1695 = vmatpush.msra.mxu2 %v539_v54  ;;  %v559_v49 = vld [vmem:[%s8347_s3 + $0x148] sm:$0xff]  ;;  %v518_v54 = vld [vmem:[%s8347_s3] sm:$0xff] }
 0x462   :  { %1675 = vmatpush.msrb.mxu1 %v570_v11  ;;  %1715 = vmatpush.msra.mxu3 %v571_v14  ;;  %v551_v11 = vld [vmem:[%s8347_s3 + $0x108] sm:$0xff]  ;;  %v5692_v14 = vld [vmem:[%s8340_s8 + $0x10] sm:$0xff] }
 0x463   :  { %1656 = vmatpush.msrb.mxu0 %v536_v59  ;;  %1696 = vmatpush.msra.mxu2 %v537_v61  ;;  %v519_v59 = vld [vmem:[%s8347_s3 + $0x8] sm:$0xff] }
 0x464   :  { %1676 = vmatpush.msrb.mxu1 %v568_v17  ;;  %1716 = vmatpush.msra.mxu3 %v569_v24  ;;  %v1626_v24 = vperm.slane %v5692_v14, 2 }
 0x465   :  { %1657 = vmatpush.msrb.mxu0 %v534_v0  ;;  %1697 = vmatpush.msra.mxu2 %v535_v4  ;;  %v555_v0 = vld [vmem:[%s8347_s3 + $0x128] sm:$0xff] }
 0x466   :  { %1677 = vmatpush.msrb.mxu1 %v566_v26  ;;  %1717 = vmatpush.msra.mxu3 %v567_v28  ;;  %v677_v26 = vld [vmem:[%s8348_s4 + $0x2f8] sm:$0xff] }
 0x467   :  { %1658 = vmatpush.msrb.mxu0 %v532_v35  ;;  %1698 = vmatpush.msra.mxu2 %v533_v13 }
 0x468   :  { %1678 = vmatpush.msrb.mxu1 %v564_v30  ;;  %1718 = vmatpush.msra.mxu3 %v565_v15  ;;  %v672_v30 = vld [vmem:[%s8348_s4 + $0x2d0] sm:$0xff] }
 0x469   :  { %1659 = vmatpush.msrb.mxu0 %v530_v16  ;;  %1699 = vmatpush.msra.mxu2 %v531_v21  ;;  %v708_v15 = vld [vmem:[%s8348_s4 + $0x3f0] sm:$0xff] }
 0x46a   :  { %1679 = vmatpush.msrb.mxu1 %v562_v32  ;;  %1719 = vmatpush.msra.mxu3 %v563_v40  ;;  %v709_v32 = vld [vmem:[%s8348_s4 + $0x3f8] sm:$0xff]  ;;  %v670_v40 = vld [vmem:[%s8348_s4 + $0x2c0] sm:$0xff] }
 0x46b   :  { %1660 = vmatpush.msrb.mxu0 %v528_v25  ;;  %1700 = vmatpush.msra.mxu2 %v529_v27  ;;  %v676_v25 = vld [vmem:[%s8348_s4 + $0x2f0] sm:$0xff]  ;;  %v674_v27 = vld [vmem:[%s8348_s4 + $0x2e0] sm:$0xff] }
 0x46c   :  { %1680 = vmatpush.msrb.mxu1 %v560_v58  ;;  %1720 = vmatpush.msra.mxu3 %v561_v42  ;;  %v707_v58 = vld [vmem:[%s8348_s4 + $0x3e8] sm:$0xff] }
 0x46d   :  { %1661 = vmatpush.msrb.mxu0 %v526_v29  ;;  %1701 = vmatpush.msra.mxu2 %v527_v31  ;;  %v675_v29 = vld [vmem:[%s8348_s4 + $0x2e8] sm:$0xff]  ;;  %v673_v31 = vld [vmem:[%s8348_s4 + $0x2d8] sm:$0xff] }
 0x46e   :  { %1681 = vmatpush.msrb.mxu1 %v558_v45  ;;  %1721 = vmatpush.msra.mxu3 %v559_v49  ;;  %v705_v45 = vld [vmem:[%s8348_s4 + $0x3d8] sm:$0xff] }
 0x46f   :  { %1662 = vmatpush.msrb.mxu0 %v524_v18  ;;  %1702 = vmatpush.msra.mxu2 %v525_v33  ;;  %v5722_v18 = vld [vmem:[%s8340_s8 + $0x18] sm:$0xff]  ;;  %v706_v33 = vld [vmem:[%s8348_s4 + $0x3e0] sm:$0xff] }
 0x470   :  { %1682 = vmatpush.msrb.mxu1 %v556_v55  ;;  %1722 = vmatpush.msra.mxu3 %v557_v60  ;;  %v1627_v49 = vperm.slane %v5722_v18, 2  ;;  %v667_v60 = vld [vmem:[%s8348_s4 + $0x2a8] sm:$0xff]  ;;  %v3762_v18 = vld [vmem:[%s8348_s4 + $0xf8] sm:$0xff] }
 0x471   :  { %1663 = vmatpush.msrb.mxu0 %v522_v51  ;;  %1703 = vmatpush.msra.mxu2 %v523_v41  ;;  %v671_v51 = vld [vmem:[%s8348_s4 + $0x2c8] sm:$0xff] }
 0x472   :  { %1683 = vmatpush.msrb.mxu1 %v554_v63  ;;  %1723 = vmatpush.msra.mxu3 %v555_v0  ;;  %v700_v63 = vld [vmem:[%s8348_s4 + $0x3b0] sm:$0xff]  ;;  %v701_v0 = vld [vmem:[%s8348_s4 + $0x3b8] sm:$0xff] }
 0x473   :  { %1664 = vmatpush.msrb.mxu0 %v520_v44  ;;  %1704 = vmatpush.msra.mxu2 %v521_v46  ;;  %v704_v44 = vld [vmem:[%s8348_s4 + $0x3d0] sm:$0xff]  ;;  %v1042_v46 = vadd.f32 %v4845_v22, %v4847_v23  ;;  %v702_v22 = vld [vmem:[%s8348_s4 + $0x3c0] sm:$0xff]  ;;  %v703_v23 = vld [vmem:[%s8348_s4 + $0x3c8] sm:$0xff] }
 0x474   :  { %1684 = vmatpush.msrb.mxu1 %v552_v1 }
 0x475   :  { %1665 = vmatpush.msrb.mxu0 %v518_v54  ;;  %1705 = vmatpush.msra.mxu2 %v519_v59  ;;  %v669_v54 = vld [vmem:[%s8348_s4 + $0x2b8] sm:$0xff]  ;;  %v666_v59 = vld [vmem:[%s8348_s4 + $0x2a0] sm:$0xff] }
 0x476   :  { %1685 = vmatpush.msrb.mxu1 %v550_v5  ;;  %v698_v5 = vld [vmem:[%s8348_s4 + $0x3a0] sm:$0xff] }
 0x477   :  { %1744 = vmatpush.msra.mxu0 %v676_v25  ;;  %1784 = vmatpush.msrb.mxu2 %v677_v26  ;;  %v696_v25 = vld [vmem:[%s8348_s4 + $0x390] sm:$0xff]  ;;  %v697_v26 = vld [vmem:[%s8348_s4 + $0x398] sm:$0xff] }
 0x478   :  { %1764 = vmatpush.msra.mxu1 %v708_v15 }
 0x479   :  { %1745 = vmatpush.msra.mxu0 %v674_v27  ;;  %1785 = vmatpush.msrb.mxu2 %v675_v29  ;;  %v661_v29 = vld [vmem:[%s8348_s4 + $0x278] sm:$0xff] }
 0x47a   :  { %1765 = vmatpush.msra.mxu1 %v706_v33  ;;  %v5819_v33 = vld [vmem:[%s8339_s0] sm:$0xff] }
 0x47b   :  { %1746 = vmatpush.msra.mxu0 %v672_v30  ;;  %1786 = vmatpush.msrb.mxu2 %v673_v31  ;;  %v694_v30 = vld [vmem:[%s8348_s4 + $0x380] sm:$0xff]  ;;  %v695_v31 = vld [vmem:[%s8348_s4 + $0x388] sm:$0xff] }
 0x47c   :  { %1766 = vmatpush.msra.mxu1 %v704_v44  ;;  %v654_v44 = vld [vmem:[%s8348_s4 + $0x240] sm:$0xff] }
 0x47d   :  { %1747 = vmatpush.msra.mxu0 %v670_v40  ;;  %1787 = vmatpush.msrb.mxu2 %v671_v51  ;;  %v656_v51 = vld [vmem:[%s8348_s4 + $0x250] sm:$0xff] }
 0x47e   :  { %1767 = vmatpush.msra.mxu1 %v702_v22  ;;  %v653_v22 = vld [vmem:[%s8348_s4 + $0x238] sm:$0xff] }
 0x47f   :  { %1788 = vmatpush.msrb.mxu2 %v669_v54  ;;  %v652_v54 = vld [vmem:[%s8348_s4 + $0x230] sm:$0xff] }
 0x480   :  { %1768 = vmatpush.msra.mxu1 %v700_v63 }
 0x481   :  { %1789 = vmatpush.msrb.mxu2 %v667_v60  ;;  %v5861_v60 = vld [vmem:[%s8339_s0 + $0x8] sm:$0xff] }
 0x482   :  { %1769 = vmatpush.msra.mxu1 %v698_v5  ;;  %v648_v5 = vld [vmem:[%s8348_s4 + $0x210] sm:$0xff] }
 0x484   :  { %1770 = vmatpush.msra.mxu1 %v696_v25  ;;  %v612_v25 = vld [vmem:[%s8348_s4 + $0xf0] sm:$0xff] }
 0x486   :  { %1771 = vmatpush.msra.mxu1 %v694_v30  ;;  %v611_v30 = vld [vmem:[%s8348_s4 + $0xe8] sm:$0xff] }
 0x4ae   :  { %v1397_v43 = vpop.f32.mrf.mxu0 }
 0x4af   :  { %v1417_v47 = vpop.f32.mrf.mxu1 }
 0x4b0   :  { %v1418_v50 = vadd.f32 %v1417_v47, %v1397_v43 }
 0x4b2   :  { %v5667_v61 = vadd.f32 %v1418_v50, %v4561_v39  ;;  %v553_v39 = vld [vmem:[%s8347_s3 + $0x118] sm:$0xff]  ;;  %v668_v50 = vld [vmem:[%s8348_s4 + $0x2b0] sm:$0xff] }
 0x4b3   :  { %1724 = vmatpush.msra.mxu3 %v553_v39  ;;  %1748 = vmatpush.msra.mxu0 %v668_v50  ;;  %v664_v39 = vld [vmem:[%s8348_s4 + $0x290] sm:$0xff]  ;;  %v691_v50 = vld [vmem:[%s8348_s4 + $0x368] sm:$0xff] }
 0x4b4   :  { %v1437_v4 = vpop.f32.mrf.mxu2 }
 0x4b5   :  { %v1457_v35 = vpop.f32.mrf.mxu3  ;;  %1725 = vmatpush.msra.mxu3 %v551_v11  ;;  %1749 = vmatpush.msra.mxu0 %v666_v59  ;;  %v689_v59 = vld [vmem:[%s8348_s4 + $0x358] sm:$0xff] }
 0x4b6   :  { %v5687_v13 = vadd.f32 %v1457_v35, %v1437_v4  ;;  %v665_v4 = vld [vmem:[%s8348_s4 + $0x298] sm:$0xff]  ;;  %v699_v35 = vld [vmem:[%s8348_s4 + $0x3a8] sm:$0xff] }
 0x4b7   :  { %1804 = vmatpush.msrb.mxu3 %v709_v32  ;;  %1750 = vmatpush.msra.mxu0 %v664_v39  ;;  %v659_v32 = vld [vmem:[%s8348_s4 + $0x268] sm:$0xff]  ;;  %v686_v39 = vld [vmem:[%s8348_s4 + $0x340] sm:$0xff] }
 0x4b8   :  { %v1477_v16 = vpop.f32.mrf.mxu0  ;;  %v1497_v17 = vpop.f32.mrf.mxu1  ;;  %1790 = vmatpush.msrb.mxu2 %v665_v4  ;;  %v687_v4 = vld [vmem:[%s8348_s4 + $0x348] sm:$0xff] }
 0x4b9   :  { %v1498_v21 = vadd.f32 %v1497_v17, %v1477_v16  ;;  %1805 = vmatpush.msrb.mxu3 %v707_v58  ;;  %v662_v16 = vld [vmem:[%s8348_s4 + $0x280] sm:$0xff]  ;;  %v663_v17 = vld [vmem:[%s8348_s4 + $0x288] sm:$0xff]  ;;  %v657_v58 = vld [vmem:[%s8348_s4 + $0x258] sm:$0xff] }
 0x4ba   :  { %1751 = vmatpush.msra.mxu0 %v662_v16  ;;  %1791 = vmatpush.msrb.mxu2 %v663_v17  ;;  %v685_v16 = vld [vmem:[%s8348_s4 + $0x338] sm:$0xff]  ;;  %v646_v17 = vld [vmem:[%s8348_s4 + $0x200] sm:$0xff] }
 0x4bb   :  { %v1622_v28 = vadd.f32 %v1498_v21, %v4624_v62  ;;  %1806 = vmatpush.msrb.mxu3 %v705_v45  ;;  %v655_v45 = vld [vmem:[%s8348_s4 + $0x248] sm:$0xff] }
 0x4bc   :  { %1792 = vmatpush.msrb.mxu2 %v661_v29  ;;  %v610_v29 = vld [vmem:[%s8348_s4 + $0xe0] sm:$0xff] }
 0x4bd   :  { %v1630_v62 = vadd.f32 %v1626_v24, %v1622_v28  ;;  %1807 = vmatpush.msrb.mxu3 %v703_v23  ;;  %v660_v28 = vld [vmem:[%s8348_s4 + $0x270] sm:$0xff] }
 0x4be   :  { %1752 = vmatpush.msra.mxu0 %v660_v28  ;;  %1793 = vmatpush.msrb.mxu2 %v659_v32  ;;  %v683_v28 = vld [vmem:[%s8348_s4 + $0x328] sm:$0xff]  ;;  %v609_v32 = vld [vmem:[%s8348_s4 + $0xd8] sm:$0xff] }
 0x4bf   :  { %v1634_v41 = vmul.f32 0.5, %v1630_v62  ;;  %v1517_v42 = vpop.f32.mrf.mxu2  ;;  %v1537_v43 = vpop.f32.mrf.mxu3  ;;  %1808 = vmatpush.msrb.mxu3 %v701_v0  ;;  %v658_v62 = vld [vmem:[%s8348_s4 + $0x260] sm:$0xff] }
 0x4c0   :  { %v1538_v47 = vadd.f32 %v1537_v43, %v1517_v42  ;;  %1753 = vmatpush.msra.mxu0 %v658_v62  ;;  %v693_v42 = vld [vmem:[%s8348_s4 + $0x378] sm:$0xff]  ;;  %1794 = vmatpush.msrb.mxu2 %v657_v58  ;;  %v650_v0 = vld [vmem:[%s8348_s4 + $0x220] sm:$0xff]  ;;  %v608_v62 = vld [vmem:[%s8348_s4 + $0xd0] sm:$0xff] }
 0x4c1   :  { %3100 = vtanh.f32 %v1634_v41  ;;  %1809 = vmatpush.msrb.mxu3 %v699_v35  ;;  %v692_v41 = vld [vmem:[%s8348_s4 + $0x370] sm:$0xff]  ;;  %v649_v35 = vld [vmem:[%s8348_s4 + $0x218] sm:$0xff]  ;;  %v606_v58 = vld [vmem:[%s8348_s4 + $0xc0] sm:$0xff] }
 0x4c2   :  { %v1623_v55 = vadd.f32 %v1538_v47, %v1042_v46  ;;  %1754 = vmatpush.msra.mxu0 %v656_v51  ;;  %v690_v47 = vld [vmem:[%s8348_s4 + $0x360] sm:$0xff]  ;;  %1772 = vmatpush.msra.mxu1 %v692_v41  ;;  %v679_v51 = vld [vmem:[%s8348_s4 + $0x308] sm:$0xff]  ;;  %v644_v41 = vld [vmem:[%s8348_s4 + $0x1f0] sm:$0xff] }
 0x4c3   :  { %1810 = vmatpush.msrb.mxu3 %v697_v26  ;;  %1795 = vmatpush.msrb.mxu2 %v655_v45  ;;  %v613_v26 = vld [vmem:[%s8348_s4 + $0xf8] sm:$0xff]  ;;  %v642_v45 = vld [vmem:[%s8348_s4 + $0x1e0] sm:$0xff] }
 0x4c4   :  { %v1631_v1 = vadd.f32 %v1627_v49, %v1623_v55  ;;  %1755 = vmatpush.msra.mxu0 %v654_v44  ;;  %v688_v55 = vld [vmem:[%s8348_s4 + $0x350] sm:$0xff]  ;;  %1773 = vmatpush.msra.mxu1 %v690_v47  ;;  %v643_v47 = vld [vmem:[%s8348_s4 + $0x1e8] sm:$0xff] }
 0x4c5   :  { %1811 = vmatpush.msrb.mxu3 %v695_v31  ;;  %1796 = vmatpush.msrb.mxu2 %v653_v22  ;;  %v680_v31 = vld [vmem:[%s8348_s4 + $0x310] sm:$0xff]  ;;  %v603_v22 = vld [vmem:[%s8348_s4 + $0xa8] sm:$0xff] }
 0x4c6   :  { %v1635_v11 = vmul.f32 0.5, %v1631_v1  ;;  %1756 = vmatpush.msra.mxu0 %v652_v54  ;;  %v651_v1 = vld [vmem:[%s8348_s4 + $0x228] sm:$0xff]  ;;  %1774 = vmatpush.msra.mxu1 %v688_v55  ;;  %v604_v44 = vld [vmem:[%s8348_s4 + $0xb0] sm:$0xff] }
 0x4c7   :  { %v3101_v21 = vpop.eup %3100  ;;  %1812 = vmatpush.msrb.mxu3 %v693_v42  ;;  %1797 = vmatpush.msrb.mxu2 %v651_v1  ;;  %v607_v42 = vld [vmem:[%s8348_s4 + $0xc8] sm:$0xff]  ;;  %v640_v54 = vld [vmem:[%s8348_s4 + $0x1d0] sm:$0xff]  ;;  %v598_v1 = vld [vmem:[%s8348_s4 + $0x80] sm:$0xff] }
 0x4c8   :  { %v1642_v27 = vadd.f32 1.0, %v3101_v21  ;;  %3102 = vtanh.f32 %v1635_v11  ;;  %1757 = vmatpush.msra.mxu0 %v650_v0  ;;  %v684_v11 = vld [vmem:[%s8348_s4 + $0x330] sm:$0xff]  ;;  %1775 = vmatpush.msra.mxu1 %v686_v39  ;;  %v647_v21 = vld [vmem:[%s8348_s4 + $0x208] sm:$0xff] }
 0x4c9   :  { %1813 = vmatpush.msrb.mxu3 %v691_v50  ;;  %1798 = vmatpush.msrb.mxu2 %v649_v35  ;;  %v602_v50 = vld [vmem:[%s8348_s4 + $0xa0] sm:$0xff]  ;;  %v600_v55 = vld [vmem:[%s8348_s4 + $0x90] sm:$0xff]  ;;  %v639_v0 = vld [vmem:[%s8348_s4 + $0x1c8] sm:$0xff] }
 0x4ca   :  { %v1646_v15 = vmul.f32 0.5, %v1642_v27  ;;  %1758 = vmatpush.msra.mxu0 %v648_v5  ;;  %1776 = vmatpush.msra.mxu1 %v684_v11  ;;  %v682_v27 = vld [vmem:[%s8348_s4 + $0x320] sm:$0xff]  ;;  %v636_v39 = vld [vmem:[%s8348_s4 + $0x1b0] sm:$0xff]  ;;  %v637_v5 = vld [vmem:[%s8348_s4 + $0x1b8] sm:$0xff] }
 0x4cb   :  { %1814 = vmatpush.msrb.mxu3 %v689_v59  ;;  %1799 = vmatpush.msrb.mxu2 %v647_v21  ;;  %v638_v59 = vld [vmem:[%s8348_s4 + $0x1c0] sm:$0xff]  ;;  %v597_v21 = vld [vmem:[%s8348_s4 + $0x78] sm:$0xff] }
 0x4cc   :  { %v1648_v40 = vmul.f32 %v5819_v33, %v1646_v15  ;;  %1759 = vmatpush.msra.mxu0 %v646_v17  ;;  %1777 = vmatpush.msra.mxu1 %v682_v27  ;;  %v681_v15 = vld [vmem:[%s8348_s4 + $0x318] sm:$0xff]  ;;  %v5993_v35 = vld [vmem:[%s8340_s8] sm:$0xff]  ;;  %v632_v27 = vld [vmem:[%s8348_s4 + $0x190] sm:$0xff] }
 0x4cd   :  { %1815 = vmatpush.msrb.mxu3 %v687_v4  ;;  %v599_v4 = vld [vmem:[%s8348_s4 + $0x88] sm:$0xff]  ;;  %v1624_v11 = vperm.slane %v5993_v35, 2  ;;  %v634_v17 = vld [vmem:[%s8348_s4 + $0x1a0] sm:$0xff] }
 0x4ce   :  { %v3103_v43 = vpop.eup %3102  ;;  %1666 = vmatmul.f32.vlgmr.msrb.gmra.mxu0 %v1648_v40  ;;  %1706 = vmatmul.f32.vlgmr.msra.gmra.mxu2 %v1648_v40  ;;  %v678_v40 = vld [vmem:[%s8348_s4 + $0x300] sm:$0xff] }
 0x4cf   :  { %v1643_v46 = vadd.f32 1.0, %v3103_v43  ;;  %1816 = vmatpush.msrb.mxu3 %v685_v16  ;;  %1824 = vmatpush.msrb.mxu0 %v612_v25  ;;  %v645_v43 = vld [vmem:[%s8348_s4 + $0x1f8] sm:$0xff]  ;;  %v596_v16 = vld [vmem:[%s8348_s4 + $0x70] sm:$0xff]  ;;  %v635_v25 = vld [vmem:[%s8348_s4 + $0x1a8] sm:$0xff] }
 0x4d0   :  { %1864 = vmatpush.msra.mxu2 %v613_v26  ;;  %1778 = vmatpush.msra.mxu1 %v680_v31  ;;  %v594_v26 = vld [vmem:[%s8348_s4 + $0x60] sm:$0xff] }
 0x4d1   :  { %v1647_v23 = vmul.f32 0.5, %v1643_v46  ;;  %1817 = vmatpush.msrb.mxu3 %v683_v28  ;;  %1825 = vmatpush.msrb.mxu0 %v610_v29  ;;  %v605_v46 = vld [vmem:[%s8348_s4 + $0xb8] sm:$0xff]  ;;  %v595_v28 = vld [vmem:[%s8348_s4 + $0x68] sm:$0xff]  ;;  %v630_v31 = vld [vmem:[%s8348_s4 + $0x180] sm:$0xff] }
 0x4d2   :  { %1865 = vmatpush.msra.mxu2 %v611_v30  ;;  %1779 = vmatpush.msra.mxu1 %v678_v40  ;;  %v633_v29 = vld [vmem:[%s8348_s4 + $0x198] sm:$0xff]  ;;  %v592_v30 = vld [vmem:[%s8348_s4 + $0x50] sm:$0xff]  ;;  %v1628_v40 = vadd.f32 %v1624_v11, %v5667_v61 }
 0x4d3   :  { %v1649_v63 = vmul.f32 %v5861_v60, %v1647_v23  ;;  %1818 = vmatpush.msrb.mxu3 %v681_v15  ;;  %1826 = vmatpush.msrb.mxu0 %v608_v62  ;;  %v641_v23 = vld [vmem:[%s8348_s4 + $0x1d8] sm:$0xff]  ;;  %v631_v62 = vld [vmem:[%s8348_s4 + $0x188] sm:$0xff] }
 0x4d4   :  { %1866 = vmatpush.msra.mxu2 %v609_v32  ;;  %v593_v15 = vld [vmem:[%s8348_s4 + $0x58] sm:$0xff]  ;;  %v962_v32 = vadd.f32 %v4840_v19, %v4842_v20  ;;  %v591_v19 = vld [vmem:[%s8348_s4 + $0x48] sm:$0xff] }
 0x4d5   :  { %1686 = vmatmul.f32.vlgmr.msrb.gmra.mxu1 %v1649_v63  ;;  %1726 = vmatmul.f32.vlgmr.msra.gmra.mxu3 %v1649_v63  ;;  %v601_v63 = vld [vmem:[%s8348_s4 + $0x98] sm:$0xff] }
 0x4d6   :  { %1819 = vmatpush.msrb.mxu3 %v679_v51  ;;  %1827 = vmatpush.msrb.mxu0 %v606_v58  ;;  %v590_v51 = vld [vmem:[%s8348_s4 + $0x40] sm:$0xff]  ;;  %v628_v58 = vld [vmem:[%s8348_s4 + $0x170] sm:$0xff]  ;;  %v629_v20 = vld [vmem:[%s8348_s4 + $0x178] sm:$0xff]  ;;  %v1621_v61 = vadd.f32 %v5687_v13, %v962_v32 }
 0x4d7   :  { %1844 = vmatpush.msrb.mxu1 %v644_v41  ;;  %1867 = vmatpush.msra.mxu2 %v607_v42  ;;  %v6053_v41 = vld [vmem:[%s8340_s8 + $0x8] sm:$0xff]  ;;  %v589_v13 = vld [vmem:[%s8348_s4 + $0x38] sm:$0xff] }
 0x4d8   :  { %1884 = vmatpush.msra.mxu3 %v645_v43  ;;  %1828 = vmatpush.msrb.mxu0 %v604_v44  ;;  %v1625_v42 = vperm.slane %v6053_v41, 2  ;;  %v588_v43 = vld [vmem:[%s8348_s4 + $0x30] sm:$0xff]  ;;  %v626_v44 = vld [vmem:[%s8348_s4 + $0x160] sm:$0xff] }
 0x4d9   :  { %1845 = vmatpush.msrb.mxu1 %v642_v45  ;;  %1868 = vmatpush.msra.mxu2 %v605_v46  ;;  %v627_v45 = vld [vmem:[%s8348_s4 + $0x168] sm:$0xff]  ;;  %v1632_v46 = vmul.f32 0.5, %v1628_v40  ;;  %v1617_v40 = vpop.f32.mrf.mxu3 }
 0x4da   :  { %1885 = vmatpush.msra.mxu3 %v643_v47  ;;  %1829 = vmatpush.msrb.mxu0 %v602_v50  ;;  %v586_v47 = vld [vmem:[%s8348_s4 + $0x20] sm:$0xff]  ;;  %v624_v50 = vld [vmem:[%s8348_s4 + $0x150] sm:$0xff] }
 0x4db   :  { %1846 = vmatpush.msrb.mxu1 %v640_v54  ;;  %1869 = vmatpush.msra.mxu2 %v603_v22  ;;  %v1557_v54 = vpop.f32.mrf.mxu0  ;;  %v587_v22 = vld [vmem:[%s8348_s4 + $0x28] sm:$0xff]  ;;  %3104 = vtanh.f32 %v1632_v46 }
 0x4dc   :  { %1886 = vmatpush.msra.mxu3 %v641_v23  ;;  %1830 = vmatpush.msrb.mxu0 %v600_v55  ;;  %v625_v23 = vld [vmem:[%s8348_s4 + $0x158] sm:$0xff]  ;;  %v1629_v55 = vadd.f32 %v1625_v42, %v1621_v61  ;;  %v1085_v61 = vperm.slane %v6053_v41, 0 }
 0x4dd   :  { %1847 = vmatpush.msrb.mxu1 %v638_v59  ;;  %1870 = vmatpush.msra.mxu2 %v601_v63  ;;  %v584_v59 = vld [vmem:[%s8348_s4 + $0x10] sm:$0xff]  ;;  %v622_v63 = vld [vmem:[%s8348_s4 + $0x140] sm:$0xff] }
 0x4de   :  { %1887 = vmatpush.msra.mxu3 %v639_v0  ;;  %1831 = vmatpush.msrb.mxu0 %v598_v1  ;;  %v585_v0 = vld [vmem:[%s8348_s4 + $0x18] sm:$0xff]  ;;  %v623_v1 = vld [vmem:[%s8348_s4 + $0x148] sm:$0xff] }
 0x4df   :  { %1848 = vmatpush.msrb.mxu1 %v636_v39  ;;  %1871 = vmatpush.msra.mxu2 %v599_v4  ;;  %v582_v39 = vld [vmem:[%s8348_s4] sm:$0xff]  ;;  %v620_v4 = vld [vmem:[%s8348_s4 + $0x130] sm:$0xff] }
 0x4e0   :  { %1888 = vmatpush.msra.mxu3 %v637_v5  ;;  %1832 = vmatpush.msrb.mxu0 %v596_v16  ;;  %v1577_v5 = vpop.f32.mrf.mxu1  ;;  %v583_v16 = vld [vmem:[%s8348_s4 + $0x8] sm:$0xff] }
 0x4e1   :  { %1849 = vmatpush.msrb.mxu1 %v634_v17  ;;  %1872 = vmatpush.msra.mxu2 %v597_v21  ;;  %v621_v17 = vld [vmem:[%s8348_s4 + $0x138] sm:$0xff]  ;;  %v1633_v21 = vmul.f32 0.5, %v1629_v55 }
 0x4e2   :  { %1889 = vmatpush.msra.mxu3 %v635_v25  ;;  %1833 = vmatpush.msrb.mxu0 %v594_v26  ;;  %v618_v25 = vld [vmem:[%s8348_s4 + $0x120] sm:$0xff]  ;;  %v762_v26 = vadd.f32 %v4475_v3, %v4473_v2  ;;  %v617_v2 = vld [vmem:[%s8348_s4 + $0x118] sm:$0xff]  ;;  %v3105_v3 = vpop.eup %3104 }
 0x4e3   :  { %1850 = vmatpush.msrb.mxu1 %v632_v27  ;;  %1873 = vmatpush.msra.mxu2 %v595_v28  ;;  %v1084_v27 = vperm.slane %v5993_v35, 0  ;;  %v1597_v28 = vpop.f32.mrf.mxu2  ;;  %3106 = vtanh.f32 %v1633_v21 }
 0x4e4   :  { %1890 = vmatpush.msra.mxu3 %v633_v29  ;;  %1834 = vmatpush.msrb.mxu0 %v592_v30  ;;  %v619_v29 = vld [vmem:[%s8348_s4 + $0x128] sm:$0xff]  ;;  %v616_v30 = vld [vmem:[%s8348_s4 + $0x110] sm:$0xff] }
 0x4e5   :  { %1851 = vmatpush.msrb.mxu1 %v630_v31  ;;  %1874 = vmatpush.msra.mxu2 %v593_v15  ;;  %v1578_v15 = vadd.f32 %v1577_v5, %v1557_v54  ;;  %v6126_v32 = vadd.f32 %v1084_v27, %v762_v26 }
 0x4e6   :  { %1891 = vmatpush.msra.mxu3 %v631_v62  ;;  %1835 = vmatpush.msrb.mxu0 %v590_v51  ;;  %v614_v62 = vld [vmem:[%s8348_s4 + $0x100] sm:$0xff]  ;;  %v615_v51 = vld [vmem:[%s8348_s4 + $0x108] sm:$0xff] }
 0x4e7   :  { %1852 = vmatpush.msrb.mxu1 %v628_v58  ;;  %1875 = vmatpush.msra.mxu2 %v591_v19  ;;  %v1730_v19 = vperm.slane %v5993_v35, 3  ;;  %vm1088_vm2 = vcmp.gt.f32.partialorder %v6126_v32, 0.0 }
 0x4e8   :  { %1892 = vmatpush.msra.mxu3 %v629_v20  ;;  %1836 = vmatpush.msrb.mxu0 %v588_v43  ;;  %v802_v20 = vadd.f32 %v4816_v6, %v4818_v8  ;;  %v1640_v43 = vadd.f32 1.0, %v3105_v3 }
 0x4e9   :  { %1853 = vmatpush.msrb.mxu1 %v626_v44  ;;  %1876 = vmatpush.msra.mxu2 %v589_v13 }
 0x4ea   :  { %1893 = vmatpush.msra.mxu3 %v627_v45  ;;  %1837 = vmatpush.msrb.mxu0 %v586_v47  ;;  %v1090_v45 = vmin.f32 %v6126_v32, 0.0  ;;  %v3107_v47 = vpop.eup %3106  ;;  %v1644_v6 = vmul.f32 0.5, %v1640_v43 }
 0x4eb   :  { %1854 = vmatpush.msrb.mxu1 %v624_v50  ;;  %1877 = vmatpush.msra.mxu2 %v587_v22  ;;  %v1618_v50 = vadd.f32 %v1617_v40, %v1597_v28  ;;  %v6140_v22 = vadd.f32 %v1085_v61, %v802_v20  ;;  %v3148_v40 = vld [vmem:[%s8338_s1 + $0x3f8] sm:$0xff] }
 0x4ec   :  { %1894 = vmatpush.msra.mxu3 %v625_v23  ;;  %1838 = vmatpush.msrb.mxu0 %v584_v59  ;;  %v1731_v23 = vperm.slane %v6053_v41, 3  ;;  %v1092_v55 = vmul.f32 1.442695, %v1090_v45  ;;  %v1641_v59 = vadd.f32 1.0, %v3107_v47  ;;  %v3155_v47 = vld [vmem:[%s8338_s1 + $0x318] sm:$0xff] }
 0x4ed   :  { %1855 = vmatpush.msrb.mxu1 %v622_v63  ;;  %1878 = vmatpush.msra.mxu2 %v585_v0  ;;  %vm1089_vm3 = vcmp.gt.f32.partialorder %v6140_v22, 0.0 }
 0x4ee   :  { %1895 = vmatpush.msra.mxu3 %v623_v1  ;;  %1839 = vmatpush.msrb.mxu0 %v582_v39  ;;  %v1091_v1 = vmin.f32 %v6140_v22, 0.0  ;;  %v1736_v39 = vsub.f32 1.0, %v1644_v6  ;;  %v1645_v5 = vmul.f32 0.5, %v1641_v59 }
 0x4ef   :  { %1856 = vmatpush.msrb.mxu1 %v620_v4  ;;  %1879 = vmatpush.msra.mxu2 %v583_v16 }
 0x4f0   :  { %1896 = vmatpush.msra.mxu3 %v621_v17  ;;  %v1094_v17 = vmul.f32 1.442695, %v1091_v1  ;;  %v1738_v21 = vmul.f32 %v5819_v33, %v1736_v39  ;;  %v1737_v26 = vsub.f32 1.0, %v1645_v5  ;;  %v3163_v1 = vld [vmem:[%s8338_s1 + $0x288] sm:$0xff]  ;;  %v3165_v39 = vld [vmem:[%s8338_s1 + $0x290] sm:$0xff] }
 0x4f1   :  { %1857 = vmatpush.msrb.mxu1 %v618_v25 }
 0x4f2   :  { %1897 = vmatpush.msra.mxu3 %v619_v29  ;;  %v1739_v33 = vmul.f32 %v5861_v60, %v1737_v26  ;;  %v3150_v60 = vld [vmem:[%s8338_s1 + $0x3b0] sm:$0xff] }
 0x4f3   :  { %1858 = vmatpush.msrb.mxu1 %v616_v30  ;;  %v3172_v26 = vld [vmem:[%s8338_s1 + $0x750] sm:$0xff] }
 0x4f4   :  { %1898 = vmatpush.msra.mxu3 %v617_v2  ;;  %v3146_v2 = vld [vmem:[%s8338_s1 + $0x440] sm:$0xff] }
 0x4f5   :  { %1859 = vmatpush.msrb.mxu1 %v614_v62  ;;  %v3147_v62 = vld [vmem:[%s8338_s1 + $0x3f0] sm:$0xff] }
 0x4f6   :  { %1899 = vmatpush.msra.mxu3 %v615_v51 }
 0x54b   :  { %v1667_v31 = vpop.f32.mrf.mxu0 }
 0x54c   :  { %v1668_v58 = vadd.f32 %v1667_v31, %v1578_v15  ;;  %v3145_v31 = vld [vmem:[%s8338_s1 + $0x438] sm:$0xff] }
 0x551   :  { %v1707_v46 = vpop.f32.mrf.mxu2 }
 0x552   :  { %v1687_v44 = vpop.f32.mrf.mxu1  ;;  %v1708_v8 = vadd.f32 %v1707_v46, %v1618_v50  ;;  %v3153_v46 = vld [vmem:[%s8338_s1 + $0x368] sm:$0xff]  ;;  %v3156_v50 = vld [vmem:[%s8338_s1 + $0x870] sm:$0xff] }
 0x553   :  { %v1688_v13 = vadd.f32 %v1687_v44, %v1668_v58  ;;  %v3149_v58 = vld [vmem:[%s8338_s1 + $0x3a8] sm:$0xff]  ;;  %v3151_v44 = vld [vmem:[%s8338_s1 + $0x360] sm:$0xff] }
 0x555   :  { %v1732_v54 = vadd.f32 %v1730_v19, %v1688_v13  ;;  %v3152_v13 = vld [vmem:[%s8338_s1 + $0x8b8] sm:$0xff] }
 0x557   :  { %3108 = vtanh.f32 %v1732_v54  ;;  %v3157_v54 = vld [vmem:[%s8338_s1 + $0x320] sm:$0xff] }
 0x558   :  { %v1727_v63 = vpop.f32.mrf.mxu3  ;;  %3110 = vpow2.f32 %v1092_v55  ;;  %v3160_v55 = vld [vmem:[%s8338_s1 + $0x828] sm:$0xff] }
 0x559   :  { %v1728_v0 = vadd.f32 %v1727_v63, %v1708_v8  ;;  %v3159_v8 = vld [vmem:[%s8338_s1 + $0x2d0] sm:$0xff]  ;;  %v3161_v63 = vld [vmem:[%s8338_s1 + $0x2d8] sm:$0xff] }
 0x55b   :  { %v1733_v4 = vadd.f32 %v1731_v23, %v1728_v0  ;;  %v3162_v0 = vld [vmem:[%s8338_s1 + $0x830] sm:$0xff] }
 0x55d   :  { %v3109_v16 = vpop.eup %3108  ;;  %3112 = vtanh.f32 %v1733_v4  ;;  %v3166_v4 = vld [vmem:[%s8338_s1 + $0x7e8] sm:$0xff] }
 0x55e   :  { %v1740_v25 = vmul.f32 %v3109_v16, %v1644_v6  ;;  %v3111_v29 = vpop.eup %3110  ;;  %3114 = vpow2.f32 %v1094_v17  ;;  %v3158_v6 = vld [vmem:[%s8338_s1 + $0x878] sm:$0xff]  ;;  %v3169_v17 = vld [vmem:[%s8338_s1 + $0x248] sm:$0xff] }
 0x55f   :  { %v3048_v15 = vadd.f32 -1.0, %v3111_v29  ;;  %v3168_v16 = vld [vmem:[%s8338_s1 + $0x798] sm:$0xff] }
 0x560   :  { %v1742_v28 = vadd.f32 %v1740_v25, %v1738_v21  ;;  %v3170_v21 = vld [vmem:[%s8338_s1 + $0x7a0] sm:$0xff]  ;;  %v3171_v25 = vld [vmem:[%s8338_s1 + $0x1f8] sm:$0xff] }
 0x561   :  { %v1098_v43 = vsel %vm1088_vm2, %v6126_v32, %v3048_v15  ;;  %v3154_v32 = vld [vmem:[%s8338_s1 + $0x8c0] sm:$0xff]  ;;  %v3174_v29 = vld [vmem:[%s8338_s1 + $0x758] sm:$0xff] }
 0x562   :  { %1760 = vmatmul.f32.vlgmr.msra.gmra.mxu0 %v1742_v28  ;;  %1800 = vmatmul.f32.vlgmr.msrb.gmra.mxu2 %v1742_v28  ;;  %v3173_v28 = vld [vmem:[%s8338_s1 + $0x200] sm:$0xff] }
 0x563   :  { %v3113_v30 = vpop.eup %3112  ;;  %1908 = vmatpush.msra.mxu0 %v3145_v31  ;;  %1948 = vmatpush.msrb.mxu2 %v3146_v2  ;;  %v3176_v31 = vld [vmem:[%s8338_s1 + $0x708] sm:$0xff]  ;;  %v3177_v2 = vld [vmem:[%s8338_s1 + $0x1b8] sm:$0xff]  ;;  %v3180_v15 = vld [vmem:[%s8338_s1 + $0x6c0] sm:$0xff] }
 0x564   :  { %v1741_v3 = vmul.f32 %v3113_v30, %v1645_v5  ;;  %v3115_v20 = vpop.eup %3114  ;;  %v3167_v5 = vld [vmem:[%s8338_s1 + $0x240] sm:$0xff]  ;;  %v3175_v30 = vld [vmem:[%s8338_s1 + $0x1b0] sm:$0xff] }
 0x565   :  { %1909 = vmatpush.msra.mxu0 %v3147_v62  ;;  %1949 = vmatpush.msrb.mxu2 %v3148_v40  ;;  %v3049_v45 = vadd.f32 -1.0, %v3115_v20  ;;  %v3181_v62 = vld [vmem:[%s8338_s1 + $0x170] sm:$0xff]  ;;  %v3182_v40 = vld [vmem:[%s8338_s1 + $0x6c8] sm:$0xff]  ;;  %v3186_v20 = vld [vmem:[%s8338_s1 + $0x680] sm:$0xff] }
 0x566   :  { %v1743_v51 = vadd.f32 %v1741_v3, %v1739_v33  ;;  %v3178_v33 = vld [vmem:[%s8338_s1 + $0x710] sm:$0xff]  ;;  %v3179_v3 = vld [vmem:[%s8338_s1 + $0x168] sm:$0xff] }
 0x567   :  { %1910 = vmatpush.msra.mxu0 %v3149_v58  ;;  %1950 = vmatpush.msrb.mxu2 %v3150_v60  ;;  %v1099_v59 = vsel %vm1089_vm3, %v6140_v22, %v3049_v45  ;;  %v3164_v22 = vld [vmem:[%s8338_s1 + $0x7e0] sm:$0xff]  ;;  %v3184_v58 = vld [vmem:[%s8338_s1 + $0x678] sm:$0xff]  ;;  %v3185_v60 = vld [vmem:[%s8338_s1 + $0x128] sm:$0xff] }
 0x568   :  { %1780 = vmatmul.f32.vlgmr.msra.gmra.mxu1 %v1743_v51  ;;  %1820 = vmatmul.f32.vlgmr.msrb.gmra.mxu3 %v1743_v51  ;;  %v3183_v51 = vld [vmem:[%s8338_s1 + $0x120] sm:$0xff]  ;;  %v3190_v45 = vld [vmem:[%s8338_s1 + $0x638] sm:$0xff] }
 0x569   :  { %1911 = vmatpush.msra.mxu0 %v3151_v44  ;;  %1928 = vmatpush.msra.mxu1 %v3152_v13  ;;  %v3188_v44 = vld [vmem:[%s8338_s1 + $0x630] sm:$0xff]  ;;  %v3189_v13 = vld [vmem:[%s8338_s1 + $0xe0] sm:$0xff] }
 0x56a   :  { %1840 = vmatmul.f32.vlgmr.msrb.gmra.mxu0 %v1098_v43  ;;  %1880 = vmatmul.f32.vlgmr.msra.gmra.mxu2 %v1098_v43  ;;  %v3187_v43 = vld [vmem:[%s8338_s1 + $0xd8] sm:$0xff] }
 0x56b   :  { %1951 = vmatpush.msrb.mxu2 %v3153_v46  ;;  %1968 = vmatpush.msrb.mxu3 %v3154_v32  ;;  %v3191_v46 = vld [vmem:[%s8338_s1 + $0x90] sm:$0xff]  ;;  %v3192_v32 = vld [vmem:[%s8338_s1 + $0x5e8] sm:$0xff] }
 0x56c   :  { %1912 = vmatpush.msra.mxu0 %v3155_v47  ;;  %1929 = vmatpush.msra.mxu1 %v3156_v50  ;;  %v3193_v47 = vld [vmem:[%s8338_s1 + $0x98] sm:$0xff]  ;;  %v3194_v50 = vld [vmem:[%s8338_s1 + $0x5f0] sm:$0xff] }
 0x56d   :  { %1952 = vmatpush.msrb.mxu2 %v3157_v54  ;;  %1969 = vmatpush.msrb.mxu3 %v3158_v6  ;;  %v3195_v54 = vld [vmem:[%s8338_s1 + $0x48] sm:$0xff]  ;;  %v3196_v6 = vld [vmem:[%s8338_s1 + $0x5a0] sm:$0xff] }
 0x56e   :  { %1913 = vmatpush.msra.mxu0 %v3159_v8  ;;  %1930 = vmatpush.msra.mxu1 %v3160_v55  ;;  %v3197_v8 = vld [vmem:[%s8338_s1 + $0x50] sm:$0xff]  ;;  %v3198_v55 = vld [vmem:[%s8338_s1 + $0x5a8] sm:$0xff] }
 0x56f   :  { %1953 = vmatpush.msrb.mxu2 %v3161_v63  ;;  %1970 = vmatpush.msrb.mxu3 %v3162_v0  ;;  %v3200_v63 = vld [vmem:[%s8338_s1 + $0x558] sm:$0xff]  ;;  %v3201_v0 = vld [vmem:[%s8338_s1 + $0x8] sm:$0xff] }
 0x570   :  { %1860 = vmatmul.f32.vlgmr.msrb.gmra.mxu1 %v1099_v59  ;;  %1900 = vmatmul.f32.vlgmr.msra.gmra.mxu3 %v1099_v59  ;;  %v3199_v59 = vld [vmem:[%s8338_s1] sm:$0xff] }
 0x571   :  { %1914 = vmatpush.msra.mxu0 %v3163_v1  ;;  %1931 = vmatpush.msra.mxu1 %v3164_v22  ;;  %v3202_v1 = vld [vmem:[%s8338_s1 + $0x560] sm:$0xff]  ;;  %v3203_v22 = vld [vmem:[%s8338_s1 + $0x448] sm:$0xff] }
 0x572   :  { %1954 = vmatpush.msrb.mxu2 %v3165_v39  ;;  %1971 = vmatpush.msrb.mxu3 %v3166_v4  ;;  %v3204_v39 = vld [vmem:[%s8338_s1 + $0x450] sm:$0xff] }
 0x573   :  { %1915 = vmatpush.msra.mxu0 %v3167_v5  ;;  %1932 = vmatpush.msra.mxu1 %v3168_v16  ;;  %v3205_v4 = vld [vmem:[%s8338_s1 + $0x510] sm:$0xff]  ;;  %v3206_v5 = vld [vmem:[%s8338_s1 + $0x518] sm:$0xff]  ;;  %v3207_v16 = vld [vmem:[%s8338_s1 + $0x400] sm:$0xff] }
 0x574   :  { %1955 = vmatpush.msrb.mxu2 %v3169_v17  ;;  %1972 = vmatpush.msrb.mxu3 %v3170_v21  ;;  %v3208_v17 = vld [vmem:[%s8338_s1 + $0x408] sm:$0xff] }
 0x575   :  { %1916 = vmatpush.msra.mxu0 %v3171_v25  ;;  %1933 = vmatpush.msra.mxu1 %v3172_v26  ;;  %v3209_v21 = vld [vmem:[%s8338_s1 + $0x4c8] sm:$0xff]  ;;  %v3210_v25 = vld [vmem:[%s8338_s1 + $0x4d0] sm:$0xff]  ;;  %v3211_v26 = vld [vmem:[%s8338_s1 + $0x3b8] sm:$0xff] }
 0x576   :  { %1956 = vmatpush.msrb.mxu2 %v3173_v28  ;;  %1973 = vmatpush.msrb.mxu3 %v3174_v29  ;;  %v3212_v28 = vld [vmem:[%s8338_s1 + $0x3c0] sm:$0xff] }
 0x577   :  { %1917 = vmatpush.msra.mxu0 %v3175_v30  ;;  %1934 = vmatpush.msra.mxu1 %v3176_v31  ;;  %v3213_v29 = vld [vmem:[%s8338_s1 + $0x480] sm:$0xff]  ;;  %v3214_v30 = vld [vmem:[%s8338_s1 + $0x488] sm:$0xff]  ;;  %v3215_v31 = vld [vmem:[%s8338_s1 + $0x370] sm:$0xff] }
 0x578   :  { %1957 = vmatpush.msrb.mxu2 %v3177_v2  ;;  %1974 = vmatpush.msrb.mxu3 %v3178_v33  ;;  %v3216_v2 = vld [vmem:[%s8338_s1 + $0x8c8] sm:$0xff]  ;;  %v3217_v33 = vld [vmem:[%s8338_s1 + $0x378] sm:$0xff] }
 0x579   :  { %1918 = vmatpush.msra.mxu0 %v3179_v3  ;;  %1935 = vmatpush.msra.mxu1 %v3180_v15  ;;  %v3218_v3 = vld [vmem:[%s8338_s1 + $0x8d0] sm:$0xff]  ;;  %v3219_v15 = vld [vmem:[%s8338_s1 + $0x328] sm:$0xff] }
 0x57a   :  { %1958 = vmatpush.msrb.mxu2 %v3181_v62  ;;  %1975 = vmatpush.msrb.mxu3 %v3182_v40  ;;  %v3220_v62 = vld [vmem:[%s8338_s1 + $0x880] sm:$0xff]  ;;  %v3221_v40 = vld [vmem:[%s8338_s1 + $0x330] sm:$0xff] }
 0x57b   :  { %1919 = vmatpush.msra.mxu0 %v3183_v51  ;;  %1936 = vmatpush.msra.mxu1 %v3184_v58  ;;  %v3222_v51 = vld [vmem:[%s8338_s1 + $0x888] sm:$0xff]  ;;  %v3223_v58 = vld [vmem:[%s8338_s1 + $0x2e0] sm:$0xff] }
 0x57c   :  { %1959 = vmatpush.msrb.mxu2 %v3185_v60  ;;  %1976 = vmatpush.msrb.mxu3 %v3186_v20  ;;  %v3224_v60 = vld [vmem:[%s8338_s1 + $0x838] sm:$0xff]  ;;  %v3225_v20 = vld [vmem:[%s8338_s1 + $0x2e8] sm:$0xff] }
 0x57d   :  { %1920 = vmatpush.msra.mxu0 %v3187_v43  ;;  %1937 = vmatpush.msra.mxu1 %v3188_v44  ;;  %v3226_v43 = vld [vmem:[%s8338_s1 + $0x840] sm:$0xff]  ;;  %v3227_v44 = vld [vmem:[%s8338_s1 + $0x298] sm:$0xff] }
 0x57e   :  { %1960 = vmatpush.msrb.mxu2 %v3189_v13  ;;  %1977 = vmatpush.msrb.mxu3 %v3190_v45  ;;  %v3228_v13 = vld [vmem:[%s8338_s1 + $0x7f0] sm:$0xff]  ;;  %v3229_v45 = vld [vmem:[%s8338_s1 + $0x2a0] sm:$0xff] }
 0x57f   :  { %1921 = vmatpush.msra.mxu0 %v3191_v46  ;;  %1938 = vmatpush.msra.mxu1 %v3192_v32  ;;  %v3230_v46 = vld [vmem:[%s8338_s1 + $0x7f8] sm:$0xff]  ;;  %v3231_v32 = vld [vmem:[%s8338_s1 + $0x250] sm:$0xff] }
 0x580   :  { %1961 = vmatpush.msrb.mxu2 %v3193_v47  ;;  %1978 = vmatpush.msrb.mxu3 %v3194_v50  ;;  %v3232_v47 = vld [vmem:[%s8338_s1 + $0x7a8] sm:$0xff]  ;;  %v3233_v50 = vld [vmem:[%s8338_s1 + $0x258] sm:$0xff] }
 0x581   :  { %1922 = vmatpush.msra.mxu0 %v3195_v54  ;;  %1939 = vmatpush.msra.mxu1 %v3196_v6  ;;  %v3234_v54 = vld [vmem:[%s8338_s1 + $0x7b0] sm:$0xff]  ;;  %v3235_v6 = vld [vmem:[%s8338_s1 + $0x208] sm:$0xff] }
 0x582   :  { %1962 = vmatpush.msrb.mxu2 %v3197_v8  ;;  %1979 = vmatpush.msrb.mxu3 %v3198_v55  ;;  %v3236_v8 = vld [vmem:[%s8338_s1 + $0x760] sm:$0xff]  ;;  %v3237_v55 = vld [vmem:[%s8338_s1 + $0x210] sm:$0xff] }
 0x583   :  { %1923 = vmatpush.msra.mxu0 %v3199_v59  ;;  %1940 = vmatpush.msra.mxu1 %v3200_v63  ;;  %v3238_v59 = vld [vmem:[%s8338_s1 + $0x768] sm:$0xff]  ;;  %v3239_v63 = vld [vmem:[%s8338_s1 + $0x1c0] sm:$0xff] }
 0x584   :  { %1963 = vmatpush.msrb.mxu2 %v3201_v0  ;;  %1980 = vmatpush.msrb.mxu3 %v3202_v1  ;;  %v3240_v0 = vld [vmem:[%s8338_s1 + $0x718] sm:$0xff]  ;;  %v3241_v1 = vld [vmem:[%s8338_s1 + $0x1c8] sm:$0xff] }
 0x585   :  { %1988 = vmatpush.msrb.mxu0 %v3203_v22  ;;  %1941 = vmatpush.msra.mxu1 %v3205_v4  ;;  %v3242_v22 = vld [vmem:[%s8338_s1 + $0x720] sm:$0xff]  ;;  %v3244_v4 = vld [vmem:[%s8338_s1 + $0x6d0] sm:$0xff] }
 0x586   :  { %2028 = vmatpush.msra.mxu2 %v3204_v39  ;;  %1981 = vmatpush.msrb.mxu3 %v3206_v5  ;;  %v3243_v39 = vld [vmem:[%s8338_s1 + $0x178] sm:$0xff]  ;;  %v3245_v5 = vld [vmem:[%s8338_s1 + $0x180] sm:$0xff] }
 0x587   :  { %1989 = vmatpush.msrb.mxu0 %v3207_v16  ;;  %1942 = vmatpush.msra.mxu1 %v3209_v21  ;;  %v3246_v16 = vld [vmem:[%s8338_s1 + $0x6d8] sm:$0xff]  ;;  %v3248_v21 = vld [vmem:[%s8338_s1 + $0x688] sm:$0xff] }
 0x588   :  { %2029 = vmatpush.msra.mxu2 %v3208_v17  ;;  %1982 = vmatpush.msrb.mxu3 %v3210_v25  ;;  %v3247_v17 = vld [vmem:[%s8338_s1 + $0x130] sm:$0xff]  ;;  %v3249_v25 = vld [vmem:[%s8338_s1 + $0x138] sm:$0xff] }
 0x589   :  { %1990 = vmatpush.msrb.mxu0 %v3211_v26  ;;  %1943 = vmatpush.msra.mxu1 %v3213_v29  ;;  %v3250_v26 = vld [vmem:[%s8338_s1 + $0x690] sm:$0xff]  ;;  %v3252_v29 = vld [vmem:[%s8338_s1 + $0x640] sm:$0xff] }
 0x58a   :  { %2030 = vmatpush.msra.mxu2 %v3212_v28  ;;  %1983 = vmatpush.msrb.mxu3 %v3214_v30  ;;  %v3251_v28 = vld [vmem:[%s8338_s1 + $0xe8] sm:$0xff]  ;;  %v3253_v30 = vld [vmem:[%s8338_s1 + $0xf0] sm:$0xff] }
 0x58b   :  { %1991 = vmatpush.msrb.mxu0 %v3215_v31  ;;  %2008 = vmatpush.msrb.mxu1 %v3216_v2  ;;  %v3254_v31 = vld [vmem:[%s8338_s1 + $0x648] sm:$0xff]  ;;  %v3255_v2 = vld [vmem:[%s8338_s1 + $0xa0] sm:$0xff] }
 0x58c   :  { %2031 = vmatpush.msra.mxu2 %v3217_v33  ;;  %2048 = vmatpush.msra.mxu3 %v3218_v3  ;;  %v3256_v33 = vld [vmem:[%s8338_s1 + $0x5f8] sm:$0xff]  ;;  %v3257_v3 = vld [vmem:[%s8338_s1 + $0xa8] sm:$0xff] }
 0x58d   :  { %1992 = vmatpush.msrb.mxu0 %v3219_v15  ;;  %2009 = vmatpush.msrb.mxu1 %v3220_v62  ;;  %v3258_v15 = vld [vmem:[%s8338_s1 + $0x600] sm:$0xff]  ;;  %v3259_v62 = vld [vmem:[%s8338_s1 + $0x58] sm:$0xff] }
 0x58e   :  { %2032 = vmatpush.msra.mxu2 %v3221_v40  ;;  %2049 = vmatpush.msra.mxu3 %v3222_v51  ;;  %v3260_v40 = vld [vmem:[%s8338_s1 + $0x5b0] sm:$0xff]  ;;  %v3261_v51 = vld [vmem:[%s8338_s1 + $0x60] sm:$0xff] }
 0x58f   :  { %1993 = vmatpush.msrb.mxu0 %v3223_v58  ;;  %2010 = vmatpush.msrb.mxu1 %v3224_v60  ;;  %v3262_v58 = vld [vmem:[%s8338_s1 + $0x5b8] sm:$0xff]  ;;  %v3263_v60 = vld [vmem:[%s8338_s1 + $0x10] sm:$0xff] }
 0x590   :  { %2033 = vmatpush.msra.mxu2 %v3225_v20  ;;  %2050 = vmatpush.msra.mxu3 %v3226_v43  ;;  %v3264_v20 = vld [vmem:[%s8338_s1 + $0x568] sm:$0xff]  ;;  %v3265_v43 = vld [vmem:[%s8338_s1 + $0x18] sm:$0xff] }
 0x591   :  { %1994 = vmatpush.msrb.mxu0 %v3227_v44  ;;  %2011 = vmatpush.msrb.mxu1 %v3228_v13  ;;  %v3266_v44 = vld [vmem:[%s8338_s1 + $0x570] sm:$0xff]  ;;  %v3267_v13 = vld [vmem:[%s8338_s1 + $0x520] sm:$0xff] }
 0x592   :  { %2034 = vmatpush.msra.mxu2 %v3229_v45  ;;  %2051 = vmatpush.msra.mxu3 %v3230_v46  ;;  %v3268_v45 = vld [vmem:[%s8338_s1 + $0x528] sm:$0xff]  ;;  %v3269_v46 = vld [vmem:[%s8338_s1 + $0x4d8] sm:$0xff] }
 0x593   :  { %1995 = vmatpush.msrb.mxu0 %v3231_v32  ;;  %2012 = vmatpush.msrb.mxu1 %v3232_v47  ;;  %v3270_v32 = vld [vmem:[%s8338_s1 + $0x4e0] sm:$0xff]  ;;  %v3271_v47 = vld [vmem:[%s8338_s1 + $0x490] sm:$0xff] }
 0x594   :  { %2035 = vmatpush.msra.mxu2 %v3233_v50  ;;  %2052 = vmatpush.msra.mxu3 %v3234_v54  ;;  %v3272_v50 = vld [vmem:[%s8338_s1 + $0x498] sm:$0xff] }
 0x595   :  { %1996 = vmatpush.msrb.mxu0 %v3235_v6  ;;  %2013 = vmatpush.msrb.mxu1 %v3236_v8 }
 0x596   :  { %2036 = vmatpush.msra.mxu2 %v3237_v55  ;;  %2053 = vmatpush.msra.mxu3 %v3238_v59 }
 0x597   :  { %1997 = vmatpush.msrb.mxu0 %v3239_v63  ;;  %2014 = vmatpush.msrb.mxu1 %v3240_v0 }
 0x598   :  { %2037 = vmatpush.msra.mxu2 %v3241_v1  ;;  %2054 = vmatpush.msra.mxu3 %v3242_v22  ;;  %v1904_v1 = vperm.slane %v5993_v35, 6 }
 0x599   :  { %1998 = vmatpush.msrb.mxu0 %v3243_v39  ;;  %2015 = vmatpush.msrb.mxu1 %v3244_v4 }
 0x59a   :  { %2038 = vmatpush.msra.mxu2 %v3245_v5  ;;  %2055 = vmatpush.msra.mxu3 %v3246_v16 }
 0x59b   :  { %1999 = vmatpush.msrb.mxu0 %v3247_v17  ;;  %2016 = vmatpush.msrb.mxu1 %v3248_v21  ;;  %v1905_v21 = vperm.slane %v6053_v41, 6 }
 0x59c   :  { %2039 = vmatpush.msra.mxu2 %v3249_v25  ;;  %2056 = vmatpush.msra.mxu3 %v3250_v26  ;;  %v3273_v25 = vld [vmem:[%s8338_s1 + $0x458] sm:$0xff]  ;;  %v3274_v26 = vld [vmem:[%s8338_s1 + $0x460] sm:$0xff] }
 0x59d   :  { %2000 = vmatpush.msrb.mxu0 %v3251_v28  ;;  %2017 = vmatpush.msrb.mxu1 %v3252_v29 }
 0x59e   :  { %2040 = vmatpush.msra.mxu2 %v3253_v30  ;;  %2057 = vmatpush.msra.mxu3 %v3254_v31  ;;  %v3275_v30 = vld [vmem:[%s8338_s1 + $0x410] sm:$0xff]  ;;  %v3276_v31 = vld [vmem:[%s8338_s1 + $0x418] sm:$0xff] }
 0x59f   :  { %2001 = vmatpush.msrb.mxu0 %v3255_v2  ;;  %2018 = vmatpush.msrb.mxu1 %v3256_v33  ;;  %v3277_v33 = vld [vmem:[%s8338_s1 + $0x3c8] sm:$0xff] }
 0x5a0   :  { %2041 = vmatpush.msra.mxu2 %v3257_v3  ;;  %2058 = vmatpush.msra.mxu3 %v3258_v15  ;;  %v3278_v3 = vld [vmem:[%s8338_s1 + $0x3d0] sm:$0xff]  ;;  %v3279_v15 = vld [vmem:[%s8338_s1 + $0x380] sm:$0xff] }
 0x5a1   :  { %2002 = vmatpush.msrb.mxu0 %v3259_v62  ;;  %2019 = vmatpush.msrb.mxu1 %v3260_v40  ;;  %v3280_v62 = vld [vmem:[%s8338_s1 + $0x8d8] sm:$0xff]  ;;  %v3281_v40 = vld [vmem:[%s8338_s1 + $0x388] sm:$0xff] }
 0x5a2   :  { %2042 = vmatpush.msra.mxu2 %v3261_v51  ;;  %2059 = vmatpush.msra.mxu3 %v3262_v58  ;;  %v3282_v51 = vld [vmem:[%s8338_s1 + $0x8e0] sm:$0xff]  ;;  %v3283_v58 = vld [vmem:[%s8338_s1 + $0x338] sm:$0xff] }
 0x5a3   :  { %2003 = vmatpush.msrb.mxu0 %v3263_v60  ;;  %2020 = vmatpush.msrb.mxu1 %v3264_v20  ;;  %v3284_v60 = vld [vmem:[%s8338_s1 + $0x890] sm:$0xff]  ;;  %v3285_v20 = vld [vmem:[%s8338_s1 + $0x340] sm:$0xff] }
 0x5a4   :  { %2043 = vmatpush.msra.mxu2 %v3265_v43  ;;  %2060 = vmatpush.msra.mxu3 %v3266_v44  ;;  %v3286_v43 = vld [vmem:[%s8338_s1 + $0x898] sm:$0xff]  ;;  %v3287_v44 = vld [vmem:[%s8338_s1 + $0x2f0] sm:$0xff] }
 0x5a5   :  { %2021 = vmatpush.msrb.mxu1 %v3267_v13  ;;  %v3288_v13 = vld [vmem:[%s8338_s1 + $0x848] sm:$0xff] }
 0x5a6   :  { %2061 = vmatpush.msra.mxu3 %v3268_v45  ;;  %v3289_v45 = vld [vmem:[%s8338_s1 + $0x2f8] sm:$0xff] }
 0x5a7   :  { %2022 = vmatpush.msrb.mxu1 %v3269_v46  ;;  %v3290_v46 = vld [vmem:[%s8338_s1 + $0x850] sm:$0xff] }
 0x5a8   :  { %2062 = vmatpush.msra.mxu3 %v3270_v32  ;;  %v3291_v32 = vld [vmem:[%s8338_s1 + $0x2a8] sm:$0xff] }
 0x5a9   :  { %2023 = vmatpush.msrb.mxu1 %v3271_v47  ;;  %v3292_v47 = vld [vmem:[%s8338_s1 + $0x800] sm:$0xff] }
 0x5aa   :  { %2063 = vmatpush.msra.mxu3 %v3272_v50  ;;  %v3293_v50 = vld [vmem:[%s8338_s1 + $0x2b0] sm:$0xff] }
 0x5df   :  { %v1761_v54 = vpop.f32.mrf.mxu0 }
 0x5e5   :  { %v1781_v6 = vpop.f32.mrf.mxu1  ;;  %v1801_v8 = vpop.f32.mrf.mxu2 }
 0x5e6   :  { %v1782_v55 = vadd.f32 %v1781_v6, %v1761_v54  ;;  %v3294_v54 = vld [vmem:[%s8338_s1 + $0x808] sm:$0xff]  ;;  %v3295_v6 = vld [vmem:[%s8338_s1 + $0x260] sm:$0xff] }
 0x5e7   :  { %v1841_v59 = vpop.f32.mrf.mxu0 }
 0x5e8   :  { %v1842_v0 = vadd.f32 %v1841_v59, %v1782_v55  ;;  %v3297_v55 = vld [vmem:[%s8338_s1 + $0x268] sm:$0xff]  ;;  %v3298_v59 = vld [vmem:[%s8338_s1 + $0x7c0] sm:$0xff] }
 0x5eb   :  { %v1821_v63 = vpop.f32.mrf.mxu3 }
 0x5ec   :  { %v1822_v39 = vadd.f32 %v1821_v63, %v1801_v8  ;;  %v3296_v8 = vld [vmem:[%s8338_s1 + $0x7b8] sm:$0xff] }
 0x5ed   :  { %v1861_v22 = vpop.f32.mrf.mxu1  ;;  %v1881_v5 = vpop.f32.mrf.mxu2  ;;  %v3299_v63 = vld [vmem:[%s8338_s1 + $0x218] sm:$0xff] }
 0x5ee   :  { %v1862_v4 = vadd.f32 %v1861_v22, %v1842_v0  ;;  %v1882_v17 = vadd.f32 %v1881_v5, %v1822_v39  ;;  %v3300_v0 = vld [vmem:[%s8338_s1 + $0x770] sm:$0xff]  ;;  %v3301_v22 = vld [vmem:[%s8338_s1 + $0x220] sm:$0xff]  ;;  %v3302_v39 = vld [vmem:[%s8338_s1 + $0x778] sm:$0xff] }
 0x5ef   :  { %v3304_v5 = vld [vmem:[%s8338_s1 + $0x728] sm:$0xff] }
 0x5f0   :  { %v6539_v16 = vadd.f32 %v1904_v1, %v1862_v4  ;;  %v3303_v4 = vld [vmem:[%s8338_s1 + $0x1d0] sm:$0xff] }
 0x5f2   :  { %1924 = vmatmul.f32.vlgmr.msra.gmra.mxu0 %v6539_v16  ;;  %1964 = vmatmul.f32.vlgmr.msrb.gmra.mxu2 %v6539_v16 }
 0x5f3   :  { %2068 = vmatpush.msra.mxu0 %v3273_v25  ;;  %2108 = vmatpush.msrb.mxu2 %v3274_v26  ;;  %v1901_v28 = vpop.f32.mrf.mxu3  ;;  %v3306_v25 = vld [vmem:[%s8338_s1 + $0x730] sm:$0xff]  ;;  %v3307_v26 = vld [vmem:[%s8338_s1 + $0x188] sm:$0xff] }
 0x5f4   :  { %v1902_v29 = vadd.f32 %v1901_v28, %v1882_v17  ;;  %v3305_v17 = vld [vmem:[%s8338_s1 + $0x1d8] sm:$0xff]  ;;  %v3308_v28 = vld [vmem:[%s8338_s1 + $0x6e0] sm:$0xff] }
 0x5f5   :  { %2069 = vmatpush.msra.mxu0 %v3275_v30  ;;  %2109 = vmatpush.msrb.mxu2 %v3276_v31  ;;  %v3310_v30 = vld [vmem:[%s8338_s1 + $0x6e8] sm:$0xff]  ;;  %v3311_v31 = vld [vmem:[%s8338_s1 + $0x140] sm:$0xff] }
 0x5f6   :  { %v6558_v2 = vadd.f32 %v1905_v21, %v1902_v29  ;;  %v3309_v29 = vld [vmem:[%s8338_s1 + $0x190] sm:$0xff] }
 0x5f7   :  { %2070 = vmatpush.msra.mxu0 %v3277_v33  ;;  %2110 = vmatpush.msrb.mxu2 %v3278_v3  ;;  %v3312_v33 = vld [vmem:[%s8338_s1 + $0x698] sm:$0xff]  ;;  %v3313_v3 = vld [vmem:[%s8338_s1 + $0x148] sm:$0xff] }
 0x5f8   :  { %1944 = vmatmul.f32.vlgmr.msra.gmra.mxu1 %v6558_v2  ;;  %1984 = vmatmul.f32.vlgmr.msrb.gmra.mxu3 %v6558_v2 }
 0x5f9   :  { %2071 = vmatpush.msra.mxu0 %v3279_v15  ;;  %2088 = vmatpush.msra.mxu1 %v3280_v62  ;;  %v3314_v15 = vld [vmem:[%s8338_s1 + $0x6a0] sm:$0xff]  ;;  %v3315_v62 = vld [vmem:[%s8338_s1 + $0xf8] sm:$0xff] }
 0x5fa   :  { %2111 = vmatpush.msrb.mxu2 %v3281_v40  ;;  %2128 = vmatpush.msrb.mxu3 %v3282_v51  ;;  %v3316_v40 = vld [vmem:[%s8338_s1 + $0x650] sm:$0xff]  ;;  %v3317_v51 = vld [vmem:[%s8338_s1 + $0x100] sm:$0xff] }
 0x5fb   :  { %2004 = vmatmul.f32.vlgmr.msrb.gmra.mxu0 %v6539_v16  ;;  %2044 = vmatmul.f32.vlgmr.msra.gmra.mxu2 %v6539_v16 }
 0x5fc   :  { %2072 = vmatpush.msra.mxu0 %v3283_v58  ;;  %2089 = vmatpush.msra.mxu1 %v3284_v60  ;;  %v3318_v58 = vld [vmem:[%s8338_s1 + $0x658] sm:$0xff]  ;;  %v3319_v60 = vld [vmem:[%s8338_s1 + $0xb0] sm:$0xff] }
 0x5fd   :  { %2112 = vmatpush.msrb.mxu2 %v3285_v20  ;;  %2129 = vmatpush.msrb.mxu3 %v3286_v43  ;;  %v3320_v20 = vld [vmem:[%s8338_s1 + $0x608] sm:$0xff]  ;;  %v3321_v43 = vld [vmem:[%s8338_s1 + $0xb8] sm:$0xff] }
 0x5fe   :  { %2073 = vmatpush.msra.mxu0 %v3287_v44  ;;  %2090 = vmatpush.msra.mxu1 %v3288_v13  ;;  %v3322_v44 = vld [vmem:[%s8338_s1 + $0x610] sm:$0xff]  ;;  %v3323_v13 = vld [vmem:[%s8338_s1 + $0x68] sm:$0xff] }
 0x5ff   :  { %2113 = vmatpush.msrb.mxu2 %v3289_v45  ;;  %2130 = vmatpush.msrb.mxu3 %v3290_v46  ;;  %v3324_v45 = vld [vmem:[%s8338_s1 + $0x5c0] sm:$0xff]  ;;  %v3325_v46 = vld [vmem:[%s8338_s1 + $0x70] sm:$0xff] }
 0x600   :  { %2074 = vmatpush.msra.mxu0 %v3291_v32  ;;  %2091 = vmatpush.msra.mxu1 %v3292_v47  ;;  %v3326_v32 = vld [vmem:[%s8338_s1 + $0x5c8] sm:$0xff]  ;;  %v3327_v47 = vld [vmem:[%s8338_s1 + $0x20] sm:$0xff] }
 0x601   :  { %2114 = vmatpush.msrb.mxu2 %v3293_v50  ;;  %2131 = vmatpush.msrb.mxu3 %v3294_v54  ;;  %v3328_v50 = vld [vmem:[%s8338_s1 + $0x578] sm:$0xff]  ;;  %v3329_v54 = vld [vmem:[%s8338_s1 + $0x28] sm:$0xff] }
 0x602   :  { %2024 = vmatmul.f32.vlgmr.msrb.gmra.mxu1 %v6558_v2  ;;  %2064 = vmatmul.f32.vlgmr.msra.gmra.mxu3 %v6558_v2 }
 0x603   :  { %2075 = vmatpush.msra.mxu0 %v3295_v6  ;;  %2092 = vmatpush.msra.mxu1 %v3296_v8  ;;  %v3330_v6 = vld [vmem:[%s8338_s1 + $0x580] sm:$0xff]  ;;  %v3331_v8 = vld [vmem:[%s8338_s1 + $0x468] sm:$0xff] }
 0x604   :  { %2115 = vmatpush.msrb.mxu2 %v3297_v55  ;;  %2132 = vmatpush.msrb.mxu3 %v3298_v59  ;;  %v3332_v55 = vld [vmem:[%s8338_s1 + $0x470] sm:$0xff] }
 0x605   :  { %2076 = vmatpush.msra.mxu0 %v3299_v63  ;;  %2093 = vmatpush.msra.mxu1 %v3300_v0  ;;  %v3333_v59 = vld [vmem:[%s8338_s1 + $0x530] sm:$0xff]  ;;  %v3334_v63 = vld [vmem:[%s8338_s1 + $0x538] sm:$0xff]  ;;  %v3335_v0 = vld [vmem:[%s8338_s1 + $0x420] sm:$0xff] }
 0x606   :  { %2116 = vmatpush.msrb.mxu2 %v3301_v22  ;;  %2133 = vmatpush.msrb.mxu3 %v3302_v39  ;;  %v3336_v22 = vld [vmem:[%s8338_s1 + $0x428] sm:$0xff] }
 0x607   :  { %2077 = vmatpush.msra.mxu0 %v3303_v4  ;;  %2094 = vmatpush.msra.mxu1 %v3304_v5  ;;  %v3337_v39 = vld [vmem:[%s8338_s1 + $0x4e8] sm:$0xff]  ;;  %v3338_v4 = vld [vmem:[%s8338_s1 + $0x4f0] sm:$0xff]  ;;  %v3339_v5 = vld [vmem:[%s8338_s1 + $0x3d8] sm:$0xff] }
 0x608   :  { %2117 = vmatpush.msrb.mxu2 %v3305_v17  ;;  %2134 = vmatpush.msrb.mxu3 %v3306_v25  ;;  %v3340_v17 = vld [vmem:[%s8338_s1 + $0x3e0] sm:$0xff] }
 0x609   :  { %2078 = vmatpush.msra.mxu0 %v3307_v26  ;;  %2095 = vmatpush.msra.mxu1 %v3308_v28  ;;  %v3341_v25 = vld [vmem:[%s8338_s1 + $0x4a0] sm:$0xff]  ;;  %v3342_v26 = vld [vmem:[%s8338_s1 + $0x4a8] sm:$0xff]  ;;  %v3343_v28 = vld [vmem:[%s8338_s1 + $0x390] sm:$0xff] }
 0x60a   :  { %2118 = vmatpush.msrb.mxu2 %v3309_v29  ;;  %2135 = vmatpush.msrb.mxu3 %v3310_v30  ;;  %v3344_v29 = vld [vmem:[%s8338_s1 + $0x8e8] sm:$0xff]  ;;  %v3345_v30 = vld [vmem:[%s8338_s1 + $0x398] sm:$0xff] }
 0x60b   :  { %2079 = vmatpush.msra.mxu0 %v3311_v31  ;;  %2096 = vmatpush.msra.mxu1 %v3312_v33  ;;  %v3346_v31 = vld [vmem:[%s8338_s1 + $0x8f0] sm:$0xff]  ;;  %v3347_v33 = vld [vmem:[%s8338_s1 + $0x348] sm:$0xff] }
 0x60c   :  { %2119 = vmatpush.msrb.mxu2 %v3313_v3  ;;  %2136 = vmatpush.msrb.mxu3 %v3314_v15  ;;  %v3348_v3 = vld [vmem:[%s8338_s1 + $0x8a0] sm:$0xff]  ;;  %v3349_v15 = vld [vmem:[%s8338_s1 + $0x350] sm:$0xff] }
 0x60d   :  { %2080 = vmatpush.msra.mxu0 %v3315_v62  ;;  %2097 = vmatpush.msra.mxu1 %v3316_v40  ;;  %v3350_v62 = vld [vmem:[%s8338_s1 + $0x8a8] sm:$0xff]  ;;  %v3351_v40 = vld [vmem:[%s8338_s1 + $0x300] sm:$0xff] }
 0x60e   :  { %2120 = vmatpush.msrb.mxu2 %v3317_v51  ;;  %2137 = vmatpush.msrb.mxu3 %v3318_v58  ;;  %v3352_v51 = vld [vmem:[%s8338_s1 + $0x858] sm:$0xff]  ;;  %v3353_v58 = vld [vmem:[%s8338_s1 + $0x308] sm:$0xff] }
 0x60f   :  { %2081 = vmatpush.msra.mxu0 %v3319_v60  ;;  %2098 = vmatpush.msra.mxu1 %v3320_v20  ;;  %v3354_v60 = vld [vmem:[%s8338_s1 + $0x860] sm:$0xff]  ;;  %v3355_v20 = vld [vmem:[%s8338_s1 + $0x2b8] sm:$0xff] }
 0x610   :  { %2121 = vmatpush.msrb.mxu2 %v3321_v43  ;;  %2138 = vmatpush.msrb.mxu3 %v3322_v44  ;;  %v3356_v43 = vld [vmem:[%s8338_s1 + $0x810] sm:$0xff]  ;;  %v3357_v44 = vld [vmem:[%s8338_s1 + $0x2c0] sm:$0xff] }
 0x611   :  { %2082 = vmatpush.msra.mxu0 %v3323_v13  ;;  %2099 = vmatpush.msra.mxu1 %v3324_v45  ;;  %v3358_v13 = vld [vmem:[%s8338_s1 + $0x818] sm:$0xff]  ;;  %v3359_v45 = vld [vmem:[%s8338_s1 + $0x270] sm:$0xff] }
 0x612   :  { %2122 = vmatpush.msrb.mxu2 %v3325_v46  ;;  %2139 = vmatpush.msrb.mxu3 %v3326_v32  ;;  %v3360_v46 = vld [vmem:[%s8338_s1 + $0x7c8] sm:$0xff]  ;;  %v3361_v32 = vld [vmem:[%s8338_s1 + $0x278] sm:$0xff] }
 0x613   :  { %2083 = vmatpush.msra.mxu0 %v3327_v47  ;;  %2100 = vmatpush.msra.mxu1 %v3328_v50  ;;  %v3362_v47 = vld [vmem:[%s8338_s1 + $0x7d0] sm:$0xff]  ;;  %v3363_v50 = vld [vmem:[%s8338_s1 + $0x228] sm:$0xff] }
 0x614   :  { %2123 = vmatpush.msrb.mxu2 %v3329_v54  ;;  %2140 = vmatpush.msrb.mxu3 %v3330_v6  ;;  %v3364_v54 = vld [vmem:[%s8338_s1 + $0x780] sm:$0xff]  ;;  %v3365_v6 = vld [vmem:[%s8338_s1 + $0x230] sm:$0xff] }
 0x615   :  { %2084 = vmatmul.f32.vlgmr.msra.gmra.mxu0 %v6539_v16  ;;  %2124 = vmatmul.f32.vlgmr.msrb.gmra.mxu2 %v6539_v16 }
 0x616   :  { %2148 = vmatpush.msrb.mxu0 %v3331_v8  ;;  %2188 = vmatpush.msra.mxu2 %v3332_v55  ;;  %v3366_v8 = vld [vmem:[%s8338_s1 + $0x788] sm:$0xff]  ;;  %v3367_v55 = vld [vmem:[%s8338_s1 + $0x1e0] sm:$0xff] }
 0x617   :  { %2101 = vmatpush.msra.mxu1 %v3333_v59  ;;  %2141 = vmatpush.msrb.mxu3 %v3334_v63  ;;  %v3368_v59 = vld [vmem:[%s8338_s1 + $0x738] sm:$0xff]  ;;  %v3369_v63 = vld [vmem:[%s8338_s1 + $0x1e8] sm:$0xff] }
 0x618   :  { %2149 = vmatpush.msrb.mxu0 %v3335_v0  ;;  %2189 = vmatpush.msra.mxu2 %v3336_v22  ;;  %v3370_v0 = vld [vmem:[%s8338_s1 + $0x740] sm:$0xff]  ;;  %v3371_v22 = vld [vmem:[%s8338_s1 + $0x198] sm:$0xff] }
 0x619   :  { %2102 = vmatpush.msra.mxu1 %v3337_v39  ;;  %2142 = vmatpush.msrb.mxu3 %v3338_v4  ;;  %v3372_v39 = vld [vmem:[%s8338_s1 + $0x6f0] sm:$0xff]  ;;  %v3373_v4 = vld [vmem:[%s8338_s1 + $0x1a0] sm:$0xff] }
 0x61a   :  { %2150 = vmatpush.msrb.mxu0 %v3339_v5  ;;  %2190 = vmatpush.msra.mxu2 %v3340_v17  ;;  %v3374_v5 = vld [vmem:[%s8338_s1 + $0x6f8] sm:$0xff]  ;;  %v3375_v17 = vld [vmem:[%s8338_s1 + $0x150] sm:$0xff] }
 0x61b   :  { %2103 = vmatpush.msra.mxu1 %v3341_v25  ;;  %2143 = vmatpush.msrb.mxu3 %v3342_v26  ;;  %v3376_v25 = vld [vmem:[%s8338_s1 + $0x6a8] sm:$0xff]  ;;  %v3377_v26 = vld [vmem:[%s8338_s1 + $0x158] sm:$0xff] }
 0x61c   :  { %2104 = vmatmul.f32.vlgmr.msra.gmra.mxu1 %v6558_v2  ;;  %2144 = vmatmul.f32.vlgmr.msrb.gmra.mxu3 %v6558_v2 }
 0x61d   :  { %2151 = vmatpush.msrb.mxu0 %v3343_v28  ;;  %2168 = vmatpush.msrb.mxu1 %v3344_v29  ;;  %v3378_v28 = vld [vmem:[%s8338_s1 + $0x6b0] sm:$0xff]  ;;  %v3379_v29 = vld [vmem:[%s8338_s1 + $0x108] sm:$0xff] }
 0x61e   :  { %2191 = vmatpush.msra.mxu2 %v3345_v30  ;;  %2208 = vmatpush.msra.mxu3 %v3346_v31  ;;  %v3380_v30 = vld [vmem:[%s8338_s1 + $0x660] sm:$0xff]  ;;  %v3381_v31 = vld [vmem:[%s8338_s1 + $0x110] sm:$0xff] }
 0x61f   :  { %2152 = vmatpush.msrb.mxu0 %v3347_v33  ;;  %2169 = vmatpush.msrb.mxu1 %v3348_v3  ;;  %v3382_v33 = vld [vmem:[%s8338_s1 + $0x668] sm:$0xff]  ;;  %v3383_v3 = vld [vmem:[%s8338_s1 + $0xc0] sm:$0xff] }
 0x620   :  { %2192 = vmatpush.msra.mxu2 %v3349_v15  ;;  %2209 = vmatpush.msra.mxu3 %v3350_v62  ;;  %v3384_v15 = vld [vmem:[%s8338_s1 + $0x618] sm:$0xff]  ;;  %v3385_v62 = vld [vmem:[%s8338_s1 + $0xc8] sm:$0xff] }
 0x621   :  { %2153 = vmatpush.msrb.mxu0 %v3351_v40  ;;  %2170 = vmatpush.msrb.mxu1 %v3352_v51  ;;  %v3386_v40 = vld [vmem:[%s8338_s1 + $0x620] sm:$0xff]  ;;  %v3387_v51 = vld [vmem:[%s8338_s1 + $0x78] sm:$0xff] }
 0x622   :  { %2193 = vmatpush.msra.mxu2 %v3353_v58  ;;  %2210 = vmatpush.msra.mxu3 %v3354_v60  ;;  %v3388_v58 = vld [vmem:[%s8338_s1 + $0x5d0] sm:$0xff]  ;;  %v3389_v60 = vld [vmem:[%s8338_s1 + $0x80] sm:$0xff] }
 0x623   :  { %2154 = vmatpush.msrb.mxu0 %v3355_v20  ;;  %2171 = vmatpush.msrb.mxu1 %v3356_v43  ;;  %v3390_v20 = vld [vmem:[%s8338_s1 + $0x5d8] sm:$0xff]  ;;  %v3391_v43 = vld [vmem:[%s8338_s1 + $0x30] sm:$0xff] }
 0x624   :  { %2194 = vmatpush.msra.mxu2 %v3357_v44  ;;  %2211 = vmatpush.msra.mxu3 %v3358_v13  ;;  %v3392_v44 = vld [vmem:[%s8338_s1 + $0x588] sm:$0xff]  ;;  %v3393_v13 = vld [vmem:[%s8338_s1 + $0x38] sm:$0xff] }
 0x625   :  { %2155 = vmatpush.msrb.mxu0 %v3359_v45  ;;  %2172 = vmatpush.msrb.mxu1 %v3360_v46  ;;  %v3394_v45 = vld [vmem:[%s8338_s1 + $0x590] sm:$0xff]  ;;  %v3395_v46 = vld [vmem:[%s8338_s1 + $0x478] sm:$0xff] }
 0x626   :  { %2195 = vmatpush.msra.mxu2 %v3361_v32  ;;  %2212 = vmatpush.msra.mxu3 %v3362_v47  ;;  %v3396_v32 = vld [vmem:[%s8338_s1 + $0x540] sm:$0xff]  ;;  %v3397_v47 = vld [vmem:[%s8338_s1 + $0x548] sm:$0xff] }
 0x627   :  { %2156 = vmatpush.msrb.mxu0 %v3363_v50  ;;  %2173 = vmatpush.msrb.mxu1 %v3364_v54  ;;  %v3398_v50 = vld [vmem:[%s8338_s1 + $0x430] sm:$0xff]  ;;  %v3399_v54 = vld [vmem:[%s8338_s1 + $0x4f8] sm:$0xff] }
 0x628   :  { %2196 = vmatpush.msra.mxu2 %v3365_v6  ;;  %2213 = vmatpush.msra.mxu3 %v3366_v8  ;;  %v3400_v6 = vld [vmem:[%s8338_s1 + $0x500] sm:$0xff]  ;;  %v3401_v8 = vld [vmem:[%s8338_s1 + $0x3e8] sm:$0xff] }
 0x629   :  { %2157 = vmatpush.msrb.mxu0 %v3367_v55  ;;  %2174 = vmatpush.msrb.mxu1 %v3368_v59  ;;  %v3402_v55 = vld [vmem:[%s8338_s1 + $0x4b0] sm:$0xff]  ;;  %v3403_v59 = vld [vmem:[%s8338_s1 + $0x4b8] sm:$0xff] }
 0x62a   :  { %2197 = vmatpush.msra.mxu2 %v3369_v63  ;;  %2214 = vmatpush.msra.mxu3 %v3370_v0  ;;  %v3404_v63 = vld [vmem:[%s8338_s1 + $0x3a0] sm:$0xff]  ;;  %v3405_v0 = vld [vmem:[%s8338_s1 + $0x8f8] sm:$0xff] }
 0x62b   :  { %2158 = vmatpush.msrb.mxu0 %v3371_v22  ;;  %2175 = vmatpush.msrb.mxu1 %v3372_v39  ;;  %v3406_v22 = vld [vmem:[%s8338_s1 + $0x358] sm:$0xff]  ;;  %v3407_v39 = vld [vmem:[%s8338_s1 + $0x8b0] sm:$0xff] }
 0x62c   :  { %2198 = vmatpush.msra.mxu2 %v3373_v4  ;;  %2215 = vmatpush.msra.mxu3 %v3374_v5  ;;  %v3408_v4 = vld [vmem:[%s8338_s1 + $0x310] sm:$0xff]  ;;  %v3409_v5 = vld [vmem:[%s8338_s1 + $0x868] sm:$0xff] }
 0x62d   :  { %2159 = vmatpush.msrb.mxu0 %v3375_v17  ;;  %2176 = vmatpush.msrb.mxu1 %v3376_v25  ;;  %v3410_v17 = vld [vmem:[%s8338_s1 + $0x2c8] sm:$0xff]  ;;  %v3411_v25 = vld [vmem:[%s8338_s1 + $0x820] sm:$0xff] }
 0x62e   :  { %2199 = vmatpush.msra.mxu2 %v3377_v26  ;;  %2216 = vmatpush.msra.mxu3 %v3378_v28  ;;  %v3412_v26 = vld [vmem:[%s8338_s1 + $0x280] sm:$0xff]  ;;  %v3413_v28 = vld [vmem:[%s8338_s1 + $0x7d8] sm:$0xff] }
 0x62f   :  { %2160 = vmatpush.msrb.mxu0 %v3379_v29  ;;  %2177 = vmatpush.msrb.mxu1 %v3380_v30  ;;  %v3414_v29 = vld [vmem:[%s8338_s1 + $0x238] sm:$0xff]  ;;  %v3415_v30 = vld [vmem:[%s8338_s1 + $0x790] sm:$0xff] }
 0x630   :  { %2200 = vmatpush.msra.mxu2 %v3381_v31  ;;  %2217 = vmatpush.msra.mxu3 %v3382_v33  ;;  %v3416_v31 = vld [vmem:[%s8338_s1 + $0x1f0] sm:$0xff]  ;;  %v3417_v33 = vld [vmem:[%s8338_s1 + $0x748] sm:$0xff] }
 0x631   :  { %2161 = vmatpush.msrb.mxu0 %v3383_v3  ;;  %2178 = vmatpush.msrb.mxu1 %v3384_v15  ;;  %v3418_v3 = vld [vmem:[%s8338_s1 + $0x1a8] sm:$0xff]  ;;  %v3419_v15 = vld [vmem:[%s8338_s1 + $0x700] sm:$0xff] }
 0x632   :  { %2201 = vmatpush.msra.mxu2 %v3385_v62  ;;  %2218 = vmatpush.msra.mxu3 %v3386_v40  ;;  %v3420_v62 = vld [vmem:[%s8338_s1 + $0x160] sm:$0xff]  ;;  %v3421_v40 = vld [vmem:[%s8338_s1 + $0x6b8] sm:$0xff] }
 0x633   :  { %2162 = vmatpush.msrb.mxu0 %v3387_v51  ;;  %2179 = vmatpush.msrb.mxu1 %v3388_v58  ;;  %v3422_v51 = vld [vmem:[%s8338_s1 + $0x118] sm:$0xff]  ;;  %v3423_v58 = vld [vmem:[%s8338_s1 + $0x670] sm:$0xff] }
 0x634   :  { %2202 = vmatpush.msra.mxu2 %v3389_v60  ;;  %2219 = vmatpush.msra.mxu3 %v3390_v20  ;;  %v3424_v60 = vld [vmem:[%s8338_s1 + $0xd0] sm:$0xff]  ;;  %v3425_v20 = vld [vmem:[%s8338_s1 + $0x628] sm:$0xff] }
 0x635   :  { %2163 = vmatpush.msrb.mxu0 %v3391_v43  ;;  %2180 = vmatpush.msrb.mxu1 %v3392_v44  ;;  %v3426_v43 = vld [vmem:[%s8338_s1 + $0x88] sm:$0xff]  ;;  %v3427_v44 = vld [vmem:[%s8338_s1 + $0x5e0] sm:$0xff] }
 0x636   :  { %2203 = vmatpush.msra.mxu2 %v3393_v13  ;;  %2220 = vmatpush.msra.mxu3 %v3394_v45  ;;  %v3428_v13 = vld [vmem:[%s8338_s1 + $0x40] sm:$0xff]  ;;  %v3429_v45 = vld [vmem:[%s8338_s1 + $0x598] sm:$0xff] }
 0x637   :  { %2164 = vmatmul.f32.vlgmr.msrb.gmra.mxu0 %v6539_v16  ;;  %2204 = vmatmul.f32.vlgmr.msra.gmra.mxu2 %v6539_v16 }
 0x638   :  { %2228 = vmatpush.msra.mxu0 %v3395_v46  ;;  %2181 = vmatpush.msrb.mxu1 %v3396_v32  ;;  %v3430_v46 = vld [vmem:[%s8338_s1 + $0x550] sm:$0xff]  ;;  %v3431_v32 = vld [vmem:[%s8338_s1 + $0x508] sm:$0xff] }
 0x639   :  { %2221 = vmatpush.msra.mxu3 %v3397_v47  ;;  %v3432_v47 = vld [vmem:[%s8338_s1 + $0x4c0] sm:$0xff] }
 0x63a   :  { %2229 = vmatpush.msra.mxu0 %v3398_v50  ;;  %2182 = vmatpush.msrb.mxu1 %v3399_v54 }
 0x63b   :  { %2222 = vmatpush.msra.mxu3 %v3400_v6 }
 0x63c   :  { %2230 = vmatpush.msra.mxu0 %v3401_v8  ;;  %2183 = vmatpush.msrb.mxu1 %v3402_v55 }
 0x63d   :  { %2223 = vmatpush.msra.mxu3 %v3403_v59  ;;  %2184 = vmatmul.f32.vlgmr.msrb.gmra.mxu1 %v6558_v2 }
 0x63e   :  { %2224 = vmatmul.f32.vlgmr.msra.gmra.mxu3 %v6558_v2  ;;  %2231 = vmatpush.msra.mxu0 %v3404_v63 }
 0x63f   :  { %2248 = vmatpush.msra.mxu1 %v3405_v0 }
 0x640   :  { %2232 = vmatpush.msra.mxu0 %v3406_v22 }
 0x641   :  { %2249 = vmatpush.msra.mxu1 %v3407_v39 }
 0x642   :  { %2233 = vmatpush.msra.mxu0 %v3408_v4 }
 0x643   :  { %2250 = vmatpush.msra.mxu1 %v3409_v5 }
 0x644   :  { %2234 = vmatpush.msra.mxu0 %v3410_v17  ;;  %v7053_v17 = vld [vmem:[%s8341_s6] sm:$0xff] }
 0x645   :  { %2251 = vmatpush.msra.mxu1 %v3411_v25 }
 0x646   :  { %2235 = vmatpush.msra.mxu0 %v3412_v26  ;;  %v3434_v26 = vld [vmem:[%s8345_s2 + $0x2d0] sm:$0xff] }
 0x647   :  { %2252 = vmatpush.msra.mxu1 %v3413_v28  ;;  %v3436_v28 = vld [vmem:[%s8345_s2 + $0x270] sm:$0xff] }
 0x648   :  { %2236 = vmatpush.msra.mxu0 %v3414_v29  ;;  %v3437_v29 = vld [vmem:[%s8345_s2 + $0x5d0] sm:$0xff] }
 0x649   :  { %2253 = vmatpush.msra.mxu1 %v3415_v30  ;;  %v3440_v30 = vld [vmem:[%s8345_s2 + $0x5a0] sm:$0xff] }
 0x64a   :  { %2237 = vmatpush.msra.mxu0 %v3416_v31  ;;  %v3441_v31 = vld [vmem:[%s8345_s2 + $0x210] sm:$0xff] }
 0x64b   :  { %2254 = vmatpush.msra.mxu1 %v3417_v33  ;;  %v3442_v33 = vld [vmem:[%s8345_s2 + $0x570] sm:$0xff] }
 0x64c   :  { %2238 = vmatpush.msra.mxu0 %v3418_v3  ;;  %v3443_v3 = vld [vmem:[%s8345_s2 + $0x1e0] sm:$0xff] }
 0x64d   :  { %2255 = vmatpush.msra.mxu1 %v3419_v15  ;;  %v3444_v15 = vld [vmem:[%s8345_s2 + $0x540] sm:$0xff] }
 0x64e   :  { %2239 = vmatpush.msra.mxu0 %v3420_v62  ;;  %v3445_v62 = vld [vmem:[%s8345_s2 + $0x1b0] sm:$0xff] }
 0x64f   :  { %2256 = vmatpush.msra.mxu1 %v3421_v40  ;;  %v3446_v40 = vld [vmem:[%s8345_s2 + $0x510] sm:$0xff] }
 0x650   :  { %2240 = vmatpush.msra.mxu0 %v3422_v51  ;;  %v3447_v51 = vld [vmem:[%s8345_s2 + $0x180] sm:$0xff] }
 0x651   :  { %2257 = vmatpush.msra.mxu1 %v3423_v58  ;;  %v3448_v58 = vld [vmem:[%s8345_s2 + $0x4e0] sm:$0xff] }
 0x652   :  { %2241 = vmatpush.msra.mxu0 %v3424_v60  ;;  %v3449_v60 = vld [vmem:[%s8345_s2 + $0x150] sm:$0xff] }
 0x653   :  { %2258 = vmatpush.msra.mxu1 %v3425_v20  ;;  %v3450_v20 = vld [vmem:[%s8345_s2 + $0x4b0] sm:$0xff] }
 0x654   :  { %2242 = vmatpush.msra.mxu0 %v3426_v43  ;;  %v3451_v43 = vld [vmem:[%s8345_s2 + $0x120] sm:$0xff] }
 0x655   :  { %2259 = vmatpush.msra.mxu1 %v3427_v44 }
 0x656   :  { %2243 = vmatpush.msra.mxu0 %v3428_v13 }
 0x657   :  { %2260 = vmatpush.msra.mxu1 %v3429_v45  ;;  %2244 = vmatmul.f32.vlgmr.msra.gmra.mxu0 %v6539_v16 }
 0x659   :  { %2261 = vmatpush.msra.mxu1 %v3430_v46  ;;  %v3452_v46 = vld [vmem:[%s8345_s2 + $0x480] sm:$0xff] }
 0x65b   :  { %2262 = vmatpush.msra.mxu1 %v3431_v32  ;;  %v3453_v32 = vld [vmem:[%s8345_s2 + $0xf0] sm:$0xff] }
 0x65d   :  { %2263 = vmatpush.msra.mxu1 %v3432_v47  ;;  %v3454_v47 = vld [vmem:[%s8345_s2 + $0x450] sm:$0xff] }
 0x65e   :  { %2264 = vmatmul.f32.vlgmr.msra.gmra.mxu1 %v6558_v2 }
 0x66f   :  { %v1925_v50 = vpop.f32.mrf.mxu0 }
 0x675   :  { %v1945_v54 = vpop.f32.mrf.mxu1  ;;  %v1965_v8 = vpop.f32.mrf.mxu2 }
 0x676   :  { %v7044_v6 = vadd.f32 %v1945_v54, %v1925_v50  ;;  %v3455_v50 = vld [vmem:[%s8345_s2 + $0xc0] sm:$0xff] }
 0x677   :  { %v3456_v54 = vld [vmem:[%s8345_s2 + $0x420] sm:$0xff] }
 0x678   :  { %v2005_v63 = vpop.f32.mrf.mxu0 }
 0x67b   :  { %v1985_v55 = vpop.f32.mrf.mxu3 }
 0x67c   :  { %v7046_v59 = vadd.f32 %v1985_v55, %v1965_v8  ;;  %v3457_v8 = vld [vmem:[%s8345_s2 + $0x90] sm:$0xff] }
 0x67e   :  { %v2045_v4 = vpop.f32.mrf.mxu2 }
 0x67f   :  { %v2025_v0 = vpop.f32.mrf.mxu1 }
 0x680   :  { %v2026_v22 = vadd.f32 %v2025_v0, %v2005_v63 }
 0x682   :  { %v2282_v39 = vadd.f32 %v2026_v22, %v1100_v9  ;;  %v3435_v9 = vld [vmem:[%s8345_s2 + $0x2a0] sm:$0xff]  ;;  %v3458_v22 = vld [vmem:[%s8345_s2 + $0x3f0] sm:$0xff] }
 0x684   :  { %2447 = vmatpush.msrb.mxu0 %v2282_v39  ;;  %v3459_v39 = vld [vmem:[%s8345_s2 + $0x60] sm:$0xff] }
 0x685   :  { %v2065_v5 = vpop.f32.mrf.mxu3  ;;  %3074 = vmatmul.msk.f32.vlgmr.msrb.gmra.mxu0 %vm1108_vm0, %v7053_v17 }
 0x686   :  { %v2066_v25 = vadd.f32 %v2065_v5, %v2045_v4  ;;  %2522 = vmatpush.msra.mxu0 %v3434_v26  ;;  %v3460_v4 = vld [vmem:[%s8345_s2 + $0x3c0] sm:$0xff]  ;;  %v3461_v5 = vld [vmem:[%s8345_s2 + $0x30] sm:$0xff] }
 0x687   :  { %v3463_v26 = vld [vmem:[%s8345_s2] sm:$0xff] }
 0x688   :  { %v2283_v7 = vadd.f32 %v2066_v25, %v1101_v12  ;;  %2523 = vmatpush.msra.mxu0 %v3435_v9  ;;  %v7079_v12 = vld [vmem:[%s8341_s6 + $0x8] sm:$0xff]  ;;  %v3462_v25 = vld [vmem:[%s8345_s2 + $0x390] sm:$0xff]  ;;  %v3465_v9 = vld [vmem:[%s8345_s2 + $0x360] sm:$0xff] }
 0x68a   :  { %2470 = vmatpush.msrb.mxu1 %v2283_v7  ;;  %2524 = vmatpush.msra.mxu0 %v3436_v28  ;;  %v3464_v7 = vld [vmem:[%s8345_s2 + $0x2e0] sm:$0xff]  ;;  %v3466_v28 = vld [vmem:[%s8345_s2 + $0x2b0] sm:$0xff] }
 0x68b   :  { %3076 = vmatmul.msk.f32.vlgmr.msrb.gmra.mxu1 %vm1108_vm0, %v7053_v17 }
 0x68c   :  { %2542 = vmatpush.msra.mxu1 %v3437_v29  ;;  %2525 = vmatpush.msra.mxu0 %v3438_v10  ;;  %v3467_v29 = vld [vmem:[%s8345_s2 + $0x330] sm:$0xff]  ;;  %v3468_v10 = vld [vmem:[%s8345_s2 + $0x280] sm:$0xff] }
 0x68d   :  { %3075 = vmatmul.msk.f32.gmra.mxu0 %vm1108_vm0, %v7079_v12 }
 0x68e   :  { %2543 = vmatpush.msra.mxu1 %v3440_v30  ;;  %2526 = vmatpush.msra.mxu0 %v3441_v31  ;;  %v3469_v30 = vld [vmem:[%s8345_s2 + $0x300] sm:$0xff] }
 0x68f   :  { %v3470_v31 = vld [vmem:[%s8345_s2 + $0x5e0] sm:$0xff] }
 0x690   :  { %2544 = vmatpush.msra.mxu1 %v3442_v33  ;;  %2527 = vmatpush.msra.mxu0 %v3443_v3  ;;  %v3471_v33 = vld [vmem:[%s8345_s2 + $0x250] sm:$0xff] }
 0x691   :  { %v3472_v3 = vld [vmem:[%s8345_s2 + $0x5b0] sm:$0xff] }
 0x692   :  { %2545 = vmatpush.msra.mxu1 %v3444_v15  ;;  %2528 = vmatpush.msra.mxu0 %v3445_v62  ;;  %v2085_v44 = vpop.f32.mrf.mxu0  ;;  %v3473_v15 = vld [vmem:[%s8345_s2 + $0x220] sm:$0xff] }
 0x693   :  { %3077 = vmatmul.msk.f32.gmra.mxu1 %vm1108_vm0, %v7079_v12  ;;  %v3474_v62 = vld [vmem:[%s8345_s2 + $0x580] sm:$0xff] }
 0x694   :  { %2546 = vmatpush.msra.mxu1 %v3446_v40  ;;  %2529 = vmatpush.msra.mxu0 %v3447_v51  ;;  %v3475_v40 = vld [vmem:[%s8345_s2 + $0x1f0] sm:$0xff] }
 0x695   :  { %v3476_v51 = vld [vmem:[%s8345_s2 + $0x550] sm:$0xff] }
 0x696   :  { %2547 = vmatpush.msra.mxu1 %v3448_v58  ;;  %2530 = vmatpush.msra.mxu0 %v3449_v60  ;;  %v3477_v58 = vld [vmem:[%s8345_s2 + $0x1c0] sm:$0xff] }
 0x697   :  { %v3478_v60 = vld [vmem:[%s8345_s2 + $0x520] sm:$0xff] }
 0x698   :  { %2548 = vmatpush.msra.mxu1 %v3450_v20  ;;  %2531 = vmatpush.msra.mxu0 %v3451_v43  ;;  %v2125_v55 = vpop.f32.mrf.mxu2  ;;  %v3479_v20 = vld [vmem:[%s8345_s2 + $0x190] sm:$0xff] }
 0x699   :  { %v2105_v13 = vpop.f32.mrf.mxu1  ;;  %v3480_v43 = vld [vmem:[%s8345_s2 + $0x4f0] sm:$0xff] }
 0x69a   :  { %v7121_v45 = vadd.f32 %v2105_v13, %v2085_v44  ;;  %2549 = vmatpush.msra.mxu1 %v3452_v46  ;;  %2532 = vmatpush.msra.mxu0 %v3453_v32  ;;  %v3481_v44 = vld [vmem:[%s8345_s2 + $0x160] sm:$0xff]  ;;  %v3483_v46 = vld [vmem:[%s8345_s2 + $0x130] sm:$0xff] }
 0x69b   :  { %v3482_v13 = vld [vmem:[%s8345_s2 + $0x4c0] sm:$0xff]  ;;  %v3484_v32 = vld [vmem:[%s8345_s2 + $0x490] sm:$0xff] }
 0x69c   :  { %2550 = vmatpush.msra.mxu1 %v3454_v47  ;;  %2533 = vmatpush.msra.mxu0 %v3455_v50  ;;  %v3485_v47 = vld [vmem:[%s8345_s2 + $0x100] sm:$0xff] }
 0x69e   :  { %2551 = vmatpush.msra.mxu1 %v3456_v54  ;;  %2534 = vmatpush.msra.mxu0 %v3457_v8 }
 0x69f   :  { %v2145_v63 = vpop.f32.mrf.mxu3 }
 0x6a0   :  { %v7141_v0 = vadd.f32 %v2145_v63, %v2125_v55  ;;  %2552 = vmatpush.msra.mxu1 %v3458_v22  ;;  %2535 = vmatpush.msra.mxu0 %v3459_v39  ;;  %v3486_v55 = vld [vmem:[%s8345_s2 + $0x460] sm:$0xff]  ;;  %v3487_v63 = vld [vmem:[%s8345_s2 + $0xd0] sm:$0xff] }
 0x6a1   :  { %v3488_v22 = vld [vmem:[%s8345_s2 + $0x430] sm:$0xff]  ;;  %v3489_v39 = vld [vmem:[%s8345_s2 + $0xa0] sm:$0xff] }
 0x6a2   :  { %2553 = vmatpush.msra.mxu1 %v3460_v4  ;;  %2536 = vmatpush.msra.mxu0 %v3461_v5  ;;  %v3490_v4 = vld [vmem:[%s8345_s2 + $0x400] sm:$0xff]  ;;  %v3491_v5 = vld [vmem:[%s8345_s2 + $0x70] sm:$0xff] }
 0x6a4   :  { %2554 = vmatpush.msra.mxu1 %v3462_v25  ;;  %2537 = vmatpush.msra.mxu0 %v3463_v26  ;;  %v3492_v25 = vld [vmem:[%s8345_s2 + $0x3d0] sm:$0xff]  ;;  %v3493_v26 = vld [vmem:[%s8345_s2 + $0x40] sm:$0xff] }
 0x6a6   :  { %2602 = vmatpush.msrb.mxu0 %v3464_v7  ;;  %2555 = vmatpush.msra.mxu1 %v3465_v9  ;;  %v3494_v7 = vld [vmem:[%s8345_s2 + $0x3a0] sm:$0xff]  ;;  %v3495_v9 = vld [vmem:[%s8345_s2 + $0x10] sm:$0xff] }
 0x6a8   :  { %2603 = vmatpush.msrb.mxu0 %v3466_v28  ;;  %2556 = vmatpush.msra.mxu1 %v3467_v29  ;;  %v3496_v28 = vld [vmem:[%s8345_s2 + $0x370] sm:$0xff]  ;;  %v3497_v29 = vld [vmem:[%s8345_s2 + $0x340] sm:$0xff] }
 0x6aa   :  { %2604 = vmatpush.msrb.mxu0 %v3468_v10  ;;  %2557 = vmatpush.msra.mxu1 %v3469_v30  ;;  %v3498_v10 = vld [vmem:[%s8345_s2 + $0x310] sm:$0xff] }
 0x6ac   :  { %2622 = vmatpush.msrb.mxu1 %v3470_v31  ;;  %2605 = vmatpush.msrb.mxu0 %v3471_v33 }
 0x6ae   :  { %2623 = vmatpush.msrb.mxu1 %v3472_v3  ;;  %2606 = vmatpush.msrb.mxu0 %v3473_v15  ;;  %v3499_v3 = vld [vmem:[%s8342_s5] sm:$0xff]  ;;  %v3500_v15 = vld [vmem:[%s8342_s5 + $0x8] sm:$0xff] }
 0x6b0   :  { %2624 = vmatpush.msrb.mxu1 %v3474_v62  ;;  %2607 = vmatpush.msrb.mxu0 %v3475_v40 }
 0x6b2   :  { %2625 = vmatpush.msrb.mxu1 %v3476_v51  ;;  %2608 = vmatpush.msrb.mxu0 %v3477_v58 }
 0x6b4   :  { %2626 = vmatpush.msrb.mxu1 %v3478_v60  ;;  %2609 = vmatpush.msrb.mxu0 %v3479_v20  ;;  %v2165_v50 = vpop.f32.mrf.mxu0  ;;  %v3503_v60 = vld [vmem:[%s8343_s10] ss:$0 sm:$0xff] }
 0x6b6   :  { %2627 = vmatpush.msrb.mxu1 %v3480_v43  ;;  %2610 = vmatpush.msrb.mxu0 %v3481_v44 }
 0x6b8   :  { %2628 = vmatpush.msrb.mxu1 %v3482_v13  ;;  %2611 = vmatpush.msrb.mxu0 %v3483_v46 }
 0x6ba   :  { %2629 = vmatpush.msrb.mxu1 %v3484_v32  ;;  %2612 = vmatpush.msrb.mxu0 %v3485_v47  ;;  %v2185_v54 = vpop.f32.mrf.mxu1  ;;  %v7293_v40 = vpop.f32.mrf.mxu2 }
 0x6bb   :  { %v7227_v8 = vadd.f32 %v2185_v54, %v2165_v50 }
 0x6bc   :  { %2630 = vmatpush.msrb.mxu1 %v3486_v55  ;;  %2613 = vmatpush.msrb.mxu0 %v3487_v63 }
 0x6be   :  { %2631 = vmatpush.msrb.mxu1 %v3488_v22  ;;  %2614 = vmatpush.msrb.mxu0 %v3489_v39 }
 0x6c0   :  { %2632 = vmatpush.msrb.mxu1 %v3490_v4  ;;  %2615 = vmatpush.msrb.mxu0 %v3491_v5 }
 0x6c2   :  { %2633 = vmatpush.msrb.mxu1 %v3492_v25  ;;  %2616 = vmatpush.msrb.mxu0 %v3493_v26 }
 0x6c4   :  { %2634 = vmatpush.msrb.mxu1 %v3494_v7  ;;  %2617 = vmatpush.msrb.mxu0 %v3495_v9 }
 0x6c6   :  { %2635 = vmatpush.msrb.mxu1 %v3496_v28 }
 0x6c8   :  { %2636 = vmatpush.msrb.mxu1 %v3497_v29 }
 0x6ca   :  { %2637 = vmatpush.msrb.mxu1 %v3498_v10 }
 0x6d4   :  { %v2245_v30 = vpop.f32.mrf.mxu0 }
 0x6db   :  { %v2265_v31 = vpop.f32.mrf.mxu1 }
 0x6dc   :  { %v2266_v33 = vadd.f32 %v2265_v31, %v2245_v30 }
 0x6de   :  { %2285 = vrot.lane.b32.xlu0 %v2266_v33, %s3825_s29  ;;  %2326 = vmatpush.msrb.mxu3 %v2266_v33 }
 0x6df   :  { %3068 = vmatmul.msk.f32.vlgmr.msrb.gmra.mxu3 %vm1108_vm0, %v3499_v3 }
 0x6e0   :  { %2389 = vmatpush.msra.mxu3 %v3086_v37  ;;  %v3501_v37 = vld [vmem:[%s8344_s9 + $0x8] sm:$0xff] }
 0x6e2   :  { %2390 = vmatpush.msra.mxu3 %v3087_v36  ;;  %v7291_v36 = vpop.f32.mrf.mxu3 }
 0x6e7   :  { %3069 = vmatmul.msk.f32.gmra.mxu3 %vm1108_vm0, %v3500_v15 }
 0x750   :  { %v2286_v62 = vpop.permute.xlu0 %2285 }
 0x751   :  { %2303 = vmatpush.msrb.mxu2 %v2286_v62 }
 0x752   :  { %3066 = vmatmul.msk.f32.vlgmr.msrb.gmra.mxu2 %vm1108_vm0, %v7053_v17 }
 0x753   :  { %2358 = vmatpush.msra.mxu2 %v3501_v37  ;;  %v2449_v37 = vpop.f32.mrf.mxu0 }
 0x755   :  { %2359 = vmatpush.msra.mxu2 %v3502_v34  ;;  %v2472_v34 = vpop.f32.mrf.mxu1 }
 0x75a   :  { %3067 = vmatmul.msk.f32.gmra.mxu2 %vm1108_vm0, %v7079_v12 }
 0x762   :  { %v2328_v51 = vpop.f32.mrf.mxu3 }
 0x76a   :  { %v2331_v44 = vpop.f32.mrf.mxu3 }
 0x7d5   :  { %v2305_v58 = vpop.f32.mrf.mxu2 }
 0x7d6   :  { %v2329_v17 = vadd.f32 %v2328_v51, %v2305_v58 }
 0x7d8   :  { %v2334_v20 = vadd.f32 %v3503_v60, %v2329_v17 }
 0x7da   :  { %v2336_v43 = vmax.f32 %v2334_v20, 0.0 }
 0x7dc   :  { %3070 = vmatmul.msk.f32.vlgmr.msra.gmra.mxu2 %vm1177_vm1, %v2336_v43 }
 0x7dd   :  { %v2308_v13 = vpop.f32.mrf.mxu2 }
 0x7de   :  { %v2332_v46 = vadd.f32 %v2331_v44, %v2308_v13 }
 0x7e0   :  { %v2335_v32 = vadd.f32 %v3503_v60, %v2332_v46  ;;  %v2475_v46 = vpop.f32.mrf.mxu1 }
 0x7e2   :  { %v2337_v12 = vmax.f32 %v2335_v32, 0.0 }
 0x7e4   :  { %3071 = vmatmul.msk.f32.gmra.mxu2 %vm1177_vm1, %v2337_v12 }
 0x85f   :  { %v2361_v47 = vpop.f32.mrf.mxu2 }
 0x860   :  { %v2362_v50 = vadd.f32 %v2361_v47, %v4859_v38 }
 0x862   :  { %v2367_v54 = vmax.f32 %v2362_v50, 0.0 }
 0x864   :  { %3072 = vmatmul.msk.f32.vlgmr.msra.gmra.mxu3 %vm1177_vm1, %v2367_v54 }
 0x867   :  { %v2364_v55 = vpop.f32.mrf.mxu2 }
 0x868   :  { %v2365_v63 = vadd.f32 %v2364_v55, %v4859_v38  ;;  %v3504_v55 = vld [vmem:[%s8346_s7] sm:$0xff] }
 0x86a   :  { %v2368_v22 = vmax.f32 %v2365_v63, 0.0  ;;  %v3505_v63 = vld [vmem:[%s8345_s2 + $0x2d8] sm:$0xff] }
 0x86c   :  { %3073 = vmatmul.msk.f32.gmra.mxu3 %vm1177_vm1, %v2368_v22  ;;  %v3506_v22 = vld [vmem:[%s8345_s2 + $0x5d8] sm:$0xff] }
 0x8e7   :  { %v2392_v39 = vpop.f32.mrf.mxu3 }
 0x8e8   :  { %v2393_v4 = vadd.f32 %v2392_v39, %v4865_v48  ;;  %v3507_v39 = vld [vmem:[%s8345_s2 + $0x2a8] sm:$0xff] }
 0x8ea   :  { %2400 = vperm.xlu2 %3088, %v2393_v4   ;;  %v3508_v4 = vld [vmem:[%s8345_s2 + $0x5a8] sm:$0xff] }
 0x8ef   :  { %v2395_v5 = vpop.f32.mrf.mxu3 }
 0x8f0   :  { %v2396_v25 = vadd.f32 %v2395_v5, %v4865_v48  ;;  %v3509_v5 = vld [vmem:[%s8345_s2 + $0x278] sm:$0xff] }
 0x8f2   :  { %2405 = vperm.xlu1 %3089, %v2396_v25   ;;  %v3510_v25 = vld [vmem:[%s8345_s2 + $0x578] sm:$0xff] }
 0x944   :  { %v2401_v26 = vpop.permute.xlu2 %2400 }
 0x945   :  { %v2408_v7 = vmul.f32 %v2401_v26, %v4870_v52  ;;  %v2409_v9 = vmul.f32 %v2401_v26, %v4873_v53  ;;  %v3511_v26 = vld [vmem:[%s8345_s2 + $0x248] sm:$0xff] }
 0x947   :  { %v2412_v28 = vadd.f32 %v2408_v7, %v4882_v56  ;;  %v2413_v38 = vadd.f32 %v2409_v9, %v4885_v57  ;;  %v3512_v7 = vld [vmem:[%s8345_s2 + $0x548] sm:$0xff]  ;;  %v3513_v9 = vld [vmem:[%s8345_s2 + $0x218] sm:$0xff] }
 0x949   :  { %v2416_v29 = vmul.f32 0.5, %v2412_v28  ;;  %v2417_v10 = vmul.f32 0.5, %v2413_v38  ;;  %v3514_v28 = vld [vmem:[%s8345_s2 + $0x518] sm:$0xff]  ;;  %v3515_v38 = vld [vmem:[%s8345_s2 + $0x1e8] sm:$0xff] }
 0x94b   :  { %3116 = vtanh.f32 %v2416_v29  ;;  %v3516_v29 = vld [vmem:[%s8345_s2 + $0x4e8] sm:$0xff] }
 0x94c   :  { %3118 = vtanh.f32 %v2417_v10  ;;  %v3517_v10 = vld [vmem:[%s8345_s2 + $0x1b8] sm:$0xff] }
 0x951   :  { %v3117_v51 = vpop.eup %3116 }
 0x952   :  { %v3119_v58 = vpop.eup %3118  ;;  %v2424_v17 = vadd.f32 1.0, %v3117_v51  ;;  %v3527_v51 = vld [vmem:[%s8345_s2 + $0xc8] sm:$0xff] }
 0x953   :  { %v2425_v20 = vadd.f32 1.0, %v3119_v58  ;;  %v3528_v58 = vld [vmem:[%s8345_s2 + $0x3c8] sm:$0xff] }
 0x954   :  { %v2428_v13 = vmul.f32 0.5, %v2424_v17  ;;  %v3529_v17 = vld [vmem:[%s8345_s2 + $0x98] sm:$0xff] }
 0x956   :  { %v2478_v50 = vmul.f32 %v2449_v37, %v2428_v13  ;;  %v3525_v37 = vld [vmem:[%s8345_s2 + $0xf8] sm:$0xff]  ;;  %v3536_v13 = vld [vmem:[%s8345_s2 + $0x308] sm:$0xff] }
 0x964   :  { %v2406_v30 = vpop.permute.xlu1 %2405 }
 0x965   :  { %v2410_v31 = vmul.f32 %v2406_v30, %v4870_v52  ;;  %v2411_v33 = vmul.f32 %v2406_v30, %v4873_v53  ;;  %v2452_v53 = vpop.f32.mrf.mxu0  ;;  %v3518_v30 = vld [vmem:[%s8345_s2 + $0x4b8] sm:$0xff] }
 0x967   :  { %v2414_v48 = vadd.f32 %v2410_v31, %v4882_v56  ;;  %v2415_v3 = vadd.f32 %v2411_v33, %v4885_v57  ;;  %v2429_v57 = vmul.f32 0.5, %v2425_v20  ;;  %v3519_v31 = vld [vmem:[%s8345_s2 + $0x188] sm:$0xff] }
 0x968   :  { %v3520_v33 = vld [vmem:[%s8345_s2 + $0x488] sm:$0xff] }
 0x969   :  { %v2418_v15 = vmul.f32 0.5, %v2414_v48  ;;  %v2419_v62 = vmul.f32 0.5, %v2415_v3  ;;  %v2479_v54 = vmul.f32 %v2472_v34, %v2429_v57  ;;  %v3521_v48 = vld [vmem:[%s8345_s2 + $0x158] sm:$0xff]  ;;  %v3531_v20 = vld [vmem:[%s8345_s2 + $0x68] sm:$0xff] }
 0x96a   :  { %v3522_v3 = vld [vmem:[%s8345_s2 + $0x458] sm:$0xff] }
 0x96b   :  { %3120 = vtanh.f32 %v2418_v15  ;;  %v3523_v15 = vld [vmem:[%s8345_s2 + $0x128] sm:$0xff]  ;;  %v3526_v34 = vld [vmem:[%s8345_s2 + $0x3f8] sm:$0xff] }
 0x96c   :  { %3122 = vtanh.f32 %v2419_v62  ;;  %v3524_v62 = vld [vmem:[%s8345_s2 + $0x428] sm:$0xff]  ;;  %v3539_v57 = vld [vmem:[%s8345_s2 + $0x2b8] sm:$0xff] }
 0x971   :  { %v3121_v60 = vpop.eup %3120 }
 0x972   :  { %v3123_v52 = vpop.eup %3122  ;;  %v2426_v43 = vadd.f32 1.0, %v3121_v60  ;;  %v3530_v60 = vld [vmem:[%s8345_s2 + $0x398] sm:$0xff] }
 0x973   :  { %v2427_v44 = vadd.f32 1.0, %v3123_v52  ;;  %v3532_v52 = vld [vmem:[%s8345_s2 + $0x368] sm:$0xff] }
 0x974   :  { %v2430_v56 = vmul.f32 0.5, %v2426_v43  ;;  %v3533_v43 = vld [vmem:[%s8345_s2 + $0x38] sm:$0xff] }
 0x975   :  { %v2431_v32 = vmul.f32 0.5, %v2427_v44  ;;  %v3535_v44 = vld [vmem:[%s8345_s2 + $0x8] sm:$0xff] }
 0x976   :  { %v2480_v12 = vmul.f32 %v2452_v53, %v2430_v56  ;;  %v3534_v53 = vld [vmem:[%s8345_s2 + $0x338] sm:$0xff]  ;;  %v3537_v56 = vld [vmem:[%s8345_s2 + $0x2e8] sm:$0xff] }
 0x977   :  { %v2481_v47 = vmul.f32 %v2475_v46, %v2431_v32  ;;  %v3538_v46 = vld [vmem:[%s8345_s2 + $0x5e8] sm:$0xff]  ;;  %v3540_v32 = vld [vmem:[%s8345_s2 + $0x5b8] sm:$0xff] }
 0x978   :  { %2496 = vmatpush.msrb.mxu2 %v2480_v12  ;;  %v3541_v12 = vld [vmem:[%s8345_s2 + $0x288] sm:$0xff] }
 0x979   :  { %2516 = vmatpush.msrb.mxu3 %v2481_v47  ;;  %v3542_v47 = vld [vmem:[%s8345_s2 + $0x588] sm:$0xff] }
 0x97a   :  { %2497 = vmatpush.msrb.mxu2 %v2478_v50  ;;  %v3543_v50 = vld [vmem:[%s8345_s2 + $0x258] sm:$0xff] }
 0x97b   :  { %2517 = vmatpush.msrb.mxu3 %v2479_v54  ;;  %3078 = vmatmul.msk.f32.vlgmr.msrb.gmra.mxu2 %vm1177_vm1, %v3504_v55  ;;  %v3544_v54 = vld [vmem:[%s8345_s2 + $0x558] sm:$0xff] }
 0x97c   :  { %3079 = vmatmul.msk.f32.vlgmr.msrb.gmra.mxu3 %vm1177_vm1, %v3504_v55  ;;  %2562 = vmatpush.msra.mxu2 %v3505_v63  ;;  %v3545_v55 = vld [vmem:[%s8345_s2 + $0x228] sm:$0xff] }
 0x97d   :  { %2582 = vmatpush.msra.mxu3 %v3506_v22  ;;  %v3546_v63 = vld [vmem:[%s8345_s2 + $0x528] sm:$0xff]  ;;  %v3547_v22 = vld [vmem:[%s8345_s2 + $0x1f8] sm:$0xff] }
 0x97e   :  { %2563 = vmatpush.msra.mxu2 %v3507_v39  ;;  %v3548_v39 = vld [vmem:[%s8345_s2 + $0x4f8] sm:$0xff] }
 0x97f   :  { %2583 = vmatpush.msra.mxu3 %v3508_v4  ;;  %v3549_v4 = vld [vmem:[%s8345_s2 + $0x1c8] sm:$0xff] }
 0x980   :  { %2564 = vmatpush.msra.mxu2 %v3509_v5  ;;  %v3550_v5 = vld [vmem:[%s8345_s2 + $0x4c8] sm:$0xff] }
 0x981   :  { %2584 = vmatpush.msra.mxu3 %v3510_v25  ;;  %v3551_v25 = vld [vmem:[%s8345_s2 + $0x198] sm:$0xff] }
 0x982   :  { %2565 = vmatpush.msra.mxu2 %v3511_v26  ;;  %v3552_v26 = vld [vmem:[%s8345_s2 + $0x498] sm:$0xff] }
 0x983   :  { %2585 = vmatpush.msra.mxu3 %v3512_v7  ;;  %v3553_v7 = vld [vmem:[%s8345_s2 + $0x168] sm:$0xff] }
 0x984   :  { %2566 = vmatpush.msra.mxu2 %v3513_v9  ;;  %v3554_v9 = vld [vmem:[%s8345_s2 + $0x468] sm:$0xff] }
 0x985   :  { %2586 = vmatpush.msra.mxu3 %v3514_v28  ;;  %v3555_v28 = vld [vmem:[%s8345_s2 + $0x138] sm:$0xff] }
 0x986   :  { %2567 = vmatpush.msra.mxu2 %v3515_v38  ;;  %v3556_v38 = vld [vmem:[%s8345_s2 + $0x438] sm:$0xff] }
 0x987   :  { %2587 = vmatpush.msra.mxu3 %v3516_v29  ;;  %v3557_v29 = vld [vmem:[%s8345_s2 + $0x108] sm:$0xff] }
 0x988   :  { %2568 = vmatpush.msra.mxu2 %v3517_v10  ;;  %v3558_v10 = vld [vmem:[%s8345_s2 + $0x408] sm:$0xff] }
 0x989   :  { %2588 = vmatpush.msra.mxu3 %v3518_v30  ;;  %v3559_v30 = vld [vmem:[%s8345_s2 + $0xd8] sm:$0xff] }
 0x98a   :  { %2569 = vmatpush.msra.mxu2 %v3519_v31  ;;  %v3560_v31 = vld [vmem:[%s8345_s2 + $0x3d8] sm:$0xff] }
 0x98b   :  { %2589 = vmatpush.msra.mxu3 %v3520_v33  ;;  %v3561_v33 = vld [vmem:[%s8345_s2 + $0xa8] sm:$0xff] }
 0x98c   :  { %2570 = vmatpush.msra.mxu2 %v3521_v48  ;;  %v3562_v48 = vld [vmem:[%s8345_s2 + $0x3a8] sm:$0xff] }
 0x98d   :  { %2590 = vmatpush.msra.mxu3 %v3522_v3  ;;  %v3563_v3 = vld [vmem:[%s8345_s2 + $0x78] sm:$0xff] }
 0x98e   :  { %2571 = vmatpush.msra.mxu2 %v3523_v15  ;;  %v3564_v15 = vld [vmem:[%s8345_s2 + $0x378] sm:$0xff] }
 0x98f   :  { %2591 = vmatpush.msra.mxu3 %v3524_v62  ;;  %v3565_v62 = vld [vmem:[%s8345_s2 + $0x48] sm:$0xff] }
 0x990   :  { %2572 = vmatpush.msra.mxu2 %v3525_v37  ;;  %v3566_v37 = vld [vmem:[%s8345_s2 + $0x348] sm:$0xff] }
 0x991   :  { %2592 = vmatpush.msra.mxu3 %v3526_v34  ;;  %v3567_v34 = vld [vmem:[%s8345_s2 + $0x18] sm:$0xff] }
 0x992   :  { %2573 = vmatpush.msra.mxu2 %v3527_v51  ;;  %v3568_v51 = vld [vmem:[%s8345_s2 + $0x318] sm:$0xff] }
 0x993   :  { %2593 = vmatpush.msra.mxu3 %v3528_v58 }
 0x994   :  { %2574 = vmatpush.msra.mxu2 %v3529_v17 }
 0x995   :  { %2594 = vmatpush.msra.mxu3 %v3530_v60  ;;  %v3569_v60 = vld [vmem:[%s8345_s2 + $0x2f0] sm:$0xff] }
 0x996   :  { %2575 = vmatpush.msra.mxu2 %v3531_v20  ;;  %v3570_v20 = vld [vmem:[%s8345_s2 + $0x5f0] sm:$0xff] }
 0x997   :  { %2595 = vmatpush.msra.mxu3 %v3532_v52  ;;  %v3571_v52 = vld [vmem:[%s8345_s2 + $0x2f8] sm:$0xff] }
 0x998   :  { %2576 = vmatpush.msra.mxu2 %v3533_v43  ;;  %v3572_v43 = vld [vmem:[%s8345_s2 + $0x5f8] sm:$0xff] }
 0x999   :  { %2596 = vmatpush.msra.mxu3 %v3534_v53  ;;  %v3573_v53 = vld [vmem:[%s8345_s2 + $0x2c0] sm:$0xff] }
 0x99a   :  { %2577 = vmatpush.msra.mxu2 %v3535_v44  ;;  %v3574_v44 = vld [vmem:[%s8345_s2 + $0x5c0] sm:$0xff] }
 0x99b   :  { %2597 = vmatpush.msra.mxu3 %v3536_v13  ;;  %v3575_v13 = vld [vmem:[%s8345_s2 + $0x2c8] sm:$0xff] }
 0x99c   :  { %2642 = vmatpush.msrb.mxu2 %v3537_v56  ;;  %v3576_v56 = vld [vmem:[%s8345_s2 + $0x5c8] sm:$0xff] }
 0x99d   :  { %2662 = vmatpush.msrb.mxu3 %v3538_v46  ;;  %v3577_v46 = vld [vmem:[%s8345_s2 + $0x290] sm:$0xff] }
 0x99e   :  { %2643 = vmatpush.msrb.mxu2 %v3539_v57  ;;  %v3578_v57 = vld [vmem:[%s8345_s2 + $0x590] sm:$0xff] }
 0x99f   :  { %2663 = vmatpush.msrb.mxu3 %v3540_v32  ;;  %v3579_v32 = vld [vmem:[%s8345_s2 + $0x298] sm:$0xff] }
 0x9a0   :  { %2644 = vmatpush.msrb.mxu2 %v3541_v12  ;;  %v3580_v12 = vld [vmem:[%s8345_s2 + $0x598] sm:$0xff] }
 0x9a1   :  { %2664 = vmatpush.msrb.mxu3 %v3542_v47  ;;  %v3581_v47 = vld [vmem:[%s8345_s2 + $0x260] sm:$0xff] }
 0x9a2   :  { %2645 = vmatpush.msrb.mxu2 %v3543_v50  ;;  %v3582_v50 = vld [vmem:[%s8345_s2 + $0x560] sm:$0xff] }
 0x9a3   :  { %2665 = vmatpush.msrb.mxu3 %v3544_v54  ;;  %v3583_v54 = vld [vmem:[%s8345_s2 + $0x268] sm:$0xff] }
 0x9a4   :  { %2646 = vmatpush.msrb.mxu2 %v3545_v55  ;;  %v3584_v55 = vld [vmem:[%s8345_s2 + $0x568] sm:$0xff] }
 0x9a5   :  { %2666 = vmatpush.msrb.mxu3 %v3546_v63  ;;  %v3585_v63 = vld [vmem:[%s8345_s2 + $0x230] sm:$0xff] }
 0x9a6   :  { %2647 = vmatpush.msrb.mxu2 %v3547_v22  ;;  %v3586_v22 = vld [vmem:[%s8345_s2 + $0x530] sm:$0xff] }
 0x9a7   :  { %2667 = vmatpush.msrb.mxu3 %v3548_v39  ;;  %v3587_v39 = vld [vmem:[%s8345_s2 + $0x238] sm:$0xff] }
 0x9a8   :  { %2648 = vmatpush.msrb.mxu2 %v3549_v4  ;;  %v3588_v4 = vld [vmem:[%s8345_s2 + $0x538] sm:$0xff] }
 0x9a9   :  { %2668 = vmatpush.msrb.mxu3 %v3550_v5  ;;  %v3589_v5 = vld [vmem:[%s8345_s2 + $0x200] sm:$0xff] }
 0x9aa   :  { %2649 = vmatpush.msrb.mxu2 %v3551_v25  ;;  %v3590_v25 = vld [vmem:[%s8345_s2 + $0x500] sm:$0xff] }
 0x9ab   :  { %2669 = vmatpush.msrb.mxu3 %v3552_v26  ;;  %v3591_v26 = vld [vmem:[%s8345_s2 + $0x208] sm:$0xff] }
 0x9ac   :  { %2650 = vmatpush.msrb.mxu2 %v3553_v7  ;;  %v3592_v7 = vld [vmem:[%s8345_s2 + $0x508] sm:$0xff] }
 0x9ad   :  { %2670 = vmatpush.msrb.mxu3 %v3554_v9  ;;  %v3593_v9 = vld [vmem:[%s8345_s2 + $0x1d0] sm:$0xff] }
 0x9ae   :  { %2651 = vmatpush.msrb.mxu2 %v3555_v28  ;;  %v3594_v28 = vld [vmem:[%s8345_s2 + $0x4d0] sm:$0xff] }
 0x9af   :  { %2671 = vmatpush.msrb.mxu3 %v3556_v38  ;;  %v3595_v38 = vld [vmem:[%s8345_s2 + $0x1d8] sm:$0xff] }
 0x9b0   :  { %2652 = vmatpush.msrb.mxu2 %v3557_v29  ;;  %v3596_v29 = vld [vmem:[%s8345_s2 + $0x4d8] sm:$0xff] }
 0x9b1   :  { %2672 = vmatpush.msrb.mxu3 %v3558_v10  ;;  %v3597_v10 = vld [vmem:[%s8345_s2 + $0x1a0] sm:$0xff] }
 0x9b2   :  { %2653 = vmatpush.msrb.mxu2 %v3559_v30  ;;  %v3598_v30 = vld [vmem:[%s8345_s2 + $0x4a0] sm:$0xff] }
 0x9b3   :  { %2673 = vmatpush.msrb.mxu3 %v3560_v31  ;;  %v3599_v31 = vld [vmem:[%s8345_s2 + $0x1a8] sm:$0xff] }
 0x9b4   :  { %2654 = vmatpush.msrb.mxu2 %v3561_v33  ;;  %v3600_v33 = vld [vmem:[%s8345_s2 + $0x4a8] sm:$0xff] }
 0x9b5   :  { %2674 = vmatpush.msrb.mxu3 %v3562_v48  ;;  %v3601_v48 = vld [vmem:[%s8345_s2 + $0x170] sm:$0xff] }
 0x9b6   :  { %2655 = vmatpush.msrb.mxu2 %v3563_v3  ;;  %v3602_v3 = vld [vmem:[%s8345_s2 + $0x470] sm:$0xff] }
 0x9b7   :  { %2675 = vmatpush.msrb.mxu3 %v3564_v15  ;;  %v3603_v15 = vld [vmem:[%s8345_s2 + $0x178] sm:$0xff] }
 0x9b8   :  { %2656 = vmatpush.msrb.mxu2 %v3565_v62  ;;  %v3604_v62 = vld [vmem:[%s8345_s2 + $0x478] sm:$0xff] }
 0x9b9   :  { %2676 = vmatpush.msrb.mxu3 %v3566_v37  ;;  %v3605_v37 = vld [vmem:[%s8345_s2 + $0x140] sm:$0xff] }
 0x9ba   :  { %2657 = vmatpush.msrb.mxu2 %v3567_v34  ;;  %v3606_v34 = vld [vmem:[%s8345_s2 + $0x440] sm:$0xff] }
 0x9bb   :  { %2677 = vmatpush.msrb.mxu3 %v3568_v51  ;;  %v3607_v51 = vld [vmem:[%s8345_s2 + $0x148] sm:$0xff] }
 0x9fe   :  { %v7511_v58 = vpop.f32.mrf.mxu2 }
 0x9ff   :  { %v7513_v17 = vpop.f32.mrf.mxu3  ;;  %2538 = vmatmul.f32.vlgmr.msra.gmra.mxu0 %v7511_v58  ;;  %2578 = vmatmul.f32.vlgmr.msra.gmra.mxu2 %v7511_v58 }
 0xa00   :  { %2558 = vmatmul.f32.vlgmr.msra.gmra.mxu1 %v7513_v17  ;;  %2598 = vmatmul.f32.vlgmr.msra.gmra.mxu3 %v7513_v17 }
 0xa01   :  { %2682 = vmatpush.msra.mxu0 %v3569_v60  ;;  %2702 = vmatpush.msra.mxu1 %v3570_v20  ;;  %v3608_v60 = vld [vmem:[%s8345_s2 + $0x448] sm:$0xff]  ;;  %v3609_v20 = vld [vmem:[%s8345_s2 + $0x110] sm:$0xff] }
 0xa02   :  { %2722 = vmatpush.msra.mxu2 %v3571_v52  ;;  %2742 = vmatpush.msra.mxu3 %v3572_v43  ;;  %v3610_v52 = vld [vmem:[%s8345_s2 + $0x410] sm:$0xff]  ;;  %v3611_v43 = vld [vmem:[%s8345_s2 + $0x118] sm:$0xff] }
 0xa03   :  { %2683 = vmatpush.msra.mxu0 %v3573_v53  ;;  %2703 = vmatpush.msra.mxu1 %v3574_v44  ;;  %v3612_v53 = vld [vmem:[%s8345_s2 + $0x418] sm:$0xff]  ;;  %v3613_v44 = vld [vmem:[%s8345_s2 + $0xe0] sm:$0xff] }
 0xa04   :  { %2723 = vmatpush.msra.mxu2 %v3575_v13  ;;  %2743 = vmatpush.msra.mxu3 %v3576_v56  ;;  %v3614_v13 = vld [vmem:[%s8345_s2 + $0x3e0] sm:$0xff]  ;;  %v3615_v56 = vld [vmem:[%s8345_s2 + $0xe8] sm:$0xff] }
 0xa05   :  { %2684 = vmatpush.msra.mxu0 %v3577_v46  ;;  %2704 = vmatpush.msra.mxu1 %v3578_v57  ;;  %v3616_v46 = vld [vmem:[%s8345_s2 + $0x3e8] sm:$0xff]  ;;  %v3617_v57 = vld [vmem:[%s8345_s2 + $0xb0] sm:$0xff] }
 0xa06   :  { %2724 = vmatpush.msra.mxu2 %v3579_v32  ;;  %2744 = vmatpush.msra.mxu3 %v3580_v12  ;;  %v3618_v32 = vld [vmem:[%s8345_s2 + $0x3b0] sm:$0xff]  ;;  %v3619_v12 = vld [vmem:[%s8345_s2 + $0xb8] sm:$0xff] }
 0xa07   :  { %2685 = vmatpush.msra.mxu0 %v3581_v47  ;;  %2705 = vmatpush.msra.mxu1 %v3582_v50  ;;  %v3620_v47 = vld [vmem:[%s8345_s2 + $0x3b8] sm:$0xff]  ;;  %v3621_v50 = vld [vmem:[%s8345_s2 + $0x80] sm:$0xff] }
 0xa08   :  { %2725 = vmatpush.msra.mxu2 %v3583_v54  ;;  %2745 = vmatpush.msra.mxu3 %v3584_v55  ;;  %v3622_v54 = vld [vmem:[%s8345_s2 + $0x380] sm:$0xff]  ;;  %v3623_v55 = vld [vmem:[%s8345_s2 + $0x88] sm:$0xff] }
 0xa09   :  { %2618 = vmatmul.f32.vlgmr.msrb.gmra.mxu0 %v7511_v58  ;;  %2638 = vmatmul.f32.vlgmr.msrb.gmra.mxu1 %v7513_v17 }
 0xa0a   :  { %2658 = vmatmul.f32.vlgmr.msrb.gmra.mxu2 %v7511_v58  ;;  %2678 = vmatmul.f32.vlgmr.msrb.gmra.mxu3 %v7513_v17 }
 0xa0b   :  { %2686 = vmatpush.msra.mxu0 %v3585_v63  ;;  %2706 = vmatpush.msra.mxu1 %v3586_v22  ;;  %v3624_v63 = vld [vmem:[%s8345_s2 + $0x388] sm:$0xff]  ;;  %v3625_v22 = vld [vmem:[%s8345_s2 + $0x50] sm:$0xff] }
 0xa0c   :  { %2726 = vmatpush.msra.mxu2 %v3587_v39  ;;  %2746 = vmatpush.msra.mxu3 %v3588_v4  ;;  %v3626_v39 = vld [vmem:[%s8345_s2 + $0x350] sm:$0xff]  ;;  %v3627_v4 = vld [vmem:[%s8345_s2 + $0x58] sm:$0xff] }
 0xa0d   :  { %2687 = vmatpush.msra.mxu0 %v3589_v5  ;;  %2707 = vmatpush.msra.mxu1 %v3590_v25  ;;  %v3628_v5 = vld [vmem:[%s8345_s2 + $0x358] sm:$0xff]  ;;  %v3629_v25 = vld [vmem:[%s8345_s2 + $0x20] sm:$0xff] }
 0xa0e   :  { %2727 = vmatpush.msra.mxu2 %v3591_v26  ;;  %2747 = vmatpush.msra.mxu3 %v3592_v7  ;;  %v3630_v26 = vld [vmem:[%s8345_s2 + $0x320] sm:$0xff]  ;;  %v3631_v7 = vld [vmem:[%s8345_s2 + $0x28] sm:$0xff] }
 0xa0f   :  { %2688 = vmatpush.msra.mxu0 %v3593_v9  ;;  %2708 = vmatpush.msra.mxu1 %v3594_v28  ;;  %v3632_v9 = vld [vmem:[%s8345_s2 + $0x328] sm:$0xff]  ;;  %v3633_v28 = vld [vmem:[%s8347_s3 + $0xf0] sm:$0xff] }
 0xa10   :  { %2728 = vmatpush.msra.mxu2 %v3595_v38  ;;  %2748 = vmatpush.msra.mxu3 %v3596_v29  ;;  %v3634_v38 = vld [vmem:[%s8347_s3 + $0xf8] sm:$0xff]  ;;  %v3635_v29 = vld [vmem:[%s8347_s3 + $0x1f0] sm:$0xff] }
 0xa11   :  { %2689 = vmatpush.msra.mxu0 %v3597_v10  ;;  %2709 = vmatpush.msra.mxu1 %v3598_v30  ;;  %v3638_v10 = vld [vmem:[%s8347_s3 + $0xe8] sm:$0xff]  ;;  %v3639_v30 = vld [vmem:[%s8347_s3 + $0x1e0] sm:$0xff] }
 0xa12   :  { %2729 = vmatpush.msra.mxu2 %v3599_v31  ;;  %2749 = vmatpush.msra.mxu3 %v3600_v33  ;;  %v3640_v31 = vld [vmem:[%s8347_s3 + $0x1e8] sm:$0xff]  ;;  %v3641_v33 = vld [vmem:[%s8347_s3 + $0xd0] sm:$0xff] }
 0xa13   :  { %2690 = vmatpush.msra.mxu0 %v3601_v48  ;;  %2710 = vmatpush.msra.mxu1 %v3602_v3  ;;  %v3642_v48 = vld [vmem:[%s8347_s3 + $0xd8] sm:$0xff]  ;;  %v3643_v3 = vld [vmem:[%s8347_s3 + $0x1d0] sm:$0xff] }
 0xa14   :  { %2730 = vmatpush.msra.mxu2 %v3603_v15  ;;  %2750 = vmatpush.msra.mxu3 %v3604_v62  ;;  %v3644_v15 = vld [vmem:[%s8347_s3 + $0x1d8] sm:$0xff]  ;;  %v3645_v62 = vld [vmem:[%s8347_s3 + $0xc0] sm:$0xff] }
 0xa15   :  { %2691 = vmatpush.msra.mxu0 %v3605_v37  ;;  %2711 = vmatpush.msra.mxu1 %v3606_v34  ;;  %v3646_v37 = vld [vmem:[%s8347_s3 + $0xc8] sm:$0xff]  ;;  %v3647_v34 = vld [vmem:[%s8347_s3 + $0x1c0] sm:$0xff] }
 0xa16   :  { %2731 = vmatpush.msra.mxu2 %v3607_v51  ;;  %2751 = vmatpush.msra.mxu3 %v3608_v60  ;;  %v3648_v51 = vld [vmem:[%s8347_s3 + $0x1c8] sm:$0xff]  ;;  %v3649_v60 = vld [vmem:[%s8347_s3 + $0xb0] sm:$0xff] }
 0xa17   :  { %2692 = vmatpush.msra.mxu0 %v3609_v20  ;;  %2712 = vmatpush.msra.mxu1 %v3610_v52  ;;  %v3650_v20 = vld [vmem:[%s8347_s3 + $0xb8] sm:$0xff]  ;;  %v3651_v52 = vld [vmem:[%s8347_s3 + $0x1b0] sm:$0xff] }
 0xa18   :  { %2732 = vmatpush.msra.mxu2 %v3611_v43  ;;  %2752 = vmatpush.msra.mxu3 %v3612_v53  ;;  %v3652_v43 = vld [vmem:[%s8347_s3 + $0x1b8] sm:$0xff]  ;;  %v3653_v53 = vld [vmem:[%s8347_s3 + $0xa0] sm:$0xff] }
 0xa19   :  { %2693 = vmatpush.msra.mxu0 %v3613_v44  ;;  %2713 = vmatpush.msra.mxu1 %v3614_v13  ;;  %v3654_v44 = vld [vmem:[%s8347_s3 + $0xa8] sm:$0xff]  ;;  %v3655_v13 = vld [vmem:[%s8347_s3 + $0x1a0] sm:$0xff] }
 0xa1a   :  { %2733 = vmatpush.msra.mxu2 %v3615_v56  ;;  %2753 = vmatpush.msra.mxu3 %v3616_v46  ;;  %v3656_v56 = vld [vmem:[%s8347_s3 + $0x1a8] sm:$0xff]  ;;  %v3657_v46 = vld [vmem:[%s8347_s3 + $0x90] sm:$0xff] }
 0xa1b   :  { %2694 = vmatpush.msra.mxu0 %v3617_v57  ;;  %2714 = vmatpush.msra.mxu1 %v3618_v32  ;;  %v3658_v57 = vld [vmem:[%s8347_s3 + $0x98] sm:$0xff]  ;;  %v3659_v32 = vld [vmem:[%s8347_s3 + $0x190] sm:$0xff] }
 0xa1c   :  { %2734 = vmatpush.msra.mxu2 %v3619_v12  ;;  %2754 = vmatpush.msra.mxu3 %v3620_v47  ;;  %v3660_v12 = vld [vmem:[%s8347_s3 + $0x198] sm:$0xff]  ;;  %v3661_v47 = vld [vmem:[%s8347_s3 + $0x80] sm:$0xff] }
 0xa1d   :  { %2695 = vmatpush.msra.mxu0 %v3621_v50  ;;  %2715 = vmatpush.msra.mxu1 %v3622_v54  ;;  %v3662_v50 = vld [vmem:[%s8347_s3 + $0x88] sm:$0xff]  ;;  %v3663_v54 = vld [vmem:[%s8347_s3 + $0x180] sm:$0xff] }
 0xa1e   :  { %2735 = vmatpush.msra.mxu2 %v3623_v55  ;;  %2755 = vmatpush.msra.mxu3 %v3624_v63  ;;  %v3664_v55 = vld [vmem:[%s8347_s3 + $0x188] sm:$0xff]  ;;  %v3665_v63 = vld [vmem:[%s8347_s3 + $0x70] sm:$0xff] }
 0xa1f   :  { %2696 = vmatpush.msra.mxu0 %v3625_v22  ;;  %2716 = vmatpush.msra.mxu1 %v3626_v39  ;;  %v3666_v22 = vld [vmem:[%s8347_s3 + $0x78] sm:$0xff]  ;;  %v3667_v39 = vld [vmem:[%s8347_s3 + $0x170] sm:$0xff] }
 0xa20   :  { %2736 = vmatpush.msra.mxu2 %v3627_v4  ;;  %2756 = vmatpush.msra.mxu3 %v3628_v5  ;;  %v3668_v4 = vld [vmem:[%s8347_s3 + $0x178] sm:$0xff]  ;;  %v3669_v5 = vld [vmem:[%s8347_s3 + $0x60] sm:$0xff] }
 0xa21   :  { %2697 = vmatpush.msra.mxu0 %v3629_v25  ;;  %2717 = vmatpush.msra.mxu1 %v3630_v26  ;;  %v3670_v25 = vld [vmem:[%s8347_s3 + $0x68] sm:$0xff]  ;;  %v3671_v26 = vld [vmem:[%s8347_s3 + $0x160] sm:$0xff] }
 0xa22   :  { %2737 = vmatpush.msra.mxu2 %v3631_v7  ;;  %2757 = vmatpush.msra.mxu3 %v3632_v9  ;;  %v3672_v7 = vld [vmem:[%s8347_s3 + $0x168] sm:$0xff]  ;;  %v3673_v9 = vld [vmem:[%s8347_s3 + $0x50] sm:$0xff] }
 0xa23   :  { %2698 = vmatmul.f32.vlgmr.msra.gmra.mxu0 %v7511_v58  ;;  %2718 = vmatmul.f32.vlgmr.msra.gmra.mxu1 %v7513_v17 }
 0xa24   :  { %2738 = vmatmul.f32.vlgmr.msra.gmra.mxu2 %v7511_v58  ;;  %2758 = vmatmul.f32.vlgmr.msra.gmra.mxu3 %v7513_v17  ;;  %v3636_v58 = vld [vmem:[%s8347_s3 + $0x1f8] sm:$0xff]  ;;  %v3637_v17 = vld [vmem:[%s8347_s3 + $0xe0] sm:$0xff] }
 0xa25   :  { %2788 = vmatpush.msrb.mxu0 %v3633_v28  ;;  %2828 = vmatpush.msrb.mxu2 %v3634_v38  ;;  %v3674_v28 = vld [vmem:[%s8347_s3 + $0x58] sm:$0xff]  ;;  %v3675_v38 = vld [vmem:[%s8347_s3 + $0x150] sm:$0xff] }
 0xa26   :  { %2808 = vmatpush.msrb.mxu1 %v3635_v29  ;;  %2848 = vmatpush.msrb.mxu3 %v3636_v58  ;;  %v3676_v29 = vld [vmem:[%s8347_s3 + $0x158] sm:$0xff]  ;;  %v3677_v58 = vld [vmem:[%s8347_s3 + $0x40] sm:$0xff] }
 0xa27   :  { %2789 = vmatpush.msrb.mxu0 %v3637_v17  ;;  %2829 = vmatpush.msrb.mxu2 %v3638_v10  ;;  %v3678_v17 = vld [vmem:[%s8347_s3 + $0x48] sm:$0xff]  ;;  %v3679_v10 = vld [vmem:[%s8347_s3 + $0x140] sm:$0xff] }
 0xa28   :  { %2809 = vmatpush.msrb.mxu1 %v3639_v30  ;;  %2849 = vmatpush.msrb.mxu3 %v3640_v31  ;;  %v3680_v30 = vld [vmem:[%s8347_s3 + $0x148] sm:$0xff]  ;;  %v3681_v31 = vld [vmem:[%s8347_s3 + $0x30] sm:$0xff] }
 0xa29   :  { %2790 = vmatpush.msrb.mxu0 %v3641_v33  ;;  %2830 = vmatpush.msrb.mxu2 %v3642_v48  ;;  %v3682_v33 = vld [vmem:[%s8347_s3 + $0x38] sm:$0xff]  ;;  %v3683_v48 = vld [vmem:[%s8347_s3 + $0x130] sm:$0xff] }
 0xa2a   :  { %2810 = vmatpush.msrb.mxu1 %v3643_v3  ;;  %2850 = vmatpush.msrb.mxu3 %v3644_v15  ;;  %v3684_v3 = vld [vmem:[%s8347_s3 + $0x138] sm:$0xff]  ;;  %v3685_v15 = vld [vmem:[%s8347_s3 + $0x20] sm:$0xff] }
 0xa2b   :  { %2791 = vmatpush.msrb.mxu0 %v3645_v62  ;;  %2831 = vmatpush.msrb.mxu2 %v3646_v37  ;;  %v3686_v62 = vld [vmem:[%s8347_s3 + $0x28] sm:$0xff]  ;;  %v3687_v37 = vld [vmem:[%s8347_s3 + $0x120] sm:$0xff] }
 0xa2c   :  { %2811 = vmatpush.msrb.mxu1 %v3647_v34  ;;  %2851 = vmatpush.msrb.mxu3 %v3648_v51  ;;  %v3688_v34 = vld [vmem:[%s8347_s3 + $0x128] sm:$0xff]  ;;  %v3689_v51 = vld [vmem:[%s8347_s3 + $0x10] sm:$0xff] }
 0xa2d   :  { %2792 = vmatpush.msrb.mxu0 %v3649_v60  ;;  %2832 = vmatpush.msrb.mxu2 %v3650_v20  ;;  %v3690_v60 = vld [vmem:[%s8347_s3 + $0x18] sm:$0xff]  ;;  %v3691_v20 = vld [vmem:[%s8347_s3 + $0x110] sm:$0xff] }
 0xa2e   :  { %2812 = vmatpush.msrb.mxu1 %v3651_v52  ;;  %2852 = vmatpush.msrb.mxu3 %v3652_v43  ;;  %v3692_v52 = vld [vmem:[%s8347_s3 + $0x118] sm:$0xff]  ;;  %v3693_v43 = vld [vmem:[%s8347_s3] sm:$0xff] }
 0xa2f   :  { %2793 = vmatpush.msrb.mxu0 %v3653_v53  ;;  %2833 = vmatpush.msrb.mxu2 %v3654_v44  ;;  %v3694_v53 = vld [vmem:[%s8347_s3 + $0x8] sm:$0xff]  ;;  %v3695_v44 = vld [vmem:[%s8347_s3 + $0x100] sm:$0xff] }
 0xa30   :  { %2813 = vmatpush.msrb.mxu1 %v3655_v13  ;;  %2853 = vmatpush.msrb.mxu3 %v3656_v56  ;;  %v3696_v13 = vld [vmem:[%s8347_s3 + $0x108] sm:$0xff]  ;;  %v3697_v56 = vld [vmem:[%s8348_s4 + $0x2f0] sm:$0xff] }
 0xa31   :  { %2794 = vmatpush.msrb.mxu0 %v3657_v46  ;;  %2834 = vmatpush.msrb.mxu2 %v3658_v57  ;;  %v3698_v46 = vld [vmem:[%s8348_s4 + $0x2f8] sm:$0xff]  ;;  %v3699_v57 = vld [vmem:[%s8348_s4 + $0x3f0] sm:$0xff] }
 0xa32   :  { %2814 = vmatpush.msrb.mxu1 %v3659_v32  ;;  %2854 = vmatpush.msrb.mxu3 %v3660_v12  ;;  %v3700_v32 = vld [vmem:[%s8348_s4 + $0x3f8] sm:$0xff]  ;;  %v3701_v12 = vld [vmem:[%s8348_s4 + $0x2e0] sm:$0xff] }
 0xa33   :  { %2795 = vmatpush.msrb.mxu0 %v3661_v47  ;;  %2835 = vmatpush.msrb.mxu2 %v3662_v50  ;;  %v3702_v47 = vld [vmem:[%s8348_s4 + $0x2e8] sm:$0xff]  ;;  %v3703_v50 = vld [vmem:[%s8348_s4 + $0x3e0] sm:$0xff] }
 0xa34   :  { %2815 = vmatpush.msrb.mxu1 %v3663_v54  ;;  %2855 = vmatpush.msrb.mxu3 %v3664_v55  ;;  %v3704_v54 = vld [vmem:[%s8348_s4 + $0x3e8] sm:$0xff]  ;;  %v3705_v55 = vld [vmem:[%s8348_s4 + $0x2d0] sm:$0xff] }
 0xa35   :  { %2796 = vmatpush.msrb.mxu0 %v3665_v63  ;;  %2836 = vmatpush.msrb.mxu2 %v3666_v22  ;;  %v3706_v63 = vld [vmem:[%s8348_s4 + $0x2d8] sm:$0xff]  ;;  %v3707_v22 = vld [vmem:[%s8348_s4 + $0x3d0] sm:$0xff] }
 0xa36   :  { %2816 = vmatpush.msrb.mxu1 %v3667_v39  ;;  %2856 = vmatpush.msrb.mxu3 %v3668_v4  ;;  %v3708_v39 = vld [vmem:[%s8348_s4 + $0x3d8] sm:$0xff]  ;;  %v3709_v4 = vld [vmem:[%s8348_s4 + $0x2c0] sm:$0xff] }
 0xa37   :  { %2797 = vmatpush.msrb.mxu0 %v3669_v5  ;;  %2837 = vmatpush.msrb.mxu2 %v3670_v25  ;;  %v3710_v5 = vld [vmem:[%s8348_s4 + $0x2c8] sm:$0xff]  ;;  %v3711_v25 = vld [vmem:[%s8348_s4 + $0x3c0] sm:$0xff] }
 0xa38   :  { %2817 = vmatpush.msrb.mxu1 %v3671_v26  ;;  %2857 = vmatpush.msrb.mxu3 %v3672_v7  ;;  %v3712_v26 = vld [vmem:[%s8348_s4 + $0x3c8] sm:$0xff]  ;;  %v3713_v7 = vld [vmem:[%s8348_s4 + $0x2b0] sm:$0xff] }
 0xa39   :  { %2798 = vmatpush.msrb.mxu0 %v3673_v9  ;;  %2838 = vmatpush.msrb.mxu2 %v3674_v28  ;;  %v3714_v9 = vld [vmem:[%s8348_s4 + $0x2b8] sm:$0xff]  ;;  %v3715_v28 = vld [vmem:[%s8348_s4 + $0x3b0] sm:$0xff] }
 0xa3a   :  { %2818 = vmatpush.msrb.mxu1 %v3675_v38  ;;  %2858 = vmatpush.msrb.mxu3 %v3676_v29  ;;  %v3716_v38 = vld [vmem:[%s8348_s4 + $0x3b8] sm:$0xff]  ;;  %v3717_v29 = vld [vmem:[%s8348_s4 + $0x2a0] sm:$0xff] }
 0xa3b   :  { %2799 = vmatpush.msrb.mxu0 %v3677_v58  ;;  %2839 = vmatpush.msrb.mxu2 %v3678_v17  ;;  %v3718_v58 = vld [vmem:[%s8348_s4 + $0x2a8] sm:$0xff]  ;;  %v3719_v17 = vld [vmem:[%s8348_s4 + $0x3a0] sm:$0xff] }
 0xa3c   :  { %2819 = vmatpush.msrb.mxu1 %v3679_v10  ;;  %2859 = vmatpush.msrb.mxu3 %v3680_v30  ;;  %v3720_v10 = vld [vmem:[%s8348_s4 + $0x3a8] sm:$0xff]  ;;  %v3721_v30 = vld [vmem:[%s8348_s4 + $0x290] sm:$0xff] }
 0xa3d   :  { %2800 = vmatpush.msrb.mxu0 %v3681_v31  ;;  %2840 = vmatpush.msrb.mxu2 %v3682_v33  ;;  %v3722_v31 = vld [vmem:[%s8348_s4 + $0x298] sm:$0xff]  ;;  %v3723_v33 = vld [vmem:[%s8348_s4 + $0x390] sm:$0xff] }
 0xa3e   :  { %2820 = vmatpush.msrb.mxu1 %v3683_v48  ;;  %2860 = vmatpush.msrb.mxu3 %v3684_v3  ;;  %v3724_v48 = vld [vmem:[%s8348_s4 + $0x398] sm:$0xff]  ;;  %v3725_v3 = vld [vmem:[%s8348_s4 + $0x280] sm:$0xff] }
 0xa3f   :  { %2801 = vmatpush.msrb.mxu0 %v3685_v15  ;;  %2841 = vmatpush.msrb.mxu2 %v3686_v62  ;;  %v3726_v15 = vld [vmem:[%s8348_s4 + $0x288] sm:$0xff]  ;;  %v3727_v62 = vld [vmem:[%s8348_s4 + $0x380] sm:$0xff] }
 0xa40   :  { %2821 = vmatpush.msrb.mxu1 %v3687_v37  ;;  %2861 = vmatpush.msrb.mxu3 %v3688_v34  ;;  %v3728_v37 = vld [vmem:[%s8348_s4 + $0x388] sm:$0xff]  ;;  %v3729_v34 = vld [vmem:[%s8348_s4 + $0x270] sm:$0xff] }
 0xa41   :  { %2802 = vmatpush.msrb.mxu0 %v3689_v51  ;;  %2842 = vmatpush.msrb.mxu2 %v3690_v60  ;;  %v3730_v51 = vld [vmem:[%s8348_s4 + $0x278] sm:$0xff]  ;;  %v3731_v60 = vld [vmem:[%s8348_s4 + $0x370] sm:$0xff] }
 0xa42   :  { %2822 = vmatpush.msrb.mxu1 %v3691_v20  ;;  %2862 = vmatpush.msrb.mxu3 %v3692_v52  ;;  %v3732_v20 = vld [vmem:[%s8348_s4 + $0x378] sm:$0xff]  ;;  %v3733_v52 = vld [vmem:[%s8348_s4 + $0x260] sm:$0xff] }
 0xa43   :  { %2803 = vmatpush.msrb.mxu0 %v3693_v43  ;;  %2843 = vmatpush.msrb.mxu2 %v3694_v53  ;;  %v3734_v43 = vld [vmem:[%s8348_s4 + $0x268] sm:$0xff]  ;;  %v3735_v53 = vld [vmem:[%s8348_s4 + $0x360] sm:$0xff] }
 0xa44   :  { %2823 = vmatpush.msrb.mxu1 %v3695_v44  ;;  %2863 = vmatpush.msrb.mxu3 %v3696_v13  ;;  %v3736_v44 = vld [vmem:[%s8348_s4 + $0x368] sm:$0xff]  ;;  %v3737_v13 = vld [vmem:[%s8348_s4 + $0x250] sm:$0xff] }
 0xa45   :  { %2880 = vmatpush.msra.mxu0 %v3697_v56  ;;  %2920 = vmatpush.msra.mxu2 %v3698_v46  ;;  %v3738_v56 = vld [vmem:[%s8348_s4 + $0x258] sm:$0xff]  ;;  %v3739_v46 = vld [vmem:[%s8348_s4 + $0x350] sm:$0xff] }
 0xa46   :  { %2900 = vmatpush.msra.mxu1 %v3699_v57  ;;  %2940 = vmatpush.msra.mxu3 %v3700_v32  ;;  %v3740_v57 = vld [vmem:[%s8348_s4 + $0x358] sm:$0xff]  ;;  %v3741_v32 = vld [vmem:[%s8348_s4 + $0x240] sm:$0xff] }
 0xa47   :  { %2881 = vmatpush.msra.mxu0 %v3701_v12  ;;  %2921 = vmatpush.msra.mxu2 %v3702_v47  ;;  %v3742_v12 = vld [vmem:[%s8348_s4 + $0x248] sm:$0xff]  ;;  %v3743_v47 = vld [vmem:[%s8348_s4 + $0x340] sm:$0xff] }
 0xa48   :  { %2901 = vmatpush.msra.mxu1 %v3703_v50  ;;  %2941 = vmatpush.msra.mxu3 %v3704_v54  ;;  %v3744_v50 = vld [vmem:[%s8348_s4 + $0x348] sm:$0xff]  ;;  %v3745_v54 = vld [vmem:[%s8348_s4 + $0x230] sm:$0xff] }
 0xa49   :  { %2882 = vmatpush.msra.mxu0 %v3705_v55  ;;  %2922 = vmatpush.msra.mxu2 %v3706_v63  ;;  %v3746_v55 = vld [vmem:[%s8348_s4 + $0x238] sm:$0xff]  ;;  %v3747_v63 = vld [vmem:[%s8348_s4 + $0x330] sm:$0xff] }
 0xa4a   :  { %2902 = vmatpush.msra.mxu1 %v3707_v22  ;;  %2942 = vmatpush.msra.mxu3 %v3708_v39  ;;  %v3748_v22 = vld [vmem:[%s8348_s4 + $0x338] sm:$0xff]  ;;  %v3749_v39 = vld [vmem:[%s8348_s4 + $0x220] sm:$0xff] }
 0xa4b   :  { %2883 = vmatpush.msra.mxu0 %v3709_v4  ;;  %2923 = vmatpush.msra.mxu2 %v3710_v5  ;;  %v3750_v4 = vld [vmem:[%s8348_s4 + $0x228] sm:$0xff]  ;;  %v3751_v5 = vld [vmem:[%s8348_s4 + $0x320] sm:$0xff] }
 0xa4c   :  { %2903 = vmatpush.msra.mxu1 %v3711_v25  ;;  %2943 = vmatpush.msra.mxu3 %v3712_v26  ;;  %v3752_v25 = vld [vmem:[%s8348_s4 + $0x328] sm:$0xff]  ;;  %v3753_v26 = vld [vmem:[%s8348_s4 + $0x210] sm:$0xff] }
 0xa4d   :  { %2884 = vmatpush.msra.mxu0 %v3713_v7  ;;  %2924 = vmatpush.msra.mxu2 %v3714_v9  ;;  %v3754_v7 = vld [vmem:[%s8348_s4 + $0x218] sm:$0xff]  ;;  %v3755_v9 = vld [vmem:[%s8348_s4 + $0x310] sm:$0xff] }
 0xa4e   :  { %2904 = vmatpush.msra.mxu1 %v3715_v28  ;;  %2944 = vmatpush.msra.mxu3 %v3716_v38  ;;  %v3756_v28 = vld [vmem:[%s8348_s4 + $0x318] sm:$0xff]  ;;  %v3757_v38 = vld [vmem:[%s8348_s4 + $0x200] sm:$0xff] }
 0xa4f   :  { %2885 = vmatpush.msra.mxu0 %v3717_v29  ;;  %2925 = vmatpush.msra.mxu2 %v3718_v58  ;;  %v3758_v29 = vld [vmem:[%s8348_s4 + $0x208] sm:$0xff]  ;;  %v3759_v58 = vld [vmem:[%s8348_s4 + $0x300] sm:$0xff] }
 0xa50   :  { %2905 = vmatpush.msra.mxu1 %v3719_v17  ;;  %2945 = vmatpush.msra.mxu3 %v3720_v10  ;;  %v3760_v17 = vld [vmem:[%s8348_s4 + $0x308] sm:$0xff] }
 0xa51   :  { %2886 = vmatpush.msra.mxu0 %v3721_v30  ;;  %2926 = vmatpush.msra.mxu2 %v3722_v31 }
 0xa52   :  { %2906 = vmatpush.msra.mxu1 %v3723_v33  ;;  %2946 = vmatpush.msra.mxu3 %v3724_v48 }
 0xa53   :  { %2887 = vmatpush.msra.mxu0 %v3725_v3  ;;  %2927 = vmatpush.msra.mxu2 %v3726_v15 }
 0xa54   :  { %2907 = vmatpush.msra.mxu1 %v3727_v62  ;;  %2947 = vmatpush.msra.mxu3 %v3728_v37 }
 0xa55   :  { %2888 = vmatpush.msra.mxu0 %v3729_v34  ;;  %2928 = vmatpush.msra.mxu2 %v3730_v51 }
 0xa56   :  { %2908 = vmatpush.msra.mxu1 %v3731_v60  ;;  %2948 = vmatpush.msra.mxu3 %v3732_v20 }
 0xa57   :  { %2889 = vmatpush.msra.mxu0 %v3733_v52  ;;  %2929 = vmatpush.msra.mxu2 %v3734_v43 }
 0xa58   :  { %2909 = vmatpush.msra.mxu1 %v3735_v53  ;;  %2949 = vmatpush.msra.mxu3 %v3736_v44 }
 0xa59   :  { %2890 = vmatpush.msra.mxu0 %v3737_v13  ;;  %2930 = vmatpush.msra.mxu2 %v3738_v56 }
 0xa5a   :  { %2910 = vmatpush.msra.mxu1 %v3739_v46  ;;  %2950 = vmatpush.msra.mxu3 %v3740_v57 }
 0xa5b   :  { %2891 = vmatpush.msra.mxu0 %v3741_v32  ;;  %2931 = vmatpush.msra.mxu2 %v3742_v12  ;;  %v3764_v12 = vld [vmem:[%s8348_s4 + $0xe8] sm:$0xff] }
 0xa5c   :  { %2911 = vmatpush.msra.mxu1 %v3743_v47  ;;  %2951 = vmatpush.msra.mxu3 %v3744_v50  ;;  %v3765_v50 = vld [vmem:[%s8348_s4 + $0xd0] sm:$0xff] }
 0xa5d   :  { %2892 = vmatpush.msra.mxu0 %v3745_v54  ;;  %2932 = vmatpush.msra.mxu2 %v3746_v55  ;;  %v3766_v54 = vld [vmem:[%s8348_s4 + $0xd8] sm:$0xff]  ;;  %v3767_v55 = vld [vmem:[%s8348_s4 + $0xc0] sm:$0xff] }
 0xa5e   :  { %2912 = vmatpush.msra.mxu1 %v3747_v63  ;;  %2952 = vmatpush.msra.mxu3 %v3748_v22  ;;  %v3768_v63 = vld [vmem:[%s8348_s4 + $0x1f0] sm:$0xff]  ;;  %v3769_v22 = vld [vmem:[%s8348_s4 + $0xc8] sm:$0xff] }
 0xa5f   :  { %2893 = vmatpush.msra.mxu0 %v3749_v39  ;;  %2933 = vmatpush.msra.mxu2 %v3750_v4  ;;  %v3770_v39 = vld [vmem:[%s8348_s4 + $0x1f8] sm:$0xff]  ;;  %v3771_v4 = vld [vmem:[%s8348_s4 + $0xb0] sm:$0xff] }
 0xa60   :  { %2913 = vmatpush.msra.mxu1 %v3751_v5  ;;  %2953 = vmatpush.msra.mxu3 %v3752_v25  ;;  %v3772_v5 = vld [vmem:[%s8348_s4 + $0x1e0] sm:$0xff]  ;;  %v3773_v25 = vld [vmem:[%s8348_s4 + $0xb8] sm:$0xff] }
 0xa61   :  { %2894 = vmatpush.msra.mxu0 %v3753_v26  ;;  %2934 = vmatpush.msra.mxu2 %v3754_v7  ;;  %v3774_v26 = vld [vmem:[%s8348_s4 + $0x1e8] sm:$0xff]  ;;  %v3775_v7 = vld [vmem:[%s8348_s4 + $0xa0] sm:$0xff] }
 0xa62   :  { %2914 = vmatpush.msra.mxu1 %v3755_v9  ;;  %2954 = vmatpush.msra.mxu3 %v3756_v28  ;;  %v3776_v9 = vld [vmem:[%s8348_s4 + $0x1d0] sm:$0xff]  ;;  %v3777_v28 = vld [vmem:[%s8348_s4 + $0xa8] sm:$0xff] }
 0xa63   :  { %2895 = vmatpush.msra.mxu0 %v3757_v38  ;;  %2935 = vmatpush.msra.mxu2 %v3758_v29  ;;  %v3778_v38 = vld [vmem:[%s8348_s4 + $0x1d8] sm:$0xff]  ;;  %v3779_v29 = vld [vmem:[%s8348_s4 + $0x90] sm:$0xff] }
 0xa64   :  { %2915 = vmatpush.msra.mxu1 %v3759_v58  ;;  %2955 = vmatpush.msra.mxu3 %v3760_v17  ;;  %v3780_v58 = vld [vmem:[%s8348_s4 + $0x1c0] sm:$0xff]  ;;  %v3781_v17 = vld [vmem:[%s8348_s4 + $0x98] sm:$0xff] }
 0xa7c   :  { %v2539_v10 = vpop.f32.mrf.mxu0 }
 0xa7d   :  { %v2559_v30 = vpop.f32.mrf.mxu1 }
 0xa7e   :  { %v2560_v31 = vadd.f32 %v2559_v30, %v2539_v10  ;;  %v3782_v10 = vld [vmem:[%s8348_s4 + $0x1c8] sm:$0xff]  ;;  %v3783_v30 = vld [vmem:[%s8348_s4 + $0x80] sm:$0xff] }
 0xa80   :  { %v8104_v33 = vadd.f32 %v2560_v31, %v7121_v45  ;;  %v2226_v45 = vadd.f32 %v7291_v36, %v7293_v40  ;;  %v3761_v36 = vld [vmem:[%s8348_s4 + $0xf0] sm:$0xff]  ;;  %v3763_v40 = vld [vmem:[%s8348_s4 + $0xe0] sm:$0xff] }
 0xa81   :  { %v3784_v31 = vld [vmem:[%s8348_s4 + $0x1b0] sm:$0xff] }
 0xa82   :  { %v2579_v48 = vpop.f32.mrf.mxu2 }
 0xa83   :  { %v2599_v3 = vpop.f32.mrf.mxu3 }
 0xa84   :  { %v2600_v15 = vadd.f32 %v2599_v3, %v2579_v48  ;;  %v3785_v48 = vld [vmem:[%s8348_s4 + $0x88] sm:$0xff]  ;;  %v3786_v3 = vld [vmem:[%s8348_s4 + $0x1b8] sm:$0xff] }
 0xa86   :  { %v8107_v62 = vadd.f32 %v2600_v15, %v7141_v0  ;;  %v2619_v37 = vpop.f32.mrf.mxu0  ;;  %v2639_v34 = vpop.f32.mrf.mxu1  ;;  %v3787_v15 = vld [vmem:[%s8348_s4 + $0x70] sm:$0xff] }
 0xa87   :  { %v2640_v51 = vadd.f32 %v2639_v34, %v2619_v37  ;;  %v3788_v37 = vld [vmem:[%s8348_s4 + $0x1a0] sm:$0xff]  ;;  %v3789_v34 = vld [vmem:[%s8348_s4 + $0x78] sm:$0xff] }
 0xa89   :  { %v2764_v60 = vadd.f32 %v2640_v51, %v7227_v8  ;;  %v3790_v51 = vld [vmem:[%s8348_s4 + $0x1a8] sm:$0xff] }
 0xa8b   :  { %v2768_v20 = vadd.f32 %v2764_v60, %v1626_v24  ;;  %v3791_v60 = vld [vmem:[%s8348_s4 + $0x60] sm:$0xff] }
 0xa8d   :  { %v2772_v52 = vmul.f32 0.5, %v2768_v20  ;;  %v2659_v43 = vpop.f32.mrf.mxu2  ;;  %v2679_v53 = vpop.f32.mrf.mxu3  ;;  %v3792_v20 = vld [vmem:[%s8348_s4 + $0x190] sm:$0xff] }
 0xa8e   :  { %v2680_v44 = vadd.f32 %v2679_v53, %v2659_v43  ;;  %v3794_v43 = vld [vmem:[%s8348_s4 + $0x198] sm:$0xff]  ;;  %v3795_v53 = vld [vmem:[%s8348_s4 + $0x50] sm:$0xff] }
 0xa8f   :  { %3124 = vtanh.f32 %v2772_v52  ;;  %v3793_v52 = vld [vmem:[%s8348_s4 + $0x68] sm:$0xff] }
 0xa90   :  { %v2765_v13 = vadd.f32 %v2680_v44, %v2226_v45  ;;  %v3796_v45 = vld [vmem:[%s8348_s4 + $0x180] sm:$0xff]  ;;  %v3797_v44 = vld [vmem:[%s8348_s4 + $0x58] sm:$0xff] }
 0xa92   :  { %v2769_v0 = vadd.f32 %v2765_v13, %v1627_v49  ;;  %v3798_v13 = vld [vmem:[%s8348_s4 + $0x188] sm:$0xff] }
 0xa94   :  { %v2773_v56 = vmul.f32 0.5, %v2769_v0  ;;  %v3799_v0 = vld [vmem:[%s8348_s4 + $0x40] sm:$0xff] }
 0xa95   :  { %v3125_v46 = vpop.eup %3124 }
 0xa96   :  { %v2780_v57 = vadd.f32 1.0, %v3125_v46  ;;  %3126 = vtanh.f32 %v2773_v56  ;;  %v3800_v56 = vld [vmem:[%s8348_s4 + $0x170] sm:$0xff]  ;;  %v3801_v46 = vld [vmem:[%s8348_s4 + $0x48] sm:$0xff] }
 0xa98   :  { %v2784_v8 = vmul.f32 0.5, %v2780_v57  ;;  %v3802_v57 = vld [vmem:[%s8348_s4 + $0x178] sm:$0xff] }
 0xa9a   :  { %v2786_v14 = vmul.f32 %v2784_v8, %v6539_v16  ;;  %v3803_v8 = vld [vmem:[%s8348_s4 + $0x30] sm:$0xff] }
 0xa9c   :  { %v3127_v24 = vpop.eup %3126  ;;  %2804 = vmatmul.f32.vlgmr.msrb.gmra.mxu0 %v2786_v14  ;;  %2844 = vmatmul.f32.vlgmr.msrb.gmra.mxu2 %v2786_v14  ;;  %v3804_v14 = vld [vmem:[%s8348_s4 + $0x160] sm:$0xff] }
 0xa9d   :  { %v2781_v32 = vadd.f32 1.0, %v3127_v24  ;;  %2960 = vmatpush.msrb.mxu0 %v3761_v36  ;;  %3000 = vmatpush.msrb.mxu2 %v3762_v18  ;;  %v3805_v24 = vld [vmem:[%s8348_s4 + $0x38] sm:$0xff]  ;;  %v3807_v36 = vld [vmem:[%s8348_s4 + $0x20] sm:$0xff]  ;;  %v3808_v18 = vld [vmem:[%s8348_s4 + $0x150] sm:$0xff] }
 0xa9f   :  { %v2785_v49 = vmul.f32 0.5, %v2781_v32  ;;  %2961 = vmatpush.msrb.mxu0 %v3763_v40  ;;  %3001 = vmatpush.msrb.mxu2 %v3764_v12  ;;  %v3806_v32 = vld [vmem:[%s8348_s4 + $0x168] sm:$0xff]  ;;  %v3810_v40 = vld [vmem:[%s8348_s4 + $0x158] sm:$0xff]  ;;  %v3811_v12 = vld [vmem:[%s8348_s4 + $0x10] sm:$0xff] }
 0xaa1   :  { %v2787_v47 = vmul.f32 %v2785_v49, %v6558_v2  ;;  %2962 = vmatpush.msrb.mxu0 %v3765_v50  ;;  %3002 = vmatpush.msrb.mxu2 %v3766_v54  ;;  %v3809_v49 = vld [vmem:[%s8348_s4 + $0x28] sm:$0xff]  ;;  %v3813_v50 = vld [vmem:[%s8348_s4 + $0x18] sm:$0xff] }
 0xaa2   :  { %v3814_v54 = vld [vmem:[%s8348_s4 + $0x148] sm:$0xff] }
 0xaa3   :  { %2824 = vmatmul.f32.vlgmr.msrb.gmra.mxu1 %v2787_v47  ;;  %2864 = vmatmul.f32.vlgmr.msrb.gmra.mxu3 %v2787_v47  ;;  %v3812_v47 = vld [vmem:[%s8348_s4 + $0x140] sm:$0xff] }
 0xaa4   :  { %2963 = vmatpush.msrb.mxu0 %v3767_v55  ;;  %2980 = vmatpush.msrb.mxu1 %v3768_v63  ;;  %v3815_v55 = vld [vmem:[%s8348_s4] sm:$0xff]  ;;  %v3816_v63 = vld [vmem:[%s8348_s4 + $0x130] sm:$0xff] }
 0xaa5   :  { %3003 = vmatpush.msrb.mxu2 %v3769_v22  ;;  %3020 = vmatpush.msrb.mxu3 %v3770_v39  ;;  %v3817_v22 = vld [vmem:[%s8348_s4 + $0x8] sm:$0xff]  ;;  %v3818_v39 = vld [vmem:[%s8348_s4 + $0x138] sm:$0xff] }
 0xaa6   :  { %2964 = vmatpush.msrb.mxu0 %v3771_v4  ;;  %2981 = vmatpush.msrb.mxu1 %v3772_v5  ;;  %v3819_v4 = vld [vmem:[%s8348_s4 + $0x120] sm:$0xff]  ;;  %v3820_v5 = vld [vmem:[%s8348_s4 + $0x128] sm:$0xff] }
 0xaa7   :  { %3004 = vmatpush.msrb.mxu2 %v3773_v25  ;;  %3021 = vmatpush.msrb.mxu3 %v3774_v26  ;;  %v3821_v25 = vld [vmem:[%s8348_s4 + $0x110] sm:$0xff]  ;;  %v3822_v26 = vld [vmem:[%s8348_s4 + $0x118] sm:$0xff] }
 0xaa8   :  { %2965 = vmatpush.msrb.mxu0 %v3775_v7  ;;  %2982 = vmatpush.msrb.mxu1 %v3776_v9  ;;  %v3823_v7 = vld [vmem:[%s8348_s4 + $0x100] sm:$0xff]  ;;  %v3824_v9 = vld [vmem:[%s8348_s4 + $0x108] sm:$0xff] }
 0xaa9   :  { %3005 = vmatpush.msrb.mxu2 %v3777_v28  ;;  %3022 = vmatpush.msrb.mxu3 %v3778_v38  ;;  %v2766_v28 = vadd.f32 %v8104_v33, %v1624_v11 }
 0xaaa   :  { %2966 = vmatpush.msrb.mxu0 %v3779_v29  ;;  %2983 = vmatpush.msrb.mxu1 %v3780_v58  ;;  %v2699_v29 = vpop.f32.mrf.mxu0  ;;  %v2767_v58 = vadd.f32 %v8107_v62, %v1625_v42 }
 0xaab   :  { %3006 = vmatpush.msrb.mxu2 %v3781_v17  ;;  %3023 = vmatpush.msrb.mxu3 %v3782_v10  ;;  %v2770_v38 = vmul.f32 0.5, %v2766_v28  ;;  %v2719_v17 = vpop.f32.mrf.mxu1 }
 0xaac   :  { %2967 = vmatpush.msrb.mxu0 %v3783_v30  ;;  %2984 = vmatpush.msrb.mxu1 %v3784_v31  ;;  %v2771_v10 = vmul.f32 0.5, %v2767_v58  ;;  %v2739_v30 = vpop.f32.mrf.mxu2 }
 0xaad   :  { %3007 = vmatpush.msrb.mxu2 %v3785_v48  ;;  %3024 = vmatpush.msrb.mxu3 %v3786_v3  ;;  %3128 = vtanh.f32 %v2770_v38  ;;  %v2720_v3 = vadd.f32 %v2719_v17, %v2699_v29 }
 0xaae   :  { %2968 = vmatpush.msrb.mxu0 %v3787_v15  ;;  %2985 = vmatpush.msrb.mxu1 %v3788_v37  ;;  %3130 = vtanh.f32 %v2771_v10  ;;  %v2268_v15 = vadd.f32 %v7044_v6, %v1084_v27  ;;  %v2759_v37 = vpop.f32.mrf.mxu3 }
 0xaaf   :  { %3008 = vmatpush.msrb.mxu2 %v3789_v34  ;;  %3025 = vmatpush.msrb.mxu3 %v3790_v51  ;;  %v2760_v62 = vadd.f32 %v2759_v37, %v2739_v30 }
 0xab0   :  { %2969 = vmatpush.msrb.mxu0 %v3791_v60  ;;  %2986 = vmatpush.msrb.mxu1 %v3792_v20  ;;  %v2272_v60 = vmin.f32 %v2268_v15, 0.0  ;;  %vm2270_vm4 = vcmp.gt.f32.partialorder %v2268_v15, 0.0 }
 0xab1   :  { %3009 = vmatpush.msrb.mxu2 %v3793_v52  ;;  %3026 = vmatpush.msrb.mxu3 %v3794_v43  ;;  %v2269_v43 = vadd.f32 %v7046_v59, %v1085_v61 }
 0xab2   :  { %2970 = vmatpush.msrb.mxu0 %v3795_v53  ;;  %2987 = vmatpush.msrb.mxu1 %v3796_v45  ;;  %v2274_v27 = vmul.f32 1.442695, %v2272_v60 }
 0xab3   :  { %3010 = vmatpush.msrb.mxu2 %v3797_v44  ;;  %3027 = vmatpush.msrb.mxu3 %v3798_v13  ;;  %v3129_v48 = vpop.eup %3128  ;;  %vm2271_vm5 = vcmp.gt.f32.partialorder %v2269_v43, 0.0 }
 0xab4   :  { %2971 = vmatpush.msrb.mxu0 %v3799_v0  ;;  %2988 = vmatpush.msrb.mxu1 %v3800_v56  ;;  %v2778_v33 = vadd.f32 1.0, %v3129_v48  ;;  %v3131_v42 = vpop.eup %3130  ;;  %v2273_v0 = vmin.f32 %v2269_v43, 0.0 }
 0xab5   :  { %3011 = vmatpush.msrb.mxu2 %v3801_v46  ;;  %3028 = vmatpush.msrb.mxu3 %v3802_v57  ;;  %v2779_v6 = vadd.f32 1.0, %v3131_v42 }
 0xab6   :  { %2972 = vmatpush.msrb.mxu0 %v3803_v8  ;;  %2989 = vmatpush.msrb.mxu1 %v3804_v14  ;;  %v2782_v53 = vmul.f32 0.5, %v2778_v33 }
 0xab7   :  { %3012 = vmatpush.msrb.mxu2 %v3805_v24  ;;  %3029 = vmatpush.msrb.mxu3 %v3806_v32  ;;  %v2783_v57 = vmul.f32 0.5, %v2779_v6 }
 0xab8   :  { %2973 = vmatpush.msrb.mxu0 %v3807_v36  ;;  %2990 = vmatpush.msrb.mxu1 %v3808_v18  ;;  %v2872_v56 = vsub.f32 1.0, %v2782_v53 }
 0xab9   :  { %3013 = vmatpush.msrb.mxu2 %v3809_v49  ;;  %3030 = vmatpush.msrb.mxu3 %v3810_v40  ;;  %v2873_v59 = vsub.f32 1.0, %v2783_v57 }
 0xaba   :  { %2974 = vmatpush.msrb.mxu0 %v3811_v12  ;;  %2991 = vmatpush.msrb.mxu1 %v3812_v47  ;;  %v2874_v14 = vmul.f32 %v2872_v56, %v6539_v16 }
 0xabb   :  { %3014 = vmatpush.msrb.mxu2 %v3813_v50  ;;  %3031 = vmatpush.msrb.mxu3 %v3814_v54  ;;  %v2875_v18 = vmul.f32 %v2873_v59, %v6558_v2 }
 0xabc   :  { %2975 = vmatpush.msrb.mxu0 %v3815_v55  ;;  %2992 = vmatpush.msrb.mxu1 %v3816_v63 }
 0xabd   :  { %3015 = vmatpush.msrb.mxu2 %v3817_v22  ;;  %3032 = vmatpush.msrb.mxu3 %v3818_v39 }
 0xabe   :  { %2993 = vmatpush.msrb.mxu1 %v3819_v4 }
 0xabf   :  { %3033 = vmatpush.msrb.mxu3 %v3820_v5 }
 0xac0   :  { %2994 = vmatpush.msrb.mxu1 %v3821_v25 }
 0xac1   :  { %3034 = vmatpush.msrb.mxu3 %v3822_v26 }
 0xac2   :  { %2995 = vmatpush.msrb.mxu1 %v3823_v7 }
 0xac3   :  { %3035 = vmatpush.msrb.mxu3 %v3824_v9 }
 0xb19   :  { %v2805_v31 = vpop.f32.mrf.mxu0 }
 0xb1a   :  { %v2806_v11 = vadd.f32 %v2805_v31, %v2720_v3 }
 0xb1f   :  { %v2845_v20 = vpop.f32.mrf.mxu2 }
 0xb20   :  { %v2825_v34 = vpop.f32.mrf.mxu1  ;;  %v2846_v45 = vadd.f32 %v2845_v20, %v2760_v62 }
 0xb21   :  { %v2826_v51 = vadd.f32 %v2825_v34, %v2806_v11 }
 0xb23   :  { %v2868_v52 = vadd.f32 %v2826_v51, %v1730_v19  ;;  %v2276_v19 = vmul.f32 1.442695, %v2273_v0 }
 0xb25   :  { %3132 = vtanh.f32 %v2868_v52 }
 0xb26   :  { %v2865_v44 = vpop.f32.mrf.mxu3  ;;  %3134 = vpow2.f32 %v2274_v27 }
 0xb27   :  { %v2866_v13 = vadd.f32 %v2865_v44, %v2846_v45 }
 0xb29   :  { %v2869_v46 = vadd.f32 %v2866_v13, %v1731_v23 }
 0xb2b   :  { %v3133_v8 = vpop.eup %3132  ;;  %3136 = vtanh.f32 %v2869_v46 }
 0xb2c   :  { %v2876_v61 = vmul.f32 %v3133_v8, %v2782_v53  ;;  %v3135_v32 = vpop.eup %3134  ;;  %3138 = vpow2.f32 %v2276_v19 }
 0xb2d   :  { %v3064_v40 = vadd.f32 -1.0, %v3135_v32 }
 0xb2e   :  { %v2878_v24 = vadd.f32 %v2876_v61, %v2874_v14 }
 0xb2f   :  { %v2280_v47 = vsel %vm2270_vm4, %v2268_v15, %v3064_v40 }
 0xb30   :  { %2896 = vmatmul.f32.vlgmr.msra.gmra.mxu0 %v2878_v24  ;;  %2936 = vmatmul.f32.vlgmr.msra.gmra.mxu2 %v2878_v24 }
 0xb31   :  { %v3137_v36 = vpop.eup %3136 }
 0xb32   :  { %v2877_v49 = vmul.f32 %v3137_v36, %v2783_v57  ;;  %v3139_v12 = vpop.eup %3138 }
 0xb33   :  { %v3065_v16 = vadd.f32 -1.0, %v3139_v12 }
 0xb34   :  { %v2879_v23 = vadd.f32 %v2877_v49, %v2875_v18 }
 0xb35   :  { %v2281_v50 = vsel %vm2271_vm5, %v2269_v43, %v3065_v16 }
 0xb36   :  { %2916 = vmatmul.f32.vlgmr.msra.gmra.mxu1 %v2879_v23  ;;  %2956 = vmatmul.f32.vlgmr.msra.gmra.mxu3 %v2879_v23 }
 0xb38   :  { %2976 = vmatmul.f32.vlgmr.msrb.gmra.mxu0 %v2280_v47  ;;  %3016 = vmatmul.f32.vlgmr.msrb.gmra.mxu2 %v2280_v47 }
 0xb3e   :  { %2996 = vmatmul.f32.vlgmr.msrb.gmra.mxu1 %v2281_v50  ;;  %3036 = vmatmul.f32.vlgmr.msrb.gmra.mxu3 %v2281_v50 }
 0xbad   :  { %v2897_v54 = vpop.f32.mrf.mxu0 }
 0xbb3   :  { %v2917_v55 = vpop.f32.mrf.mxu1  ;;  %v2937_v63 = vpop.f32.mrf.mxu2 }
 0xbb4   :  { %v2918_v22 = vadd.f32 %v2917_v55, %v2897_v54 }
 0xbb5   :  { %v2977_v2 = vpop.f32.mrf.mxu0 }
 0xbb6   :  { %v2978_v4 = vadd.f32 %v2977_v2, %v2918_v22 }
 0xbb9   :  { %v2957_v39 = vpop.f32.mrf.mxu3 }
 0xbba   :  { %v2958_v25 = vadd.f32 %v2957_v39, %v2937_v63 }
 0xbbb   :  { %v2997_v5 = vpop.f32.mrf.mxu1  ;;  %v3017_v7 = vpop.f32.mrf.mxu2 }
 0xbbc   :  { %v2998_v26 = vadd.f32 %v2997_v5, %v2978_v4  ;;  %v3018_v28 = vadd.f32 %v3017_v7, %v2958_v25 }
 0xbbe   :  { %v3040_v9 = vadd.f32 %v2998_v26, %v1904_v1 }
 0xbc0   :  { %3042 = vst [vmem:[%s8349_s11] sm:$0xff] %v3040_v9 }
 0xbc1   :  { %v3037_v38 = vpop.f32.mrf.mxu3 }
 0xbc2   :  { %v3038_v29 = vadd.f32 %v3037_v38, %v3018_v28 }
 0xbc4   :  { %v3041_v58 = vadd.f32 %v3038_v29, %v1905_v21 }
 0xbc6   :  { %3043 = vst [vmem:[%s8349_s11 + $0x8] sm:$0xff] %v3041_v58 }

</bundles_post_ra>
